<compile_context>
chip_gen: v5e
topology: v5e:2x2
jax: 0.10.0
libtpu: 0.0.40
codegen_flags: <defaults>
</compile_context>

<pallas_src>
import functools

import numpy as np
import jax
import jax.numpy as jnp
from jax import lax
from jax.experimental import pallas as pl
from jax.experimental.pallas import tpu as pltpu

K = 4                      # conv kernel size (all three convs)
C1, C2, C3 = 32, 64, 96    # conv channel widths
FEATURE_FLATTEN_DIM = C3
NUM_CLASSES = 10           # stand-in for Simulated_Opt['num_classes']
HIDDEN = 1024


# ---------------------------------------------------------------------------
# Fused kernel: single invocation, static unroll over available modalities.
# ---------------------------------------------------------------------------
def _fused_kernel(x_ref, w1_ref, b1_ref, w2_ref, b2_ref, w3_ref, b3_ref,
                  fw1_ref, fb1_ref, fw2t_ref, fb2_ref, o_ref,
                  *, M, B, L, Lp):
    L3 = L - 3 * (K - 1)          # valid length after 3 VALID convs
    BLp = B * Lp

    def roll_up(h, k):
        # out[j] = h[j + k] (wrap-around).  Wrapped rows land at global
        # positions >= BLp - k; valid pooled rows only ever depend on rows
        # <= b*Lp + L - 1 <= BLp - 4 for K=4, so wraps are never read.
        if k == 0:
            return h
        return pltpu.roll(h, shift=h.shape[0] - k, axis=0)

    pooled_list = []
    for m in range(M):                                      # static unroll
        # ---- conv1 (Cin=1) + ReLU : VPU multiply-add over K taps ----------
        xb = jnp.broadcast_to(x_ref[m], (BLp, C1))          # hoisted broadcast
        w1 = w1_ref[m]                                      # (K, C1)
        acc1 = xb * w1[0]
        for k in range(1, K):
            acc1 = acc1 + roll_up(xb, k) * w1[k]
        h1 = jnp.maximum(acc1 + b1_ref[m], 0.0)             # (BLp, C1) f32

        # ---- conv2 + ReLU : im2col (BLp,128)@bf16(128,64), f32 acc --------
        slab2 = jnp.concatenate([roll_up(h1, k) for k in range(K)], axis=1)
        h2 = jnp.dot(slab2.astype(jnp.bfloat16), w2_ref[m],
                     preferred_element_type=jnp.float32)
        h2 = jnp.maximum(h2 + b2_ref[m], 0.0)               # (BLp, C2)

        # ---- conv3 + ReLU : im2col (BLp,256)@bf16(256,96), f32 acc --------
        slab3 = jnp.concatenate([roll_up(h2, k) for k in range(K)], axis=1)
        h3 = jnp.dot(slab3.astype(jnp.bfloat16), w3_ref[m],
                     preferred_element_type=jnp.float32)
        h3 = jnp.maximum(h3 + b3_ref[m], 0.0)               # (BLp, C3)

        # ---- AdaptiveMaxPool1d(1): one masked max over the valid window ---
        h3r = h3.reshape(B, Lp, C3)                         # Lp % 8 == 0
        row = lax.broadcasted_iota(jnp.int32, (B, Lp, C3), 1)
        h3m = jnp.where(row < L3, h3r, 0.0)                 # 0 safe post-ReLU
        pooled_list.append(jnp.max(h3m, axis=1))            # (B, C3) f32

    # ---- classifier: one deep-contraction dot over all modalities ---------
    feat = jnp.concatenate(pooled_list, axis=1)             # (B, M*C3)
    h = jnp.dot(feat.astype(jnp.bfloat16), fw1_ref[...],
                preferred_element_type=jnp.float32)
    h = jnp.maximum(h + fb1_ref[...], 0.0)                  # (B, HIDDEN)
    logits = lax.dot_general(h.astype(jnp.bfloat16), fw2t_ref[...],
                             dimension_numbers=(((1,), (1,)), ((), ())),
                             preferred_element_type=jnp.float32)
    o_ref[...] = logits + fb2_ref[...]                      # (B, NUM_CLASSES)


def fused_forward(x_flat, w1, b1, w2b, b2, w3b, b3, fw1b, fb1, fw2t, fb2,
                  *, B, L, Lp):
    M = x_flat.shape[0]
    BLp = B * Lp
    kernel = functools.partial(_fused_kernel, M=M, B=B, L=L, Lp=Lp)
    return pl.pallas_call(
        kernel,
        out_shape=jax.ShapeDtypeStruct((B, NUM_CLASSES), jnp.float32),
        grid=(1,),
        in_specs=[
            pl.BlockSpec((M, BLp, 1), lambda i: (0, 0, 0)),        # x
            pl.BlockSpec((M, K, C1), lambda i: (0, 0, 0)),         # w1 (f32)
            pl.BlockSpec((M, 1, C1), lambda i: (0, 0, 0)),         # b1
            pl.BlockSpec((M, K * C1, C2), lambda i: (0, 0, 0)),    # w2 im2col bf16
            pl.BlockSpec((M, 1, C2), lambda i: (0, 0, 0)),         # b2
            pl.BlockSpec((M, K * C2, C3), lambda i: (0, 0, 0)),    # w3 im2col bf16
            pl.BlockSpec((M, 1, C3), lambda i: (0, 0, 0)),         # b3
            pl.BlockSpec((M * C3, HIDDEN), lambda i: (0, 0)),      # fw1 bf16
            pl.BlockSpec((1, HIDDEN), lambda i: (0, 0)),           # fb1
            pl.BlockSpec((NUM_CLASSES, HIDDEN), lambda i: (0, 0)), # fw2^T bf16
            pl.BlockSpec((1, NUM_CLASSES), lambda i: (0, 0)),      # fb2
        ],
        out_specs=pl.BlockSpec((B, NUM_CLASSES), lambda i: (0, 0)),
        compiler_params=pltpu.CompilerParams(
            dimension_semantics=("arbitrary",)),
    )(x_flat, w1, b1, w2b, b2, w3b, b3, fw1b, fb1, fw2t, fb2)


# ---------------------------------------------------------------------------
# Full model forward (thin XLA glue: gather available modalities, pad length
# to a multiple of 8, collapse (B, L) once, reshape/cast weights).
# ---------------------------------------------------------------------------
def dynamic_model_forward(x, modality_indices, params):
    avail = [i for i, a in enumerate(modality_indices) if a]
    M = len(avail)
    assert M >= 1, "at least one modality must be available"
    B, _, L = x.shape
    assert L >= 3 * (K - 1) + 1, "need L >= 10 so the pooled window is non-empty"
    Lp = ((L + 7) // 8) * 8
    xa = jnp.transpose(x[:, np.array(avail), :], (1, 0, 2))   # (M, B, L)
    if Lp != L:
        xa = jnp.pad(xa, ((0, 0), (0, 0), (0, Lp - L)))
    x_flat = xa.reshape(M, B * Lp, 1)

    w1, b1, w2, b2, w3, b3 = params['enc']
    fw1, fb1, fw2, fb2 = params['cls']
    # im2col weight layout (k-major, cin-minor rows); bf16 for the MXU.
    w2b = w2.reshape(M, K * C1, C2).astype(jnp.bfloat16)
    w3b = w3.reshape(M, K * C2, C3).astype(jnp.bfloat16)
    fw1b = fw1.astype(jnp.bfloat16)                           # (M*C3, HIDDEN)
    fw2t = jnp.transpose(fw2, (1, 0)).astype(jnp.bfloat16)    # (NUM_CLASSES, HIDDEN)
    return fused_forward(x_flat, w1, b1, w2b, b2, w3b, b3,
                         fw1b, fb1, fw2t, fb2, B=B, L=L, Lp=Lp)


# ---------------------------------------------------------------------------
# Deterministic parameter init (synthetic; shapes match the nn.Module).
# Matmul weights are pre-rounded to bf16-representable values so the f32
# reference and the bf16-MXU kernel share identical weight values.
# ---------------------------------------------------------------------------
def init_params(key, M):
    concat_dim = M * FEATURE_FLATTEN_DIM
    ks = jax.random.split(key, 10)
    s = 0.1
    bf = lambda a: a.astype(jnp.bfloat16).astype(jnp.float32)
    w1 = jax.random.normal(ks[0], (M, K, C1), jnp.float32) * s        # [k, cout]
    b1 = jax.random.normal(ks[1], (M, 1, C1), jnp.float32) * s
    w2 = bf(jax.random.normal(ks[2], (M, K, C1, C2), jnp.float32) * s)  # [k, cin, cout]
    b2 = jax.random.normal(ks[3], (M, 1, C2), jnp.float32) * s
    w3 = bf(jax.random.normal(ks[4], (M, K, C2, C3), jnp.float32) * s)
    b3 = jax.random.normal(ks[5], (M, 1, C3), jnp.float32) * s
    fw1 = bf(jax.random.normal(ks[6], (concat_dim, HIDDEN), jnp.float32) * s)
    fb1 = jax.random.normal(ks[7], (1, HIDDEN), jnp.float32) * s
    fw2 = bf(jax.random.normal(ks[8], (HIDDEN, NUM_CLASSES), jnp.float32) * s)
    fb2 = jax.random.normal(ks[9], (1, NUM_CLASSES), jnp.float32) * s
    return {'enc': (w1, b1, w2, b2, w3, b3), 'cls': (fw1, fb1, fw2, fb2)}


# ---------------------------------------------------------------------------
# Pure-JAX/XLA reference (NCW convs, f32 everywhere) for correctness checking
# ---------------------------------------------------------------------------
def ref_forward(x, modality_indices, params):
    avail = [i for i, a in enumerate(modality_indices) if a]
    w1, b1, w2, b2, w3, b3 = params['enc']
    fw1, fb1, fw2, fb2 = params['cls']
    dn = ('NCH', 'OIH', 'NCH')
    feats = []
    for m, idx in enumerate(avail):
        h = x[:, idx, :][:, None, :]                               # (B,1,L)
        tw1 = jnp.transpose(w1[m], (1, 0))[:, None, :]             # (C1,1,K)
        h = lax.conv_general_dilated(h, tw1, (1,), 'VALID', dimension_numbers=dn)
        h = jax.nn.relu(h + b1[m, 0][None, :, None])
        tw2 = jnp.transpose(w2[m], (2, 1, 0))                      # (C2,C1,K)
        h = lax.conv_general_dilated(h, tw2, (1,), 'VALID', dimension_numbers=dn)
        h = jax.nn.relu(h + b2[m, 0][None, :, None])
        tw3 = jnp.transpose(w3[m], (2, 1, 0))                      # (C3,C2,K)
        h = lax.conv_general_dilated(h, tw3, (1,), 'VALID', dimension_numbers=dn)
        h = jax.nn.relu(h + b3[m, 0][None, :, None])
        feats.append(jnp.max(h, axis=2))                           # (B,C3)
    feat = jnp.concatenate(feats, axis=1)
    h = jax.nn.relu(feat @ fw1 + fb1[0])
    return h @ fw2 + fb2[0]


if __name__ == "__main__":
    modality_indices = [True, True, False, True]   # 3 available of 4 modalities
    B, L = 2, 32
    total = len(modality_indices)
    M = sum(modality_indices)

    key = jax.random.PRNGKey(0)
    kx, kp = jax.random.split(key)
    x = jax.random.normal(kx, (B, total, L), jnp.float32)
    params = init_params(kp, M)

    out = dynamic_model_forward(x, modality_indices, params)
    out = jax.block_until_ready(out)

    ref = ref_forward(x, modality_indices, params)
    assert out.shape == (B, NUM_CLASSES)
    # Kernel uses bf16 MXU operands (f32 accumulation); reference is full f32
    # with identical (bf16-representable) weights -> loosen tolerance.
    np.testing.assert_allclose(np.asarray(out), np.asarray(ref),
                               rtol=2e-2, atol=5e-2)
    print("KERNEL_OK")
</pallas_src>

<mosaic_0001>
module attributes {stable_mosaic.version = 11 : i64} {
  func.func @_fused_kernel(%arg0: i32, %arg1: memref<3x64x1xf32, #tpu.memory_space<vmem>>, %arg2: memref<3x4x32xf32, #tpu.memory_space<vmem>>, %arg3: memref<3x1x32xf32, #tpu.memory_space<vmem>>, %arg4: memref<3x128x64xbf16, #tpu.memory_space<vmem>>, %arg5: memref<3x1x64xf32, #tpu.memory_space<vmem>>, %arg6: memref<3x256x96xbf16, #tpu.memory_space<vmem>>, %arg7: memref<3x1x96xf32, #tpu.memory_space<vmem>>, %arg8: memref<288x1024xbf16, #tpu.memory_space<vmem>>, %arg9: memref<1x1024xf32, #tpu.memory_space<vmem>>, %arg10: memref<10x1024xbf16, #tpu.memory_space<vmem>>, %arg11: memref<1x10xf32, #tpu.memory_space<vmem>>, %arg12: memref<2x10xf32, #tpu.memory_space<vmem>>) attributes {dimension_semantics = [#tpu.dimension_semantics<arbitrary>], iteration_bounds = array<i64: 1>, scalar_prefetch = 0 : i64, scratch_operands = 0 : i64, tpu.core_type = #tpu.core_type<tc>, window_params = [{pipeline_mode = #tpu.pipeline_mode<synchronous>, transform_indices = @transform_0, window_bounds = array<i64: 3, 64, 1>}, {pipeline_mode = #tpu.pipeline_mode<synchronous>, transform_indices = @transform_1, window_bounds = array<i64: 3, 4, 32>}, {pipeline_mode = #tpu.pipeline_mode<synchronous>, transform_indices = @transform_2, window_bounds = array<i64: 3, 1, 32>}, {pipeline_mode = #tpu.pipeline_mode<synchronous>, transform_indices = @transform_3, window_bounds = array<i64: 3, 128, 64>}, {pipeline_mode = #tpu.pipeline_mode<synchronous>, transform_indices = @transform_4, window_bounds = array<i64: 3, 1, 64>}, {pipeline_mode = #tpu.pipeline_mode<synchronous>, transform_indices = @transform_5, window_bounds = array<i64: 3, 256, 96>}, {pipeline_mode = #tpu.pipeline_mode<synchronous>, transform_indices = @transform_6, window_bounds = array<i64: 3, 1, 96>}, {pipeline_mode = #tpu.pipeline_mode<synchronous>, transform_indices = @transform_7, window_bounds = array<i64: 288, 1024>}, {pipeline_mode = #tpu.pipeline_mode<synchronous>, transform_indices = @transform_8, window_bounds = array<i64: 1, 1024>}, {pipeline_mode = #tpu.pipeline_mode<synchronous>, transform_indices = @transform_9, window_bounds = array<i64: 10, 1024>}, {pipeline_mode = #tpu.pipeline_mode<synchronous>, transform_indices = @transform_10, window_bounds = array<i64: 1, 10>}, {pipeline_mode = #tpu.pipeline_mode<synchronous>, transform_indices = @transform_11, window_bounds = array<i64: 2, 10>}]} {
    %c0 = arith.constant 0 : index
    %c0_0 = arith.constant 0 : index
    %c0_1 = arith.constant 0 : index
    %0 = vector.load %arg1[%c0, %c0_0, %c0_1] : memref<3x64x1xf32, #tpu.memory_space<vmem>>, vector<1x64x1xf32>
    %1 = vector.shape_cast %0 : vector<1x64x1xf32> to vector<64x1xf32>
    %2 = vector.shape_cast %1 : vector<64x1xf32> to vector<64x1xf32>
    %3 = vector.broadcast %2 : vector<64x1xf32> to vector<64x32xf32>
    %c0_2 = arith.constant 0 : index
    %c0_3 = arith.constant 0 : index
    %c0_4 = arith.constant 0 : index
    %4 = vector.load %arg2[%c0_2, %c0_3, %c0_4] : memref<3x4x32xf32, #tpu.memory_space<vmem>>, vector<1x4x32xf32>
    %5 = vector.shape_cast %4 : vector<1x4x32xf32> to vector<4x32xf32>
    %6 = vector.extract_strided_slice %5 {offsets = [0, 0], sizes = [1, 32], strides = [1, 1]} : vector<4x32xf32> to vector<1x32xf32>
    %7 = vector.shape_cast %6 : vector<1x32xf32> to vector<32xf32>
    %8 = vector.shape_cast %7 : vector<32xf32> to vector<1x32xf32>
    %9 = vector.broadcast %8 : vector<1x32xf32> to vector<64x32xf32>
    %10 = arith.mulf %3, %9 : vector<64x32xf32>
    %c63_i32 = arith.constant 63 : i32
    %11 = tpu.dynamic_rotate %3 by %c63_i32 dim 0 : vector<64x32xf32>, i32 -> vector<64x32xf32>
    %12 = vector.extract_strided_slice %5 {offsets = [1, 0], sizes = [1, 32], strides = [1, 1]} : vector<4x32xf32> to vector<1x32xf32>
    %13 = vector.shape_cast %12 : vector<1x32xf32> to vector<32xf32>
    %14 = vector.shape_cast %13 : vector<32xf32> to vector<1x32xf32>
    %15 = vector.broadcast %14 : vector<1x32xf32> to vector<64x32xf32>
    %16 = arith.mulf %11, %15 : vector<64x32xf32>
    %17 = arith.addf %10, %16 : vector<64x32xf32>
    %c62_i32 = arith.constant 62 : i32
    %18 = tpu.dynamic_rotate %3 by %c62_i32 dim 0 : vector<64x32xf32>, i32 -> vector<64x32xf32>
    %19 = vector.extract_strided_slice %5 {offsets = [2, 0], sizes = [1, 32], strides = [1, 1]} : vector<4x32xf32> to vector<1x32xf32>
    %20 = vector.shape_cast %19 : vector<1x32xf32> to vector<32xf32>
    %21 = vector.shape_cast %20 : vector<32xf32> to vector<1x32xf32>
    %22 = vector.broadcast %21 : vector<1x32xf32> to vector<64x32xf32>
    %23 = arith.mulf %18, %22 : vector<64x32xf32>
    %24 = arith.addf %17, %23 : vector<64x32xf32>
    %c61_i32 = arith.constant 61 : i32
    %25 = tpu.dynamic_rotate %3 by %c61_i32 dim 0 : vector<64x32xf32>, i32 -> vector<64x32xf32>
    %26 = vector.extract_strided_slice %5 {offsets = [3, 0], sizes = [1, 32], strides = [1, 1]} : vector<4x32xf32> to vector<1x32xf32>
    %27 = vector.shape_cast %26 : vector<1x32xf32> to vector<32xf32>
    %28 = vector.shape_cast %27 : vector<32xf32> to vector<1x32xf32>
    %29 = vector.broadcast %28 : vector<1x32xf32> to vector<64x32xf32>
    %30 = arith.mulf %25, %29 : vector<64x32xf32>
    %31 = arith.addf %24, %30 : vector<64x32xf32>
    %c0_5 = arith.constant 0 : index
    %c0_6 = arith.constant 0 : index
    %c0_7 = arith.constant 0 : index
    %32 = vector.load %arg3[%c0_5, %c0_6, %c0_7] : memref<3x1x32xf32, #tpu.memory_space<vmem>>, vector<1x1x32xf32>
    %33 = vector.shape_cast %32 : vector<1x1x32xf32> to vector<1x32xf32>
    %34 = vector.broadcast %33 : vector<1x32xf32> to vector<64x32xf32>
    %35 = arith.addf %31, %34 : vector<64x32xf32>
    %cst = arith.constant 0.000000e+00 : f32
    %36 = vector.broadcast %cst : f32 to vector<64x32xf32>
    %37 = arith.maximumf %35, %36 : vector<64x32xf32>
    %c63_i32_8 = arith.constant 63 : i32
    %38 = tpu.dynamic_rotate %37 by %c63_i32_8 dim 0 : vector<64x32xf32>, i32 -> vector<64x32xf32>
    %c62_i32_9 = arith.constant 62 : i32
    %39 = tpu.dynamic_rotate %37 by %c62_i32_9 dim 0 : vector<64x32xf32>, i32 -> vector<64x32xf32>
    %c61_i32_10 = arith.constant 61 : i32
    %40 = tpu.dynamic_rotate %37 by %c61_i32_10 dim 0 : vector<64x32xf32>, i32 -> vector<64x32xf32>
    %41 = tpu.concatenate %37, %38, %39, %40 in 1 : vector<64x32xf32>, vector<64x32xf32>, vector<64x32xf32>, vector<64x32xf32> -> vector<64x128xf32>
    %42 = arith.truncf %41 : vector<64x128xf32> to vector<64x128xbf16>
    %c0_11 = arith.constant 0 : index
    %c0_12 = arith.constant 0 : index
    %c0_13 = arith.constant 0 : index
    %43 = vector.load %arg4[%c0_11, %c0_12, %c0_13] : memref<3x128x64xbf16, #tpu.memory_space<vmem>>, vector<1x128x64xbf16>
    %44 = vector.shape_cast %43 : vector<1x128x64xbf16> to vector<128x64xbf16>
    %cst_14 = arith.constant dense<0.000000e+00> : vector<64x64xf32>
    %45 = tpu.matmul %42, %44, %cst_14 {dimension_numbers = #tpu.dot_dimension_numbers<[1], [0], [0], [1], [0, 0, 1, 1], [], []>} : vector<64x128xbf16>, vector<128x64xbf16>, vector<64x64xf32> -> vector<64x64xf32>
    %c0_15 = arith.constant 0 : index
    %c0_16 = arith.constant 0 : index
    %c0_17 = arith.constant 0 : index
    %46 = vector.load %arg5[%c0_15, %c0_16, %c0_17] : memref<3x1x64xf32, #tpu.memory_space<vmem>>, vector<1x1x64xf32>
    %47 = vector.shape_cast %46 : vector<1x1x64xf32> to vector<1x64xf32>
    %48 = vector.broadcast %47 : vector<1x64xf32> to vector<64x64xf32>
    %49 = arith.addf %45, %48 : vector<64x64xf32>
    %cst_18 = arith.constant 0.000000e+00 : f32
    %50 = vector.broadcast %cst_18 : f32 to vector<64x64xf32>
    %51 = arith.maximumf %49, %50 : vector<64x64xf32>
    %c63_i32_19 = arith.constant 63 : i32
    %52 = tpu.dynamic_rotate %51 by %c63_i32_19 dim 0 : vector<64x64xf32>, i32 -> vector<64x64xf32>
    %c62_i32_20 = arith.constant 62 : i32
    %53 = tpu.dynamic_rotate %51 by %c62_i32_20 dim 0 : vector<64x64xf32>, i32 -> vector<64x64xf32>
    %c61_i32_21 = arith.constant 61 : i32
    %54 = tpu.dynamic_rotate %51 by %c61_i32_21 dim 0 : vector<64x64xf32>, i32 -> vector<64x64xf32>
    %55 = tpu.concatenate %51, %52, %53, %54 in 1 : vector<64x64xf32>, vector<64x64xf32>, vector<64x64xf32>, vector<64x64xf32> -> vector<64x256xf32>
    %56 = arith.truncf %55 : vector<64x256xf32> to vector<64x256xbf16>
    %c0_22 = arith.constant 0 : index
    %c0_23 = arith.constant 0 : index
    %c0_24 = arith.constant 0 : index
    %57 = vector.load %arg6[%c0_22, %c0_23, %c0_24] : memref<3x256x96xbf16, #tpu.memory_space<vmem>>, vector<1x256x96xbf16>
    %58 = vector.shape_cast %57 : vector<1x256x96xbf16> to vector<256x96xbf16>
    %cst_25 = arith.constant dense<0.000000e+00> : vector<64x96xf32>
    %59 = tpu.matmul %56, %58, %cst_25 {dimension_numbers = #tpu.dot_dimension_numbers<[1], [0], [0], [1], [0, 0, 1, 1], [], []>} : vector<64x256xbf16>, vector<256x96xbf16>, vector<64x96xf32> -> vector<64x96xf32>
    %c0_26 = arith.constant 0 : index
    %c0_27 = arith.constant 0 : index
    %c0_28 = arith.constant 0 : index
    %60 = vector.load %arg7[%c0_26, %c0_27, %c0_28] : memref<3x1x96xf32, #tpu.memory_space<vmem>>, vector<1x1x96xf32>
    %61 = vector.shape_cast %60 : vector<1x1x96xf32> to vector<1x96xf32>
    %62 = vector.broadcast %61 : vector<1x96xf32> to vector<64x96xf32>
    %63 = arith.addf %59, %62 : vector<64x96xf32>
    %cst_29 = arith.constant 0.000000e+00 : f32
    %64 = vector.broadcast %cst_29 : f32 to vector<64x96xf32>
    %65 = arith.maximumf %63, %64 : vector<64x96xf32>
    %66 = vector.shape_cast %65 : vector<64x96xf32> to vector<2x32x96xf32>
    %67 = tpu.iota {dimensions = array<i32: 1>} : vector<2x32x96xi32>
    %c23_i32 = arith.constant 23 : i32
    %68 = vector.broadcast %c23_i32 : i32 to vector<2x32x96xi32>
    %69 = arith.cmpi slt, %67, %68 : vector<2x32x96xi32>
    %cst_30 = arith.constant 0.000000e+00 : f32
    %70 = vector.broadcast %cst_30 : f32 to vector<2x32x96xf32>
    %71 = arith.select %69, %66, %70 : vector<2x32x96xi1>, vector<2x32x96xf32>
    %cst_31 = arith.constant dense<0xFF800000> : vector<2x96xf32>
    %72 = vector.multi_reduction <maximumf>, %71, %cst_31 [1] : vector<2x32x96xf32> to vector<2x96xf32>
    %c1 = arith.constant 1 : index
    %c0_32 = arith.constant 0 : index
    %c0_33 = arith.constant 0 : index
    %73 = vector.load %arg1[%c1, %c0_32, %c0_33] : memref<3x64x1xf32, #tpu.memory_space<vmem>>, vector<1x64x1xf32>
    %74 = vector.shape_cast %73 : vector<1x64x1xf32> to vector<64x1xf32>
    %75 = vector.shape_cast %74 : vector<64x1xf32> to vector<64x1xf32>
    %76 = vector.broadcast %75 : vector<64x1xf32> to vector<64x32xf32>
    %c1_34 = arith.constant 1 : index
    %c0_35 = arith.constant 0 : index
    %c0_36 = arith.constant 0 : index
    %77 = vector.load %arg2[%c1_34, %c0_35, %c0_36] : memref<3x4x32xf32, #tpu.memory_space<vmem>>, vector<1x4x32xf32>
    %78 = vector.shape_cast %77 : vector<1x4x32xf32> to vector<4x32xf32>
    %79 = vector.extract_strided_slice %78 {offsets = [0, 0], sizes = [1, 32], strides = [1, 1]} : vector<4x32xf32> to vector<1x32xf32>
    %80 = vector.shape_cast %79 : vector<1x32xf32> to vector<32xf32>
    %81 = vector.shape_cast %80 : vector<32xf32> to vector<1x32xf32>
    %82 = vector.broadcast %81 : vector<1x32xf32> to vector<64x32xf32>
    %83 = arith.mulf %76, %82 : vector<64x32xf32>
    %c63_i32_37 = arith.constant 63 : i32
    %84 = tpu.dynamic_rotate %76 by %c63_i32_37 dim 0 : vector<64x32xf32>, i32 -> vector<64x32xf32>
    %85 = vector.extract_strided_slice %78 {offsets = [1, 0], sizes = [1, 32], strides = [1, 1]} : vector<4x32xf32> to vector<1x32xf32>
    %86 = vector.shape_cast %85 : vector<1x32xf32> to vector<32xf32>
    %87 = vector.shape_cast %86 : vector<32xf32> to vector<1x32xf32>
    %88 = vector.broadcast %87 : vector<1x32xf32> to vector<64x32xf32>
    %89 = arith.mulf %84, %88 : vector<64x32xf32>
    %90 = arith.addf %83, %89 : vector<64x32xf32>
    %c62_i32_38 = arith.constant 62 : i32
    %91 = tpu.dynamic_rotate %76 by %c62_i32_38 dim 0 : vector<64x32xf32>, i32 -> vector<64x32xf32>
    %92 = vector.extract_strided_slice %78 {offsets = [2, 0], sizes = [1, 32], strides = [1, 1]} : vector<4x32xf32> to vector<1x32xf32>
    %93 = vector.shape_cast %92 : vector<1x32xf32> to vector<32xf32>
    %94 = vector.shape_cast %93 : vector<32xf32> to vector<1x32xf32>
    %95 = vector.broadcast %94 : vector<1x32xf32> to vector<64x32xf32>
    %96 = arith.mulf %91, %95 : vector<64x32xf32>
    %97 = arith.addf %90, %96 : vector<64x32xf32>
    %c61_i32_39 = arith.constant 61 : i32
    %98 = tpu.dynamic_rotate %76 by %c61_i32_39 dim 0 : vector<64x32xf32>, i32 -> vector<64x32xf32>
    %99 = vector.extract_strided_slice %78 {offsets = [3, 0], sizes = [1, 32], strides = [1, 1]} : vector<4x32xf32> to vector<1x32xf32>
    %100 = vector.shape_cast %99 : vector<1x32xf32> to vector<32xf32>
    %101 = vector.shape_cast %100 : vector<32xf32> to vector<1x32xf32>
    %102 = vector.broadcast %101 : vector<1x32xf32> to vector<64x32xf32>
    %103 = arith.mulf %98, %102 : vector<64x32xf32>
    %104 = arith.addf %97, %103 : vector<64x32xf32>
    %c1_40 = arith.constant 1 : index
    %c0_41 = arith.constant 0 : index
    %c0_42 = arith.constant 0 : index
    %105 = vector.load %arg3[%c1_40, %c0_41, %c0_42] : memref<3x1x32xf32, #tpu.memory_space<vmem>>, vector<1x1x32xf32>
    %106 = vector.shape_cast %105 : vector<1x1x32xf32> to vector<1x32xf32>
    %107 = vector.broadcast %106 : vector<1x32xf32> to vector<64x32xf32>
    %108 = arith.addf %104, %107 : vector<64x32xf32>
    %cst_43 = arith.constant 0.000000e+00 : f32
    %109 = vector.broadcast %cst_43 : f32 to vector<64x32xf32>
    %110 = arith.maximumf %108, %109 : vector<64x32xf32>
    %c63_i32_44 = arith.constant 63 : i32
    %111 = tpu.dynamic_rotate %110 by %c63_i32_44 dim 0 : vector<64x32xf32>, i32 -> vector<64x32xf32>
    %c62_i32_45 = arith.constant 62 : i32
    %112 = tpu.dynamic_rotate %110 by %c62_i32_45 dim 0 : vector<64x32xf32>, i32 -> vector<64x32xf32>
    %c61_i32_46 = arith.constant 61 : i32
    %113 = tpu.dynamic_rotate %110 by %c61_i32_46 dim 0 : vector<64x32xf32>, i32 -> vector<64x32xf32>
    %114 = tpu.concatenate %110, %111, %112, %113 in 1 : vector<64x32xf32>, vector<64x32xf32>, vector<64x32xf32>, vector<64x32xf32> -> vector<64x128xf32>
    %115 = arith.truncf %114 : vector<64x128xf32> to vector<64x128xbf16>
    %c1_47 = arith.constant 1 : index
    %c0_48 = arith.constant 0 : index
    %c0_49 = arith.constant 0 : index
    %116 = vector.load %arg4[%c1_47, %c0_48, %c0_49] : memref<3x128x64xbf16, #tpu.memory_space<vmem>>, vector<1x128x64xbf16>
    %117 = vector.shape_cast %116 : vector<1x128x64xbf16> to vector<128x64xbf16>
    %cst_50 = arith.constant dense<0.000000e+00> : vector<64x64xf32>
    %118 = tpu.matmul %115, %117, %cst_50 {dimension_numbers = #tpu.dot_dimension_numbers<[1], [0], [0], [1], [0, 0, 1, 1], [], []>} : vector<64x128xbf16>, vector<128x64xbf16>, vector<64x64xf32> -> vector<64x64xf32>
    %c1_51 = arith.constant 1 : index
    %c0_52 = arith.constant 0 : index
    %c0_53 = arith.constant 0 : index
    %119 = vector.load %arg5[%c1_51, %c0_52, %c0_53] : memref<3x1x64xf32, #tpu.memory_space<vmem>>, vector<1x1x64xf32>
    %120 = vector.shape_cast %119 : vector<1x1x64xf32> to vector<1x64xf32>
    %121 = vector.broadcast %120 : vector<1x64xf32> to vector<64x64xf32>
    %122 = arith.addf %118, %121 : vector<64x64xf32>
    %cst_54 = arith.constant 0.000000e+00 : f32
    %123 = vector.broadcast %cst_54 : f32 to vector<64x64xf32>
    %124 = arith.maximumf %122, %123 : vector<64x64xf32>
    %c63_i32_55 = arith.constant 63 : i32
    %125 = tpu.dynamic_rotate %124 by %c63_i32_55 dim 0 : vector<64x64xf32>, i32 -> vector<64x64xf32>
    %c62_i32_56 = arith.constant 62 : i32
    %126 = tpu.dynamic_rotate %124 by %c62_i32_56 dim 0 : vector<64x64xf32>, i32 -> vector<64x64xf32>
    %c61_i32_57 = arith.constant 61 : i32
    %127 = tpu.dynamic_rotate %124 by %c61_i32_57 dim 0 : vector<64x64xf32>, i32 -> vector<64x64xf32>
    %128 = tpu.concatenate %124, %125, %126, %127 in 1 : vector<64x64xf32>, vector<64x64xf32>, vector<64x64xf32>, vector<64x64xf32> -> vector<64x256xf32>
    %129 = arith.truncf %128 : vector<64x256xf32> to vector<64x256xbf16>
    %c1_58 = arith.constant 1 : index
    %c0_59 = arith.constant 0 : index
    %c0_60 = arith.constant 0 : index
    %130 = vector.load %arg6[%c1_58, %c0_59, %c0_60] : memref<3x256x96xbf16, #tpu.memory_space<vmem>>, vector<1x256x96xbf16>
    %131 = vector.shape_cast %130 : vector<1x256x96xbf16> to vector<256x96xbf16>
    %cst_61 = arith.constant dense<0.000000e+00> : vector<64x96xf32>
    %132 = tpu.matmul %129, %131, %cst_61 {dimension_numbers = #tpu.dot_dimension_numbers<[1], [0], [0], [1], [0, 0, 1, 1], [], []>} : vector<64x256xbf16>, vector<256x96xbf16>, vector<64x96xf32> -> vector<64x96xf32>
    %c1_62 = arith.constant 1 : index
    %c0_63 = arith.constant 0 : index
    %c0_64 = arith.constant 0 : index
    %133 = vector.load %arg7[%c1_62, %c0_63, %c0_64] : memref<3x1x96xf32, #tpu.memory_space<vmem>>, vector<1x1x96xf32>
    %134 = vector.shape_cast %133 : vector<1x1x96xf32> to vector<1x96xf32>
    %135 = vector.broadcast %134 : vector<1x96xf32> to vector<64x96xf32>
    %136 = arith.addf %132, %135 : vector<64x96xf32>
    %cst_65 = arith.constant 0.000000e+00 : f32
    %137 = vector.broadcast %cst_65 : f32 to vector<64x96xf32>
    %138 = arith.maximumf %136, %137 : vector<64x96xf32>
    %139 = vector.shape_cast %138 : vector<64x96xf32> to vector<2x32x96xf32>
    %140 = tpu.iota {dimensions = array<i32: 1>} : vector<2x32x96xi32>
    %c23_i32_66 = arith.constant 23 : i32
    %141 = vector.broadcast %c23_i32_66 : i32 to vector<2x32x96xi32>
    %142 = arith.cmpi slt, %140, %141 : vector<2x32x96xi32>
    %cst_67 = arith.constant 0.000000e+00 : f32
    %143 = vector.broadcast %cst_67 : f32 to vector<2x32x96xf32>
    %144 = arith.select %142, %139, %143 : vector<2x32x96xi1>, vector<2x32x96xf32>
    %cst_68 = arith.constant dense<0xFF800000> : vector<2x96xf32>
    %145 = vector.multi_reduction <maximumf>, %144, %cst_68 [1] : vector<2x32x96xf32> to vector<2x96xf32>
    %c2 = arith.constant 2 : index
    %c0_69 = arith.constant 0 : index
    %c0_70 = arith.constant 0 : index
    %146 = vector.load %arg1[%c2, %c0_69, %c0_70] : memref<3x64x1xf32, #tpu.memory_space<vmem>>, vector<1x64x1xf32>
    %147 = vector.shape_cast %146 : vector<1x64x1xf32> to vector<64x1xf32>
    %148 = vector.shape_cast %147 : vector<64x1xf32> to vector<64x1xf32>
    %149 = vector.broadcast %148 : vector<64x1xf32> to vector<64x32xf32>
    %c2_71 = arith.constant 2 : index
    %c0_72 = arith.constant 0 : index
    %c0_73 = arith.constant 0 : index
    %150 = vector.load %arg2[%c2_71, %c0_72, %c0_73] : memref<3x4x32xf32, #tpu.memory_space<vmem>>, vector<1x4x32xf32>
    %151 = vector.shape_cast %150 : vector<1x4x32xf32> to vector<4x32xf32>
    %152 = vector.extract_strided_slice %151 {offsets = [0, 0], sizes = [1, 32], strides = [1, 1]} : vector<4x32xf32> to vector<1x32xf32>
    %153 = vector.shape_cast %152 : vector<1x32xf32> to vector<32xf32>
    %154 = vector.shape_cast %153 : vector<32xf32> to vector<1x32xf32>
    %155 = vector.broadcast %154 : vector<1x32xf32> to vector<64x32xf32>
    %156 = arith.mulf %149, %155 : vector<64x32xf32>
    %c63_i32_74 = arith.constant 63 : i32
    %157 = tpu.dynamic_rotate %149 by %c63_i32_74 dim 0 : vector<64x32xf32>, i32 -> vector<64x32xf32>
    %158 = vector.extract_strided_slice %151 {offsets = [1, 0], sizes = [1, 32], strides = [1, 1]} : vector<4x32xf32> to vector<1x32xf32>
    %159 = vector.shape_cast %158 : vector<1x32xf32> to vector<32xf32>
    %160 = vector.shape_cast %159 : vector<32xf32> to vector<1x32xf32>
    %161 = vector.broadcast %160 : vector<1x32xf32> to vector<64x32xf32>
    %162 = arith.mulf %157, %161 : vector<64x32xf32>
    %163 = arith.addf %156, %162 : vector<64x32xf32>
    %c62_i32_75 = arith.constant 62 : i32
    %164 = tpu.dynamic_rotate %149 by %c62_i32_75 dim 0 : vector<64x32xf32>, i32 -> vector<64x32xf32>
    %165 = vector.extract_strided_slice %151 {offsets = [2, 0], sizes = [1, 32], strides = [1, 1]} : vector<4x32xf32> to vector<1x32xf32>
    %166 = vector.shape_cast %165 : vector<1x32xf32> to vector<32xf32>
    %167 = vector.shape_cast %166 : vector<32xf32> to vector<1x32xf32>
    %168 = vector.broadcast %167 : vector<1x32xf32> to vector<64x32xf32>
    %169 = arith.mulf %164, %168 : vector<64x32xf32>
    %170 = arith.addf %163, %169 : vector<64x32xf32>
    %c61_i32_76 = arith.constant 61 : i32
    %171 = tpu.dynamic_rotate %149 by %c61_i32_76 dim 0 : vector<64x32xf32>, i32 -> vector<64x32xf32>
    %172 = vector.extract_strided_slice %151 {offsets = [3, 0], sizes = [1, 32], strides = [1, 1]} : vector<4x32xf32> to vector<1x32xf32>
    %173 = vector.shape_cast %172 : vector<1x32xf32> to vector<32xf32>
    %174 = vector.shape_cast %173 : vector<32xf32> to vector<1x32xf32>
    %175 = vector.broadcast %174 : vector<1x32xf32> to vector<64x32xf32>
    %176 = arith.mulf %171, %175 : vector<64x32xf32>
    %177 = arith.addf %170, %176 : vector<64x32xf32>
    %c2_77 = arith.constant 2 : index
    %c0_78 = arith.constant 0 : index
    %c0_79 = arith.constant 0 : index
    %178 = vector.load %arg3[%c2_77, %c0_78, %c0_79] : memref<3x1x32xf32, #tpu.memory_space<vmem>>, vector<1x1x32xf32>
    %179 = vector.shape_cast %178 : vector<1x1x32xf32> to vector<1x32xf32>
    %180 = vector.broadcast %179 : vector<1x32xf32> to vector<64x32xf32>
    %181 = arith.addf %177, %180 : vector<64x32xf32>
    %cst_80 = arith.constant 0.000000e+00 : f32
    %182 = vector.broadcast %cst_80 : f32 to vector<64x32xf32>
    %183 = arith.maximumf %181, %182 : vector<64x32xf32>
    %c63_i32_81 = arith.constant 63 : i32
    %184 = tpu.dynamic_rotate %183 by %c63_i32_81 dim 0 : vector<64x32xf32>, i32 -> vector<64x32xf32>
    %c62_i32_82 = arith.constant 62 : i32
    %185 = tpu.dynamic_rotate %183 by %c62_i32_82 dim 0 : vector<64x32xf32>, i32 -> vector<64x32xf32>
    %c61_i32_83 = arith.constant 61 : i32
    %186 = tpu.dynamic_rotate %183 by %c61_i32_83 dim 0 : vector<64x32xf32>, i32 -> vector<64x32xf32>
    %187 = tpu.concatenate %183, %184, %185, %186 in 1 : vector<64x32xf32>, vector<64x32xf32>, vector<64x32xf32>, vector<64x32xf32> -> vector<64x128xf32>
    %188 = arith.truncf %187 : vector<64x128xf32> to vector<64x128xbf16>
    %c2_84 = arith.constant 2 : index
    %c0_85 = arith.constant 0 : index
    %c0_86 = arith.constant 0 : index
    %189 = vector.load %arg4[%c2_84, %c0_85, %c0_86] : memref<3x128x64xbf16, #tpu.memory_space<vmem>>, vector<1x128x64xbf16>
    %190 = vector.shape_cast %189 : vector<1x128x64xbf16> to vector<128x64xbf16>
    %cst_87 = arith.constant dense<0.000000e+00> : vector<64x64xf32>
    %191 = tpu.matmul %188, %190, %cst_87 {dimension_numbers = #tpu.dot_dimension_numbers<[1], [0], [0], [1], [0, 0, 1, 1], [], []>} : vector<64x128xbf16>, vector<128x64xbf16>, vector<64x64xf32> -> vector<64x64xf32>
    %c2_88 = arith.constant 2 : index
    %c0_89 = arith.constant 0 : index
    %c0_90 = arith.constant 0 : index
    %192 = vector.load %arg5[%c2_88, %c0_89, %c0_90] : memref<3x1x64xf32, #tpu.memory_space<vmem>>, vector<1x1x64xf32>
    %193 = vector.shape_cast %192 : vector<1x1x64xf32> to vector<1x64xf32>
    %194 = vector.broadcast %193 : vector<1x64xf32> to vector<64x64xf32>
    %195 = arith.addf %191, %194 : vector<64x64xf32>
    %cst_91 = arith.constant 0.000000e+00 : f32
    %196 = vector.broadcast %cst_91 : f32 to vector<64x64xf32>
    %197 = arith.maximumf %195, %196 : vector<64x64xf32>
    %c63_i32_92 = arith.constant 63 : i32
    %198 = tpu.dynamic_rotate %197 by %c63_i32_92 dim 0 : vector<64x64xf32>, i32 -> vector<64x64xf32>
    %c62_i32_93 = arith.constant 62 : i32
    %199 = tpu.dynamic_rotate %197 by %c62_i32_93 dim 0 : vector<64x64xf32>, i32 -> vector<64x64xf32>
    %c61_i32_94 = arith.constant 61 : i32
    %200 = tpu.dynamic_rotate %197 by %c61_i32_94 dim 0 : vector<64x64xf32>, i32 -> vector<64x64xf32>
    %201 = tpu.concatenate %197, %198, %199, %200 in 1 : vector<64x64xf32>, vector<64x64xf32>, vector<64x64xf32>, vector<64x64xf32> -> vector<64x256xf32>
    %202 = arith.truncf %201 : vector<64x256xf32> to vector<64x256xbf16>
    %c2_95 = arith.constant 2 : index
    %c0_96 = arith.constant 0 : index
    %c0_97 = arith.constant 0 : index
    %203 = vector.load %arg6[%c2_95, %c0_96, %c0_97] : memref<3x256x96xbf16, #tpu.memory_space<vmem>>, vector<1x256x96xbf16>
    %204 = vector.shape_cast %203 : vector<1x256x96xbf16> to vector<256x96xbf16>
    %cst_98 = arith.constant dense<0.000000e+00> : vector<64x96xf32>
    %205 = tpu.matmul %202, %204, %cst_98 {dimension_numbers = #tpu.dot_dimension_numbers<[1], [0], [0], [1], [0, 0, 1, 1], [], []>} : vector<64x256xbf16>, vector<256x96xbf16>, vector<64x96xf32> -> vector<64x96xf32>
    %c2_99 = arith.constant 2 : index
    %c0_100 = arith.constant 0 : index
    %c0_101 = arith.constant 0 : index
    %206 = vector.load %arg7[%c2_99, %c0_100, %c0_101] : memref<3x1x96xf32, #tpu.memory_space<vmem>>, vector<1x1x96xf32>
    %207 = vector.shape_cast %206 : vector<1x1x96xf32> to vector<1x96xf32>
    %208 = vector.broadcast %207 : vector<1x96xf32> to vector<64x96xf32>
    %209 = arith.addf %205, %208 : vector<64x96xf32>
    %cst_102 = arith.constant 0.000000e+00 : f32
    %210 = vector.broadcast %cst_102 : f32 to vector<64x96xf32>
    %211 = arith.maximumf %209, %210 : vector<64x96xf32>
    %212 = vector.shape_cast %211 : vector<64x96xf32> to vector<2x32x96xf32>
    %213 = tpu.iota {dimensions = array<i32: 1>} : vector<2x32x96xi32>
    %c23_i32_103 = arith.constant 23 : i32
    %214 = vector.broadcast %c23_i32_103 : i32 to vector<2x32x96xi32>
    %215 = arith.cmpi slt, %213, %214 : vector<2x32x96xi32>
    %cst_104 = arith.constant 0.000000e+00 : f32
    %216 = vector.broadcast %cst_104 : f32 to vector<2x32x96xf32>
    %217 = arith.select %215, %212, %216 : vector<2x32x96xi1>, vector<2x32x96xf32>
    %cst_105 = arith.constant dense<0xFF800000> : vector<2x96xf32>
    %218 = vector.multi_reduction <maximumf>, %217, %cst_105 [1] : vector<2x32x96xf32> to vector<2x96xf32>
    %219 = tpu.concatenate %72, %145, %218 in 1 : vector<2x96xf32>, vector<2x96xf32>, vector<2x96xf32> -> vector<2x288xf32>
    %220 = arith.truncf %219 : vector<2x288xf32> to vector<2x288xbf16>
    %c0_106 = arith.constant 0 : index
    %c0_107 = arith.constant 0 : index
    %221 = vector.load %arg8[%c0_106, %c0_107] : memref<288x1024xbf16, #tpu.memory_space<vmem>>, vector<288x1024xbf16>
    %cst_108 = arith.constant dense<0.000000e+00> : vector<2x1024xf32>
    %222 = tpu.matmul %220, %221, %cst_108 {dimension_numbers = #tpu.dot_dimension_numbers<[1], [0], [0], [1], [0, 0, 1, 1], [], []>} : vector<2x288xbf16>, vector<288x1024xbf16>, vector<2x1024xf32> -> vector<2x1024xf32>
    %c0_109 = arith.constant 0 : index
    %c0_110 = arith.constant 0 : index
    %223 = vector.load %arg9[%c0_109, %c0_110] : memref<1x1024xf32, #tpu.memory_space<vmem>>, vector<1x1024xf32>
    %224 = vector.broadcast %223 : vector<1x1024xf32> to vector<2x1024xf32>
    %225 = arith.addf %222, %224 : vector<2x1024xf32>
    %cst_111 = arith.constant 0.000000e+00 : f32
    %226 = vector.broadcast %cst_111 : f32 to vector<2x1024xf32>
    %227 = arith.maximumf %225, %226 : vector<2x1024xf32>
    %228 = arith.truncf %227 : vector<2x1024xf32> to vector<2x1024xbf16>
    %c0_112 = arith.constant 0 : index
    %c0_113 = arith.constant 0 : index
    %229 = vector.load %arg10[%c0_112, %c0_113] : memref<10x1024xbf16, #tpu.memory_space<vmem>>, vector<10x1024xbf16>
    %cst_114 = arith.constant dense<0.000000e+00> : vector<2x10xf32>
    %230 = tpu.matmul %228, %229, %cst_114 {dimension_numbers = #tpu.dot_dimension_numbers<[1], [1], [0], [0], [0, 0, 1, 0], [], []>} : vector<2x1024xbf16>, vector<10x1024xbf16>, vector<2x10xf32> -> vector<2x10xf32>
    %c0_115 = arith.constant 0 : index
    %c0_116 = arith.constant 0 : index
    %231 = vector.load %arg11[%c0_115, %c0_116] : memref<1x10xf32, #tpu.memory_space<vmem>>, vector<1x10xf32>
    %232 = vector.broadcast %231 : vector<1x10xf32> to vector<2x10xf32>
    %233 = arith.addf %230, %232 : vector<2x10xf32>
    %c0_117 = arith.constant 0 : index
    %c0_118 = arith.constant 0 : index
    %234 = vector.load %arg12[%c0_117, %c0_118] : memref<2x10xf32, #tpu.memory_space<vmem>>, vector<2x10xf32>
    tpu.vector_store %arg12[%c0_117, %c0_118], %233 {strides = array<i32>} : memref<2x10xf32, #tpu.memory_space<vmem>>, vector<2x10xf32>,
    return
  }
  func.func @transform_0(%arg0: i32) -> (i32, i32, i32) {
    %c0_i32 = arith.constant 0 : i32
    %c0_i32_0 = arith.constant 0 : i32
    %c0_i32_1 = arith.constant 0 : i32
    %c0_i32_2 = arith.constant 0 : i32
    return %c0_i32, %c0_i32_0, %c0_i32_1 : i32, i32, i32
  }
  func.func @transform_1(%arg0: i32) -> (i32, i32, i32) {
    %c0_i32 = arith.constant 0 : i32
    %c0_i32_0 = arith.constant 0 : i32
    %c0_i32_1 = arith.constant 0 : i32
    %c0_i32_2 = arith.constant 0 : i32
    return %c0_i32, %c0_i32_0, %c0_i32_1 : i32, i32, i32
  }
  func.func @transform_2(%arg0: i32) -> (i32, i32, i32) {
    %c0_i32 = arith.constant 0 : i32
    %c0_i32_0 = arith.constant 0 : i32
    %c0_i32_1 = arith.constant 0 : i32
    %c0_i32_2 = arith.constant 0 : i32
    return %c0_i32, %c0_i32_0, %c0_i32_1 : i32, i32, i32
  }
  func.func @transform_3(%arg0: i32) -> (i32, i32, i32) {
    %c0_i32 = arith.constant 0 : i32
    %c0_i32_0 = arith.constant 0 : i32
    %c0_i32_1 = arith.constant 0 : i32
    %c0_i32_2 = arith.constant 0 : i32
    return %c0_i32, %c0_i32_0, %c0_i32_1 : i32, i32, i32
  }
  func.func @transform_4(%arg0: i32) -> (i32, i32, i32) {
    %c0_i32 = arith.constant 0 : i32
    %c0_i32_0 = arith.constant 0 : i32
    %c0_i32_1 = arith.constant 0 : i32
    %c0_i32_2 = arith.constant 0 : i32
    return %c0_i32, %c0_i32_0, %c0_i32_1 : i32, i32, i32
  }
  func.func @transform_5(%arg0: i32) -> (i32, i32, i32) {
    %c0_i32 = arith.constant 0 : i32
    %c0_i32_0 = arith.constant 0 : i32
    %c0_i32_1 = arith.constant 0 : i32
    %c0_i32_2 = arith.constant 0 : i32
    return %c0_i32, %c0_i32_0, %c0_i32_1 : i32, i32, i32
  }
  func.func @transform_6(%arg0: i32) -> (i32, i32, i32) {
    %c0_i32 = arith.constant 0 : i32
    %c0_i32_0 = arith.constant 0 : i32
    %c0_i32_1 = arith.constant 0 : i32
    %c0_i32_2 = arith.constant 0 : i32
    return %c0_i32, %c0_i32_0, %c0_i32_1 : i32, i32, i32
  }
  func.func @transform_7(%arg0: i32) -> (i32, i32) {
    %c0_i32 = arith.constant 0 : i32
    %c0_i32_0 = arith.constant 0 : i32
    %c0_i32_1 = arith.constant 0 : i32
    return %c0_i32, %c0_i32_0 : i32, i32
  }
  func.func @transform_8(%arg0: i32) -> (i32, i32) {
    %c0_i32 = arith.constant 0 : i32
    %c0_i32_0 = arith.constant 0 : i32
    %c0_i32_1 = arith.constant 0 : i32
    return %c0_i32, %c0_i32_0 : i32, i32
  }
  func.func @transform_9(%arg0: i32) -> (i32, i32) {
    %c0_i32 = arith.constant 0 : i32
    %c0_i32_0 = arith.constant 0 : i32
    %c0_i32_1 = arith.constant 0 : i32
    return %c0_i32, %c0_i32_0 : i32, i32
  }
  func.func @transform_10(%arg0: i32) -> (i32, i32) {
    %c0_i32 = arith.constant 0 : i32
    %c0_i32_0 = arith.constant 0 : i32
    %c0_i32_1 = arith.constant 0 : i32
    return %c0_i32, %c0_i32_0 : i32, i32
  }
  func.func @transform_11(%arg0: i32) -> (i32, i32) {
    %c0_i32 = arith.constant 0 : i32
    %c0_i32_0 = arith.constant 0 : i32
    %c0_i32_1 = arith.constant 0 : i32
    return %c0_i32, %c0_i32_0 : i32, i32
  }
}

</mosaic_0001>

<bundles_post_ra>
// kernel: tpu_custom_call.1
= control target key start
LH: loop header
LB: loop body
LE: loop exit
PB: predicated region body
PF: predicated region fallthrough
CT: control target
= control target key end

     0   :  { %16 = vsyncpa [#allocation3], 0  ;;  %s7564_s0 = inlined_call_operand.vmem [shape: f32[3,64,1], index: 0, kind: input, shape index: {}]   ;;  %s7565_s1 = inlined_call_operand.vmem [shape: f32[3,4,32], index: 1, kind: input, shape index: {}]   ;;  %s7566_s2 = inlined_call_operand.vmem [shape: f32[3,1,32], index: 2, kind: input, shape index: {}]   ;;  %s7567_s3 = inlined_call_operand.vmem [shape: bf16[3,128,64], index: 3, kind: input, shape index: {}]   ;;  %s7568_s4 = inlined_call_operand.vmem [shape: f32[3,1,64], index: 4, kind: input, shape index: {}]   ;;  %s7569_s5 = inlined_call_operand.vmem [shape: bf16[3,256,96], index: 5, kind: input, shape index: {}]   ;;  %s7570_s6 = inlined_call_operand.vmem [shape: f32[3,1,96], index: 6, kind: input, shape index: {}]   ;;  %s7571_s7 = inlined_call_operand.hbm [shape: bf16[288,1024], index: 7, kind: input, shape index: {}]   ;;  %s7572_s8 = inlined_call_operand.vmem [shape: f32[1,1024], index: 8, kind: input, shape index: {}]   ;;  %s7573_s9 = inlined_call_operand.vmem [shape: bf16[10,1024], index: 9, kind: input, shape index: {}]   ;;  %s7574_s10 = inlined_call_operand.vmem [shape: f32[1,10], index: 10, kind: input, shape index: {}]   ;;  %s7575_s11 = inlined_call_operand.hbm [shape: f32[2,10], index: 11, kind: output, shape index: {}]  }
   0x1   :  { %17 = vsyncpa [#allocation4], 0  ;;  %s36_s19 = sshll.u32 %s7571_s7, 4  ;;  %s5582_s20 = smov [#allocation2]   ;;  %s37_s19 = int_to_ptr.hbm [resolvable:$true] %s36_s19 }
   0x2   :  { %s38_s21 = sshll.u32 %s5582_s20, 4  ;;  %s5583_s22 = smov 512   ;;  %s39_s21 = int_to_ptr.vmem [resolvable:$true] %s38_s21 }
   0x3   :  { %s5584_s23 = smov 32  }
   0x4   :  { %44 = dma.hbm_to_vmem [thread:$0]  %s37_s19, 18432, %s39_s21, [#allocation3], %s5583_s22, %s5583_s22, %s5584_s23  }
   0x5   :  { %5578 = dma.done.wait [#allocation3], 18432  }
   0x6   :  { %5579 = vsyncadd [#allocation3], 4294948864  ;;  %v5585_v0 = vmov 0   ;;  %v58_v1 = vld [vmem:[%s7564_s0 + $0x10] sm:$0xff]  ;;  %v56_v2 = vld [vmem:[%s7564_s0] sm:$0xff]  ;;  %v122_v10 = vlaneseq  ;;  %s5586_s25 = smov 96  }
   0x7   :  { %5218 = vset.pattern.permute.xlu1 %v5585_v0  ;;  %5217 = vset.pattern.permute.xlu0 %v5585_v0  ;;  %v60_v3 = vld [vmem:[%s7564_s0 + $0x20] sm:$0xff]  ;;  %v59_v4 = vld [vmem:[%s7564_s0 + $0x18] sm:$0xff]  ;;  %v57_v5 = vld [vmem:[%s7564_s0 + $0x8] sm:$0xff]  ;;  %s5587_s26 = smov 64   ;;  %vm382_vm3 = vcmask 261120   ;;  %vm391_vm4 = vcmask 523264  }
   0x8   :  { %5219 = vset.pattern.permute.xlu2 %v5585_v0  ;;  %76 = vperm.xlu1 %5218, %v58_v1   ;;  %v61_v6 = vld [vmem:[%s7564_s0 + $0x28] sm:$0xff]  ;;  %v63_v7 = vld [vmem:[%s7564_s0 + $0x38] sm:$0xff]  ;;  %v62_v8 = vld [vmem:[%s7564_s0 + $0x30] sm:$0xff]  ;;  %v5678_v11 = vshrl.u32 %v122_v10, 7  ;;  %vm400_vm5 = vcmask 785408   ;;  %vm2553_vm7 = vcmask 1041409  }
   0x9   :  { %66 = vperm.xlu0 %5217, %v56_v2   ;;  %86 = vperm.xlu2 %5219, %v60_v3   ;;  %v104_v12 = vld [vmem:[%s7565_s1] sm:$0xf]  ;;  %s5589_s19 = smov [#allocation5]   ;;  %vm3942_vm8 = vcmask 74752  }
   0xa   :  { %vm124_vm0 = vcmp.lt.s32.totalorder %v5678_v11, 7  ;;  %v5684_v14 = vperm.slane %v104_v12, 1  ;;  %v5690_v18 = vperm.slane %v104_v12, 0  ;;  %vm158_vm1 = vcmp.lt.s32.totalorder %v5678_v11, 6  ;;  %v5720_v35 = vld [vmem:[%s7566_s2] ss:$0 sm:$0xff] }
   0xb   :  { %v5704_v25 = vperm.slane %v104_v12, 2  ;;  %vm192_vm2 = vcmp.lt.s32.totalorder %v5678_v11, 5  ;;  %v5712_v30 = vperm.slane %v104_v12, 3 }
  0x10   :  { %81 = vperm.xlu1 %5218, %v59_v4  }
  0x11   :  { %71 = vperm.xlu0 %5217, %v57_v5   ;;  %91 = vperm.xlu2 %5219, %v61_v6  }
  0x18   :  { %101 = vperm.xlu1 %5218, %v63_v7  }
  0x19   :  { %96 = vperm.xlu0 %5217, %v62_v8  }
  0x63   :  { %v87_v9 = vpop.permute.xlu2 %86 }
  0x64   :  { %v118_v13 = vrot.slane %v87_v9, 1  ;;  %v154_v19 = vrot.slane %v87_v9, 2  ;;  %v110_v21 = vmul.f32 %v5690_v18, %v87_v9  ;;  %v188_v26 = vrot.slane %v87_v9, 3 }
  0x6b   :  { %v5686_v15 = vpop.permute.xlu2 %91 }
  0x6c   :  { %v119_v16 = vrot.slane %v5686_v15, 1  ;;  %v155_v17 = vrot.slane %v5686_v15, 2  ;;  %v189_v24 = vrot.slane %v5686_v15, 3 }
  0x6e   :  { %v127_v20 = vsel %vm124_vm0, %v118_v13, %v119_v16  ;;  %v161_v23 = vsel %vm158_vm1, %v154_v19, %v155_v17  ;;  %v195_v29 = vsel %vm192_vm2, %v188_v26, %v189_v24 }
  0x6f   :  { %v138_v22 = vmul.f32 %v5684_v14, %v127_v20  ;;  %v172_v28 = vmul.f32 %v5704_v25, %v161_v23  ;;  %v206_v32 = vmul.f32 %v5712_v30, %v195_v29 }
  0x71   :  { %v146_v27 = vadd.f32 %v138_v22, %v110_v21 }
  0x73   :  { %v180_v31 = vadd.f32 %v172_v28, %v146_v27 }
  0x75   :  { %v214_v36 = vadd.f32 %v206_v32, %v180_v31 }
  0x77   :  { %v226_v37 = vadd.f32 %v5720_v35, %v214_v36 }
  0x79   :  { %v5767_v29 = vmax.f32 %v226_v37, 0.0 }
  0x7a   :  { %v77_v33 = vpop.permute.xlu1 %76 }
  0x7b   :  { %v5715_v34 = vpop.permute.xlu0 %66  ;;  %v108_v38 = vmul.f32 %v5690_v18, %v77_v33  ;;  %v116_v39 = vrot.slane %v77_v33, 1  ;;  %v152_v40 = vrot.slane %v77_v33, 2  ;;  %v186_v41 = vrot.slane %v77_v33, 3 }
  0x7c   :  { %v106_v42 = vmul.f32 %v5690_v18, %v5715_v34  ;;  %v114_v43 = vrot.slane %v5715_v34, 1  ;;  %v150_v44 = vrot.slane %v5715_v34, 2  ;;  %v184_v45 = vrot.slane %v5715_v34, 3 }
  0x82   :  { %v82_v46 = vpop.permute.xlu1 %81 }
  0x83   :  { %v72_v47 = vpop.permute.xlu0 %71  ;;  %v109_v48 = vmul.f32 %v5690_v18, %v82_v46  ;;  %v117_v49 = vrot.slane %v82_v46, 1  ;;  %v153_v50 = vrot.slane %v82_v46, 2  ;;  %v187_v51 = vrot.slane %v82_v46, 3 }
  0x84   :  { %v107_v52 = vmul.f32 %v5690_v18, %v72_v47  ;;  %v115_v53 = vrot.slane %v72_v47, 1  ;;  %v151_v54 = vrot.slane %v72_v47, 2  ;;  %v185_v55 = vrot.slane %v72_v47, 3 }
  0x85   :  { %v128_v56 = vsel %vm124_vm0, %v117_v49, %v118_v13  ;;  %v129_v57 = vsel %vm124_vm0, %v116_v39, %v117_v49  ;;  %v162_v58 = vsel %vm158_vm1, %v153_v50, %v154_v19  ;;  %v163_v59 = vsel %vm158_vm1, %v152_v40, %v153_v50 }
  0x86   :  { %v136_v60 = vmul.f32 %v5684_v14, %v129_v57  ;;  %v137_v61 = vmul.f32 %v5684_v14, %v128_v56  ;;  %v170_v62 = vmul.f32 %v5704_v25, %v163_v59  ;;  %v171_v63 = vmul.f32 %v5704_v25, %v162_v58 }
  0x87   :  { %v196_v0 = vsel %vm192_vm2, %v187_v51, %v188_v26  ;;  %v197_v1 = vsel %vm192_vm2, %v186_v41, %v187_v51  ;;  %v130_v2 = vsel %vm124_vm0, %v115_v53, %v116_v39  ;;  %v131_v3 = vsel %vm124_vm0, %v114_v43, %v115_v53 }
  0x88   :  { %v144_v4 = vadd.f32 %v136_v60, %v108_v38  ;;  %v145_v5 = vadd.f32 %v137_v61, %v109_v48  ;;  %v204_v6 = vmul.f32 %v5712_v30, %v197_v1  ;;  %v205_v7 = vmul.f32 %v5712_v30, %v196_v0 }
  0x89   :  { %v134_v8 = vmul.f32 %v5684_v14, %v131_v3  ;;  %v135_v9 = vmul.f32 %v5684_v14, %v130_v2  ;;  %v164_v10 = vsel %vm158_vm1, %v151_v54, %v152_v40  ;;  %v165_v12 = vsel %vm158_vm1, %v150_v44, %v151_v54 }
  0x8a   :  { %v178_v13 = vadd.f32 %v170_v62, %v144_v4  ;;  %v179_v19 = vadd.f32 %v171_v63, %v145_v5  ;;  %v168_v20 = vmul.f32 %v5704_v25, %v165_v12  ;;  %v169_v21 = vmul.f32 %v5704_v25, %v164_v10  ;;  %v102_v22 = vpop.permute.xlu1 %101 }
  0x8b   :  { %v142_v23 = vadd.f32 %v134_v8, %v106_v42  ;;  %v143_v26 = vadd.f32 %v135_v9, %v107_v52  ;;  %v198_v27 = vsel %vm192_vm2, %v185_v55, %v186_v41  ;;  %v199_v28 = vsel %vm192_vm2, %v184_v45, %v185_v55  ;;  %v97_v47 = vpop.permute.xlu0 %96 }
  0x8c   :  { %v212_v31 = vadd.f32 %v204_v6, %v178_v13  ;;  %v213_v32 = vadd.f32 %v205_v7, %v179_v19  ;;  %v202_v33 = vmul.f32 %v5712_v30, %v199_v28  ;;  %v203_v39 = vmul.f32 %v5712_v30, %v198_v27 }
  0x8d   :  { %v176_v36 = vadd.f32 %v168_v20, %v142_v23  ;;  %v177_v38 = vadd.f32 %v169_v21, %v143_v26  ;;  %v121_v40 = vrot.slane %v102_v22, 1  ;;  %v157_v46 = vrot.slane %v102_v22, 2 }
  0x8e   :  { %v224_v42 = vadd.f32 %v5720_v35, %v212_v31  ;;  %v225_v41 = vadd.f32 %v5720_v35, %v213_v32  ;;  %v191_v50 = vrot.slane %v102_v22, 3  ;;  %v111_v51 = vmul.f32 %v5690_v18, %v5686_v15 }
  0x8f   :  { %v210_v48 = vadd.f32 %v202_v33, %v176_v36  ;;  %v211_v49 = vadd.f32 %v203_v39, %v177_v38  ;;  %v132_v37 = vsel %vm124_vm0, %v121_v40, %v114_v43  ;;  %v113_v52 = vmul.f32 %v5690_v18, %v102_v22 }
  0x90   :  { %v166_v53 = vsel %vm158_vm1, %v157_v46, %v150_v44  ;;  %v274_v54 = vrot.slane %v5767_v29, 3  ;;  %v141_v57 = vmul.f32 %v5684_v14, %v132_v37  ;;  %v112_v58 = vmul.f32 %v5690_v18, %v97_v47 }
  0x91   :  { %v222_v55 = vadd.f32 %v5720_v35, %v210_v48  ;;  %v223_v56 = vadd.f32 %v5720_v35, %v211_v49  ;;  %v5785_v43 = vmax.f32 %v224_v42, 0.0  ;;  %v5787_v59 = vmax.f32 %v225_v41, 0.0 }
  0x92   :  { %v120_v60 = vrot.slane %v97_v47, 1  ;;  %v156_v61 = vrot.slane %v97_v47, 2  ;;  %v175_v44 = vmul.f32 %v5704_v25, %v166_v53  ;;  %v200_v63 = vsel %vm192_vm2, %v191_v50, %v184_v45 }
  0x93   :  { %v5789_v62 = vmax.f32 %v222_v55, 0.0  ;;  %v190_v0 = vrot.slane %v97_v47, 3  ;;  %v5796_v1 = vmax.f32 %v223_v56, 0.0  ;;  %v149_v4 = vadd.f32 %v141_v57, %v113_v52 }
  0x94   :  { %v125_v18 = vsel %vm124_vm0, %v120_v60, %v121_v40  ;;  %v126_v2 = vsel %vm124_vm0, %v119_v16, %v120_v60  ;;  %v159_v3 = vsel %vm158_vm1, %v156_v61, %v157_v46  ;;  %v160_v45 = vsel %vm158_vm1, %v155_v17, %v156_v61 }
  0x95   :  { %v139_v34 = vmul.f32 %v5684_v14, %v126_v2  ;;  %v140_v5 = vmul.f32 %v5684_v14, %v125_v18  ;;  %v174_v6 = vmul.f32 %v5704_v25, %v159_v3  ;;  %v193_v7 = vsel %vm192_vm2, %v190_v0, %v191_v50 }
  0x96   :  { %v194_v16 = vsel %vm192_vm2, %v189_v24, %v190_v0  ;;  %v272_v8 = vrot.slane %v5785_v43, 3  ;;  %v173_v14 = vmul.f32 %v5704_v25, %v160_v45  ;;  %v208_v17 = vmul.f32 %v5712_v30, %v193_v7 }
  0x97   :  { %v147_v9 = vadd.f32 %v139_v34, %v111_v51  ;;  %v148_v10 = vadd.f32 %v140_v5, %v112_v58  ;;  %v207_v12 = vmul.f32 %v5712_v30, %v194_v16  ;;  %v270_v13 = vrot.slane %v5789_v62, 3 }
  0x98   :  { %v271_v19 = vrot.slane %v5796_v1, 3  ;;  %v254_v20 = vrot.slane %v5789_v62, 2  ;;  %v255_v24 = vrot.slane %v5796_v1, 2  ;;  %v256_v22 = vrot.slane %v5785_v43, 2 }
  0x99   :  { %v181_v15 = vadd.f32 %v173_v14, %v147_v9  ;;  %v182_v21 = vadd.f32 %v174_v6, %v148_v10  ;;  %v183_v23 = vadd.f32 %v175_v44, %v149_v4  ;;  %v238_v27 = vrot.slane %v5789_v62, 1 }
  0x9a   :  { %v283_v25 = vsel %vm192_vm2, %v271_v19, %v272_v8  ;;  %v284_v26 = vsel %vm192_vm2, %v270_v13, %v271_v19  ;;  %v267_v33 = vsel %vm158_vm1, %v255_v24, %v256_v22  ;;  %v268_v36 = vsel %vm158_vm1, %v254_v20, %v255_v24 }
  0x9b   :  { %v215_v28 = vadd.f32 %v207_v12, %v181_v15  ;;  %v216_v31 = vadd.f32 %v208_v17, %v182_v21  ;;  %v5230_v32 = vpack.i.bf16 %v283_v25, %v284_v26  ;;  %v239_v38 = vrot.slane %v5796_v1, 1 }
  0x9c   :  { %v240_v39 = vrot.slane %v5785_v43, 1  ;;  %v273_v40 = vrot.slane %v5787_v59, 3  ;;  %v209_v42 = vmul.f32 %v5712_v30, %v200_v63  ;;  %v5225_v47 = vpack.i.bf16 %v267_v33, %v268_v36  ;;  %v4058_v36 = vld [vmem:[%s7564_s0 + $0x48] sm:$0xff] }
  0x9d   :  { %v227_v41 = vadd.f32 %v5720_v35, %v215_v28  ;;  %v228_v46 = vadd.f32 %v5720_v35, %v216_v31  ;;  %5231 = vrot.lane.b32.xlu1 %v5230_v32, %s5586_s25  ;;  %v252_v49 = vsel %vm124_vm0, %v238_v27, %v239_v38  ;;  %v257_v37 = vrot.slane %v5787_v59, 2 }
  0x9e   :  { %v251_v48 = vsel %vm124_vm0, %v239_v38, %v240_v39  ;;  %v258_v30 = vrot.slane %v5767_v29, 2  ;;  %v217_v50 = vadd.f32 %v209_v42, %v183_v23  ;;  %5226 = vrot.lane.b32.xlu0 %v5225_v47, %s5587_s26  ;;  %v281_v52 = vsel %vm192_vm2, %v273_v40, %v274_v54  ;;  %v4992_v38 = vld [vmem:[%s7567_s3 + $0x38] sm:$0xff]  ;;  %v4063_v47 = vld [vmem:[%s7564_s0 + $0x70] sm:$0xff] }
  0x9f   :  { %v5220_v51 = vpack.i.bf16 %v251_v48, %v252_v49  ;;  %v242_v53 = vrot.slane %v5767_v29, 1  ;;  %v5862_v55 = vmax.f32 %v227_v41, 0.0  ;;  %v5864_v56 = vmax.f32 %v228_v46, 0.0  ;;  %481 = vmatpush.bf16.msra.mxu0 %v4992_v38  ;;  %v4060_v42 = vld [vmem:[%s7564_s0 + $0x58] sm:$0xff]  ;;  %v4215_v41 = vld [vmem:[%s7564_s0 + $0x90] sm:$0xff]  ;;  %v4214_v48 = vld [vmem:[%s7564_s0 + $0x88] sm:$0xff] }
  0xa0   :  { %v282_v57 = vsel %vm192_vm2, %v272_v8, %v273_v40  ;;  %v241_v58 = vrot.slane %v5787_v59, 1  ;;  %v265_v60 = vsel %vm158_vm1, %v257_v37, %v258_v30  ;;  %v266_v61 = vsel %vm158_vm1, %v256_v22, %v257_v37  ;;  %v4061_v40 = vld [vmem:[%s7564_s0 + $0x60] sm:$0xff]  ;;  %v4064_v46 = vld [vmem:[%s7564_s0 + $0x78] sm:$0xff] }
  0xa1   :  { %5221 = vrot.lane.b32.xlu2 %v5220_v51, %s5584_s23  ;;  %v229_v44 = vadd.f32 %v5720_v35, %v217_v50  ;;  %v5245_v63 = vpack.i.bf16 %v281_v52, %v282_v57  ;;  %v275_v2 = vrot.slane %v5862_v55, 3  ;;  %v276_v3 = vrot.slane %v5864_v56, 3  ;;  %v4213_v49 = vld [vmem:[%s7564_s0 + $0x80] sm:$0xff]  ;;  %v4216_v37 = vld [vmem:[%s7564_s0 + $0x98] sm:$0xff]  ;;  %v4990_v50 = vld [vmem:[%s7567_s3 + $0x28] sm:$0xff] }
  0xa2   :  { %v249_v0 = vsel %vm124_vm0, %v241_v58, %v242_v53  ;;  %v250_v18 = vsel %vm124_vm0, %v240_v39, %v241_v58  ;;  %v5240_v4 = vpack.i.bf16 %v265_v60, %v266_v61  ;;  %v259_v34 = vrot.slane %v5862_v55, 2  ;;  %v4062_v39 = vld [vmem:[%s7564_s0 + $0x68] sm:$0xff]  ;;  %v4989_v51 = vld [vmem:[%s7567_s3 + $0x20] sm:$0xff]  ;;  %v4988_v52 = vld [vmem:[%s7567_s3 + $0x18] sm:$0xff] }
  0xa3   :  { %v260_v5 = vrot.slane %v5864_v56, 2  ;;  %v5884_v45 = vmax.f32 %v229_v44, 0.0  ;;  %v5235_v35 = vpack.i.bf16 %v249_v0, %v250_v18  ;;  %v279_v6 = vsel %vm192_vm2, %v275_v2, %v276_v3  ;;  %v4986_v57 = vld [vmem:[%s7567_s3 + $0x8] sm:$0xff]  ;;  %v4985_v58 = vld [vmem:[%s7567_s3] sm:$0xff] }
  0xa4   :  { %v280_v7 = vsel %vm192_vm2, %v274_v54, %v275_v2  ;;  %v243_v16 = vrot.slane %v5862_v55, 1  ;;  %v244_v8 = vrot.slane %v5864_v56, 1  ;;  %v264_v10 = vsel %vm158_vm1, %v258_v30, %v259_v34  ;;  %v4991_v30 = vld [vmem:[%s7567_s3 + $0x30] sm:$0xff] }
  0xa5   :  { %5246 = vrot.lane.b32.xlu1 %v5245_v63, %s5586_s25  ;;  %v263_v9 = vsel %vm158_vm1, %v259_v34, %v260_v5  ;;  %v5260_v14 = vpack.i.bf16 %v279_v6, %v280_v7  ;;  %v277_v54 = vrot.slane %v5884_v45, 3  ;;  %v261_v15 = vrot.slane %v5884_v45, 2  ;;  %482 = vmatpush.bf16.msra.mxu0 %v4991_v30 }
  0xa6   :  { %5241 = vrot.lane.b32.xlu0 %v5240_v4, %s5587_s26  ;;  %v247_v12 = vsel %vm124_vm0, %v243_v16, %v244_v8  ;;  %v248_v17 = vsel %vm124_vm0, %v242_v53, %v243_v16  ;;  %v5255_v19 = vpack.i.bf16 %v263_v9, %v264_v10  ;;  %v245_v23 = vrot.slane %v5884_v45, 1  ;;  %v4987_v53 = vld [vmem:[%s7567_s3 + $0x10] sm:$0xff] }
  0xa7   :  { %v5250_v21 = vpack.i.bf16 %v247_v12, %v248_v17  ;;  %v278_v24 = vsel %vm192_vm2, %v276_v3, %v277_v54  ;;  %v285_v22 = vsel %vm192_vm2, %v277_v54, %v270_v13  ;;  %v262_v25 = vsel %vm158_vm1, %v260_v5, %v261_v15 }
  0xa8   :  { %v269_v26 = vsel %vm158_vm1, %v261_v15, %v254_v20  ;;  %v5275_v28 = vpack.i.bf16 %v285_v22, %v278_v24  ;;  %v246_v31 = vsel %vm124_vm0, %v244_v8, %v245_v23  ;;  %v253_v13 = vsel %vm124_vm0, %v245_v23, %v238_v27  ;;  %v4059_v20 = vld [vmem:[%s7564_s0 + $0x50] sm:$0xff]  ;;  %v4057_v27 = vld [vmem:[%s7564_s0 + $0x40] sm:$0xff] }
  0xa9   :  { %5236 = vrot.lane.b32.xlu2 %v5235_v35, %s5584_s23  ;;  %v5270_v32 = vpack.i.bf16 %v269_v26, %v262_v25  ;;  %v5265_v33 = vpack.i.bf16 %v253_v13, %v246_v31  ;;  %483 = vmatpush.bf16.msra.mxu0 %v4990_v50 }
  0xad   :  { %5261 = vrot.lane.b32.xlu1 %v5260_v14, %s5586_s25  ;;  %484 = vmatpush.bf16.msra.mxu0 %v4989_v51 }
  0xae   :  { %5256 = vrot.lane.b32.xlu0 %v5255_v19, %s5587_s26 }
  0xb1   :  { %5251 = vrot.lane.b32.xlu2 %v5250_v21, %s5584_s23  ;;  %485 = vmatpush.bf16.msra.mxu0 %v4988_v52 }
  0xb5   :  { %5276 = vrot.lane.b32.xlu1 %v5275_v28, %s5586_s25  ;;  %486 = vmatpush.bf16.msra.mxu0 %v4987_v53 }
  0xb6   :  { %5271 = vrot.lane.b32.xlu0 %v5270_v32, %s5587_s26 }
  0xb9   :  { %5266 = vrot.lane.b32.xlu2 %v5265_v33, %s5584_s23  ;;  %487 = vmatpush.bf16.msra.mxu0 %v4986_v57 }
  0xbd   :  { %914 = vperm.xlu1 %5218, %v4059_v20   ;;  %488 = vmatpush.bf16.msra.mxu0 %v4985_v58 }
  0xbe   :  { %909 = vperm.xlu0 %5217, %v4058_v36  }
  0xc1   :  { %904 = vperm.xlu2 %5219, %v4057_v27  }
  0xc5   :  { %929 = vperm.xlu1 %5218, %v4062_v39  }
  0xc6   :  { %924 = vperm.xlu0 %5217, %v4061_v40  }
  0xc9   :  { %919 = vperm.xlu2 %5219, %v4060_v42  }
  0xcd   :  { %1743 = vperm.xlu1 %5218, %v4215_v41  }
  0xce   :  { %939 = vperm.xlu0 %5217, %v4064_v46  }
  0xd1   :  { %934 = vperm.xlu2 %5219, %v4063_v47  }
  0xd6   :  { %1738 = vperm.xlu0 %5217, %v4214_v48  }
  0xd9   :  { %1733 = vperm.xlu2 %5219, %v4213_v49   ;;  %v4065_v49 = vld [vmem:[%s7565_s1 + $0x4] sm:$0xf] }
  0xda   :  { %v6024_v52 = vperm.slane %v4065_v49, 1 }
  0xe1   :  { %1748 = vperm.xlu2 %5219, %v4216_v37  }
  0xfb   :  { %v5222_v60 = vpop.permute.xlu2 %5221 }
  0xfc   :  { %v5224_v44 = vunpack.i.h.bf16 %v5222_v60  ;;  %v5223_v63 = vunpack.i.l.bf16 %v5222_v60  ;;  %v6029_v60 = vperm.slane %v4065_v49, 0 }
  0xfe   :  { %v384_v5 = vsel %vm382_vm3, %v5796_v1, %v5224_v44  ;;  %v383_v35 = vsel %vm382_vm3, %v5789_v62, %v5223_v63  ;;  %v6032_v44 = vperm.slane %v4065_v49, 2 }
 0x103   :  { %v5237_v61 = vpop.permute.xlu2 %5236 }
 0x104   :  { %v5239_v17 = vunpack.i.h.bf16 %v5237_v61  ;;  %v5238_v54 = vunpack.i.l.bf16 %v5237_v61 }
 0x106   :  { %v386_v62 = vsel %vm382_vm3, %v5787_v59, %v5239_v17  ;;  %v385_v21 = vsel %vm382_vm3, %v5785_v43, %v5238_v54 }
 0x10b   :  { %v5252_v6 = vpop.permute.xlu2 %5251 }
 0x10c   :  { %v5254_v43 = vunpack.i.h.bf16 %v5252_v6  ;;  %v5253_v36 = vunpack.i.l.bf16 %v5252_v6 }
 0x10e   :  { %v388_v39 = vsel %vm382_vm3, %v5862_v55, %v5254_v43  ;;  %v387_v40 = vsel %vm382_vm3, %v5767_v29, %v5253_v36 }
 0x10f   :  { %v5232_v0 = vpop.permute.xlu1 %5231 }
 0x110   :  { %v5234_v18 = vunpack.i.h.bf16 %v5232_v0  ;;  %v5233_v2 = vunpack.i.l.bf16 %v5232_v0  ;;  %v5227_v3 = vpop.permute.xlu0 %5226 }
 0x111   :  { %v5229_v4 = vunpack.i.h.bf16 %v5227_v3  ;;  %v5228_v34 = vunpack.i.l.bf16 %v5227_v3 }
 0x113   :  { %v392_v7 = vsel %vm391_vm4, %v383_v35, %v5228_v34  ;;  %v393_v16 = vsel %vm391_vm4, %v384_v5, %v5229_v4  ;;  %v5267_v15 = vpop.permute.xlu2 %5266 }
 0x114   :  { %v401_v8 = vsel %vm400_vm5, %v392_v7, %v5233_v2  ;;  %v402_v9 = vsel %vm400_vm5, %v393_v16, %v5234_v18  ;;  %v5269_v51 = vunpack.i.h.bf16 %v5267_v15  ;;  %v5268_v55 = vunpack.i.l.bf16 %v5267_v15 }
 0x115   :  { %v409_v10 = vpack.c.bf16 %v402_v9, %v401_v8  ;;  %v6040_v18 = vperm.slane %v4065_v49, 3 }
 0x116   :  { %v390_v34 = vsel %vm382_vm3, %v5884_v45, %v5269_v51  ;;  %v389_v5 = vsel %vm382_vm3, %v5864_v56, %v5268_v55 }
 0x117   :  { %v5247_v14 = vpop.permute.xlu1 %5246  ;;  %489 = vmatmul.bf16.vlgmr.msra.gmra.mxu0 %v409_v10 }
 0x118   :  { %v5242_v12 = vpop.permute.xlu0 %5241  ;;  %v5249_v24 = vunpack.i.h.bf16 %v5247_v14  ;;  %v5248_v22 = vunpack.i.l.bf16 %v5247_v14 }
 0x119   :  { %v5244_v19 = vunpack.i.h.bf16 %v5242_v12  ;;  %v5243_v1 = vunpack.i.l.bf16 %v5242_v12 }
 0x11b   :  { %v394_v25 = vsel %vm391_vm4, %v385_v21, %v5243_v1  ;;  %v395_v26 = vsel %vm391_vm4, %v386_v62, %v5244_v19  ;;  %v6007_v33 = vpop.permute.xlu2 %904 }
 0x11c   :  { %v403_v31 = vsel %vm400_vm5, %v394_v25, %v5248_v22  ;;  %v404_v13 = vsel %vm400_vm5, %v395_v26, %v5249_v24  ;;  %v953_v29 = vrot.slane %v6007_v33, 1  ;;  %v945_v7 = vmul.f32 %v6029_v60, %v6007_v33 }
 0x11d   :  { %v410_v32 = vpack.c.bf16 %v404_v13, %v403_v31  ;;  %v986_v16 = vrot.slane %v6007_v33, 2  ;;  %v1019_v8 = vrot.slane %v6007_v33, 3 }
 0x11f   :  { %v5262_v23 = vpop.permute.xlu1 %5261 }
 0x120   :  { %v5257_v28 = vpop.permute.xlu0 %5256  ;;  %v5264_v42 = vunpack.i.h.bf16 %v5262_v23  ;;  %v5263_v41 = vunpack.i.l.bf16 %v5262_v23 }
 0x121   :  { %v5259_v27 = vunpack.i.h.bf16 %v5257_v28  ;;  %v5258_v38 = vunpack.i.l.bf16 %v5257_v28 }
 0x123   :  { %v396_v47 = vsel %vm391_vm4, %v387_v40, %v5258_v38  ;;  %v397_v48 = vsel %vm391_vm4, %v388_v39, %v5259_v27  ;;  %v6022_v37 = vpop.permute.xlu2 %919 }
 0x124   :  { %v405_v57 = vsel %vm400_vm5, %v396_v47, %v5263_v41  ;;  %v406_v58 = vsel %vm400_vm5, %v397_v48, %v5264_v42  ;;  %v956_v61 = vrot.slane %v6022_v37, 1  ;;  %v989_v10 = vrot.slane %v6022_v37, 2 }
 0x125   :  { %v411_v4 = vpack.c.bf16 %v406_v58, %v405_v57  ;;  %v1022_v1 = vrot.slane %v6022_v37, 3  ;;  %v6101_v57 = vld [vmem:[%s7566_s2 + $0x1] ss:$0 sm:$0xff] }
 0x127   :  { %v6009_v20 = vpop.permute.xlu1 %5276  ;;  %494 = vmatmul.bf16.gmra.mxu0 %v410_v32 }
 0x128   :  { %v6011_v59 = vpop.permute.xlu0 %5271  ;;  %v5279_v23 = vunpack.i.h.bf16 %v6009_v20  ;;  %v5278_v25 = vunpack.i.l.bf16 %v6009_v20 }
 0x129   :  { %v5274_v45 = vunpack.i.h.bf16 %v6011_v59  ;;  %v5273_v14 = vunpack.i.l.bf16 %v6011_v59 }
 0x12b   :  { %v398_v32 = vsel %vm391_vm4, %v389_v5, %v5273_v14  ;;  %v399_v59 = vsel %vm391_vm4, %v390_v34, %v5274_v45  ;;  %v6108_v34 = vpop.permute.xlu2 %934 }
 0x12f   :  { %v915_v46 = vpop.permute.xlu1 %914 }
 0x130   :  { %v955_v30 = vrot.slane %v915_v46, 1  ;;  %v910_v50 = vpop.permute.xlu0 %909  ;;  %v988_v35 = vrot.slane %v915_v46, 2  ;;  %v1021_v12 = vrot.slane %v915_v46, 3  ;;  %v947_v15 = vmul.f32 %v6029_v60, %v915_v46 }
 0x131   :  { %v954_v53 = vrot.slane %v910_v50, 1  ;;  %v987_v3 = vrot.slane %v910_v50, 2  ;;  %v946_v17 = vmul.f32 %v6029_v60, %v910_v50  ;;  %v1020_v19 = vrot.slane %v910_v50, 3 }
 0x132   :  { %v965_v2 = vsel %vm124_vm0, %v955_v30, %v956_v61  ;;  %v998_v26 = vsel %vm158_vm1, %v988_v35, %v989_v10  ;;  %v1031_v40 = vsel %vm192_vm2, %v1021_v12, %v1022_v1  ;;  %v407_v46 = vsel %vm400_vm5, %v398_v32, %v5278_v25 }
 0x133   :  { %v966_v63 = vsel %vm124_vm0, %v954_v53, %v955_v30  ;;  %v967_v0 = vsel %vm124_vm0, %v953_v29, %v954_v53  ;;  %v972_v56 = vmul.f32 %v6024_v52, %v965_v2  ;;  %v1000_v54 = vsel %vm158_vm1, %v986_v16, %v987_v3 }
 0x134   :  { %v970_v6 = vmul.f32 %v6024_v52, %v967_v0  ;;  %v971_v9 = vmul.f32 %v6024_v52, %v966_v63  ;;  %v999_v21 = vsel %vm158_vm1, %v987_v3, %v988_v35  ;;  %v1003_v13 = vmul.f32 %v6032_v44, %v1000_v54 }
 0x135   :  { %v980_v31 = vadd.f32 %v972_v56, %v947_v15  ;;  %v1004_v43 = vmul.f32 %v6032_v44, %v999_v21  ;;  %v1032_v36 = vsel %vm192_vm2, %v1020_v19, %v1021_v12  ;;  %v1033_v20 = vsel %vm192_vm2, %v1019_v8, %v1020_v19 }
 0x136   :  { %v978_v62 = vadd.f32 %v970_v6, %v945_v7  ;;  %v979_v28 = vadd.f32 %v971_v9, %v946_v17  ;;  %v1005_v38 = vmul.f32 %v6032_v44, %v998_v26  ;;  %v1036_v48 = vmul.f32 %v6040_v18, %v1033_v20 }
 0x137   :  { %499 = vmatmul.bf16.gmra.mxu0 %v411_v4  ;;  %v6067_v24 = vpop.permute.xlu1 %929  ;;  %v1037_v49 = vmul.f32 %v6040_v18, %v1032_v36  ;;  %v408_v30 = vsel %vm400_vm5, %v399_v59, %v5279_v23  ;;  %v1038_v58 = vmul.f32 %v6040_v18, %v1031_v40  ;;  %v948_v4 = vmul.f32 %v6029_v60, %v6022_v37 }
 0x138   :  { %v925_v22 = vpop.permute.xlu0 %924  ;;  %v958_v27 = vrot.slane %v6067_v24, 1  ;;  %v1011_v39 = vadd.f32 %v1003_v13, %v978_v62  ;;  %v1012_v42 = vadd.f32 %v1004_v43, %v979_v28  ;;  %v1013_v47 = vadd.f32 %v1005_v38, %v980_v31 }
 0x139   :  { %v957_v41 = vrot.slane %v925_v22, 1  ;;  %v991_v50 = vrot.slane %v6067_v24, 2  ;;  %v990_v53 = vrot.slane %v925_v22, 2  ;;  %v949_v5 = vmul.f32 %v6029_v60, %v925_v22 }
 0x13a   :  { %v1044_v63 = vadd.f32 %v1036_v48, %v1011_v39  ;;  %v1045_v3 = vadd.f32 %v1037_v49, %v1012_v42  ;;  %v412_v6 = vpack.c.bf16 %v408_v30, %v407_v46  ;;  %v1024_v7 = vrot.slane %v6067_v24, 3 }
 0x13b   :  { %v963_v51 = vsel %vm124_vm0, %v957_v41, %v958_v27  ;;  %v964_v55 = vsel %vm124_vm0, %v956_v61, %v957_v41  ;;  %v1046_v61 = vadd.f32 %v1038_v58, %v1013_v47  ;;  %v996_v9 = vsel %vm158_vm1, %v990_v53, %v991_v50 }
 0x13c   :  { %v973_v0 = vmul.f32 %v6024_v52, %v964_v55  ;;  %v974_v2 = vmul.f32 %v6024_v52, %v963_v51  ;;  %v997_v45 = vsel %vm158_vm1, %v989_v10, %v990_v53  ;;  %v1023_v14 = vrot.slane %v925_v22, 3 }
 0x13d   :  { %v1057_v37 = vadd.f32 %v6101_v57, %v1044_v63  ;;  %v959_v17 = vrot.slane %v6108_v34, 1  ;;  %v1058_v54 = vadd.f32 %v6101_v57, %v1045_v3  ;;  %v1059_v15 = vadd.f32 %v6101_v57, %v1046_v61 }
 0x13e   :  { %v981_v56 = vadd.f32 %v973_v0, %v948_v4  ;;  %v982_v12 = vadd.f32 %v974_v2, %v949_v5  ;;  %v1006_v62 = vmul.f32 %v6032_v44, %v997_v45  ;;  %v1007_v21 = vmul.f32 %v6032_v44, %v996_v9  ;;  %v6186_v9 = vpop.permute.xlu2 %1733 }
 0x13f   :  { %v1029_v10 = vsel %vm192_vm2, %v1023_v14, %v1024_v7  ;;  %v1030_v22 = vsel %vm192_vm2, %v1022_v1, %v1023_v14  ;;  %v6132_v25 = vmax.f32 %v1057_v37, 0.0  ;;  %v6138_v13 = vmax.f32 %v1058_v54, 0.0 }
 0x140   :  { %v940_v35 = vpop.permute.xlu0 %939  ;;  %v1014_v26 = vadd.f32 %v1006_v62, %v981_v56  ;;  %v1015_v28 = vadd.f32 %v1007_v21, %v982_v12  ;;  %v6140_v59 = vmax.f32 %v1059_v15, 0.0  ;;  %v1039_v43 = vmul.f32 %v6040_v18, %v1030_v22 }
 0x141   :  { %v960_v19 = vrot.slane %v940_v35, 1  ;;  %v993_v32 = vrot.slane %v940_v35, 2  ;;  %v1040_v1 = vmul.f32 %v6040_v18, %v1029_v10  ;;  %v951_v20 = vmul.f32 %v6029_v60, %v6108_v34 }
 0x142   :  { %v992_v38 = vrot.slane %v6108_v34, 2  ;;  %v1025_v39 = vrot.slane %v6108_v34, 3  ;;  %v1047_v40 = vadd.f32 %v1039_v43, %v1014_v26  ;;  %v952_v41 = vmul.f32 %v6029_v60, %v940_v35 }
 0x143   :  { %v961_v23 = vsel %vm124_vm0, %v959_v17, %v960_v19  ;;  %v968_v31 = vsel %vm124_vm0, %v960_v19, %v953_v29  ;;  %v1048_v42 = vadd.f32 %v1040_v1, %v1015_v28  ;;  %v1105_v46 = vrot.slane %v6132_v25, 3  ;;  %v6217_v28 = vpop.permute.xlu1 %1743 }
 0x144   :  { %v976_v36 = vmul.f32 %v6024_v52, %v961_v23  ;;  %v977_v29 = vmul.f32 %v6024_v52, %v968_v31  ;;  %v994_v47 = vsel %vm158_vm1, %v992_v38, %v993_v32  ;;  %v1001_v48 = vsel %vm158_vm1, %v993_v32, %v986_v16  ;;  %v4218_v23 = vld [vmem:[%s7564_s0 + $0xa8] sm:$0xff] }
 0x145   :  { %v1026_v49 = vrot.slane %v940_v35, 3  ;;  %v1106_v30 = vrot.slane %v6138_v13, 3  ;;  %v1107_v55 = vrot.slane %v6140_v59, 3  ;;  %v1073_v53 = vrot.slane %v6132_v25, 1 }
 0x146   :  { %v984_v51 = vadd.f32 %v976_v36, %v951_v20  ;;  %v1074_v58 = vrot.slane %v6138_v13, 1  ;;  %v962_v63 = vsel %vm124_vm0, %v958_v27, %v959_v17  ;;  %v985_v0 = vadd.f32 %v977_v29, %v952_v41 }
 0x147   :  { %504 = vmatmul.bf16.gmra.mxu0 %v412_v6  ;;  %v1119_v16 = vsel %vm192_vm2, %v1105_v46, %v1106_v30  ;;  %v1075_v2 = vrot.slane %v6140_v59, 1  ;;  %v1060_v3 = vadd.f32 %v6101_v57, %v1047_v40  ;;  %v1009_v4 = vmul.f32 %v6032_v44, %v994_v47 }
 0x148   :  { %v1118_v34 = vsel %vm192_vm2, %v1106_v30, %v1107_v55  ;;  %v1087_v27 = vsel %vm124_vm0, %v1073_v53, %v1074_v58  ;;  %v1010_v61 = vmul.f32 %v6032_v44, %v1001_v48  ;;  %v1027_v5 = vsel %vm192_vm2, %v1025_v39, %v1026_v49  ;;  %v6208_v22 = vpop.permute.xlu0 %1738 }
 0x149   :  { %v5295_v35 = vpack.i.bf16 %v1118_v34, %v1119_v16  ;;  %v1086_v6 = vsel %vm124_vm0, %v1074_v58, %v1075_v2  ;;  %v1061_v45 = vadd.f32 %v6101_v57, %v1048_v42  ;;  %v1017_v14 = vadd.f32 %v1009_v4, %v984_v51 }
 0x14a   :  { %v1034_v37 = vsel %vm192_vm2, %v1026_v49, %v1019_v8  ;;  %v5280_v56 = vpack.i.bf16 %v1086_v6, %v1087_v27  ;;  %v1018_v12 = vadd.f32 %v1010_v61, %v985_v0  ;;  %v975_v17 = vmul.f32 %v6024_v52, %v962_v63 }
 0x14b   :  { %5296 = vrot.lane.b32.xlu2 %v5295_v35, %s5586_s25  ;;  %v1042_v54 = vmul.f32 %v6040_v18, %v1027_v5  ;;  %v1043_v19 = vmul.f32 %v6040_v18, %v1034_v37  ;;  %v950_v15 = vmul.f32 %v6029_v60, %v6067_v24  ;;  %v6200_v62 = vmax.f32 %v1060_v3, 0.0  ;;  %v4221_v60 = vld [vmem:[%s7565_s1 + $0x8] sm:$0xf] }
 0x14c   :  { %5281 = vrot.lane.b32.xlu0 %v5280_v56, %s5584_s23  ;;  %v6202_v33 = vmax.f32 %v1061_v45, 0.0  ;;  %v995_v21 = vsel %vm158_vm1, %v991_v50, %v992_v38  ;;  %v1028_v43 = vsel %vm192_vm2, %v1024_v7, %v1025_v39  ;;  %v1783_v36 = vrot.slane %v6208_v22, 1 }
 0x14d   :  { %v1050_v8 = vadd.f32 %v1042_v54, %v1017_v14  ;;  %v1051_v52 = vadd.f32 %v1043_v19, %v1018_v12  ;;  %v983_v10 = vadd.f32 %v975_v17, %v950_v15  ;;  %v1008_v26 = vmul.f32 %v6032_v44, %v995_v21  ;;  %v6228_v44 = vpop.permute.xlu2 %1748 }
 0x14e   :  { %v1108_v50 = vrot.slane %v6200_v62, 3  ;;  %v1109_v32 = vrot.slane %v6202_v33, 3  ;;  %v6230_v38 = vperm.slane %v4221_v60, 0  ;;  %v1782_v29 = vrot.slane %v6186_v9, 1 }
 0x14f   :  { %v1063_v31 = vadd.f32 %v6101_v57, %v1050_v8  ;;  %v1064_v1 = vadd.f32 %v6101_v57, %v1051_v52  ;;  %v1016_v20 = vadd.f32 %v1008_v26, %v983_v10  ;;  %v1784_v40 = vrot.slane %v6217_v28, 1  ;;  %v4220_v26 = vld [vmem:[%s7564_s0 + $0xb8] sm:$0xff] }
 0x150   :  { %v1041_v42 = vmul.f32 %v6040_v18, %v1028_v43  ;;  %v1116_v7 = vsel %vm192_vm2, %v1108_v50, %v1109_v32  ;;  %v1117_v39 = vsel %vm192_vm2, %v1107_v55, %v1108_v50  ;;  %v1785_v41 = vrot.slane %v6228_v44, 1 }
 0x151   :  { %v6235_v24 = vmax.f32 %v1063_v31, 0.0  ;;  %v6244_v47 = vmax.f32 %v1064_v1, 0.0  ;;  %v1795_v48 = vsel %vm124_vm0, %v1783_v36, %v1784_v40  ;;  %v1796_v18 = vsel %vm124_vm0, %v1782_v29, %v1783_v36 }
 0x152   :  { %v1049_v49 = vadd.f32 %v1041_v42, %v1016_v20  ;;  %v6252_v30 = vperm.slane %v4221_v60, 1  ;;  %v1794_v51 = vsel %vm124_vm0, %v1784_v40, %v1785_v41  ;;  %v1816_v55 = vrot.slane %v6208_v22, 2 }
 0x153   :  { %1758 = vperm.xlu2 %5219, %v4218_v23   ;;  %v5315_v58 = vpack.i.bf16 %v1116_v7, %v1117_v39  ;;  %v6259_v63 = vperm.slane %v4221_v60, 2  ;;  %v1111_v3 = vrot.slane %v6235_v24, 3  ;;  %v1774_v4 = vmul.f32 %v6230_v38, %v6186_v9 }
 0x154   :  { %v1799_v0 = vmul.f32 %v6252_v30, %v1796_v18  ;;  %v1800_v16 = vmul.f32 %v6252_v30, %v1795_v48  ;;  %v1815_v34 = vrot.slane %v6186_v9, 2  ;;  %v1817_v27 = vrot.slane %v6217_v28, 2 }
 0x155   :  { %v1112_v61 = vrot.slane %v6244_v47, 3  ;;  %v1062_v5 = vadd.f32 %v6101_v57, %v1049_v49  ;;  %v1818_v35 = vrot.slane %v6228_v44, 2  ;;  %v1801_v6 = vmul.f32 %v6252_v30, %v1794_v51 }
 0x156   :  { %v1775_v45 = vmul.f32 %v6230_v38, %v6208_v22  ;;  %v1776_v14 = vmul.f32 %v6230_v38, %v6217_v28  ;;  %v1828_v37 = vsel %vm158_vm1, %v1816_v55, %v1817_v27  ;;  %v1829_v56 = vsel %vm158_vm1, %v1815_v34, %v1816_v55  ;;  %v6332_v55 = vld [vmem:[%s7566_s2 + $0x2] ss:$0 sm:$0xff] }
 0x157   :  { %v1849_v57 = vrot.slane %v6208_v22, 3  ;;  %v1807_v12 = vadd.f32 %v1799_v0, %v1774_v4  ;;  %v6286_v54 = vsel %vm192_vm2, %v1111_v3, %v1112_v61  ;;  %v6292_v19 = vsel %vm192_vm2, %v1112_v61, %v1105_v46 }
 0x158   :  { %v1808_v17 = vadd.f32 %v1800_v16, %v1775_v45  ;;  %v1848_v15 = vrot.slane %v6186_v9, 3  ;;  %v1827_v8 = vsel %vm158_vm1, %v1817_v27, %v1818_v35  ;;  %v1850_v21 = vrot.slane %v6217_v28, 3 }
 0x159   :  { %v5355_v52 = vpack.i.bf16 %v6292_v19, %v6286_v54  ;;  %v6302_v10 = vmax.f32 %v1062_v5, 0.0  ;;  %v1809_v22 = vadd.f32 %v1801_v6, %v1776_v14  ;;  %v1832_v23 = vmul.f32 %v6259_v63, %v1829_v56  ;;  %v5001_v54 = vld [vmem:[%s7569_s5 + $0x40] sm:$0xff]  ;;  %v5011_v19 = vld [vmem:[%s7567_s3 + $0x50] sm:$0xff] }
 0x15a   :  { %v1833_v46 = vmul.f32 %v6259_v63, %v1828_v37  ;;  %v1851_v31 = vrot.slane %v6228_v44, 3  ;;  %v1861_v50 = vsel %vm192_vm2, %v1849_v57, %v1850_v21  ;;  %v1862_v28 = vsel %vm192_vm2, %v1848_v15, %v1849_v57 }
 0x15b   :  { %5316 = vrot.lane.b32.xlu2 %v5315_v58, %s5586_s25  ;;  %v6316_v43 = vperm.slane %v4221_v60, 3  ;;  %v1834_v1 = vmul.f32 %v6259_v63, %v1827_v8  ;;  %v1840_v36 = vadd.f32 %v1832_v23, %v1807_v12  ;;  %v1110_v48 = vrot.slane %v6302_v10, 3 }
 0x15c   :  { %v1841_v20 = vadd.f32 %v1833_v46, %v1808_v17  ;;  %v1860_v40 = vsel %vm192_vm2, %v1850_v21, %v1851_v31  ;;  %v1095_v61 = vrot.slane %v6235_v24, 2  ;;  %v1089_v6 = vrot.slane %v6132_v25, 2 }
 0x15d   :  { %v1842_v42 = vadd.f32 %v1834_v1, %v1809_v22  ;;  %v1865_v7 = vmul.f32 %v6316_v43, %v1862_v28  ;;  %v1866_v39 = vmul.f32 %v6316_v43, %v1861_v50  ;;  %v1867_v60 = vmul.f32 %v6316_v43, %v1860_v40  ;;  %v5523_v50 = vld [vmem:[%s7568_s4] ss:$0 sm:$0xff] }
 0x15e   :  { %v1114_v51 = vsel %vm192_vm2, %v1110_v48, %v1111_v3  ;;  %v1115_v0 = vsel %vm192_vm2, %v1109_v32, %v1110_v48  ;;  %v1096_v3 = vrot.slane %v6244_v47, 2 }
 0x15f   :  { %v1873_v18 = vadd.f32 %v1865_v7, %v1840_v36  ;;  %v1874_v49 = vadd.f32 %v1866_v39, %v1841_v20  ;;  %v1875_v58 = vadd.f32 %v1867_v60, %v1842_v42  ;;  %v5335_v16 = vpack.i.bf16 %v1114_v51, %v1115_v0 }
 0x160   :  { %v1097_v32 = vsel %vm158_vm1, %v1095_v61, %v1096_v3  ;;  %v1104_v37 = vsel %vm158_vm1, %v1096_v3, %v1089_v6  ;;  %v1090_v0 = vrot.slane %v6138_v13, 2 }
 0x161   :  { %v1886_v4 = vadd.f32 %v6332_v55, %v1873_v18  ;;  %v1887_v27 = vadd.f32 %v6332_v55, %v1874_v49  ;;  %v1888_v5 = vadd.f32 %v6332_v55, %v1875_v58  ;;  %v5345_v57 = vpack.i.bf16 %v1104_v37, %v1097_v32 }
 0x162   :  { %v1103_v3 = vsel %vm158_vm1, %v1089_v6, %v1090_v0  ;;  %v4217_v6 = vld [vmem:[%s7564_s0 + $0xa0] sm:$0xff] }
 0x163   :  { %1768 = vperm.xlu2 %5219, %v4220_v26   ;;  %v6345_v45 = vmax.f32 %v1886_v4, 0.0  ;;  %v6347_v14 = vmax.f32 %v1887_v27, 0.0  ;;  %v6355_v56 = vmax.f32 %v1888_v5, 0.0 }
 0x165   :  { %v7577_v12 = vrot.slane %v6345_v45, 2  ;;  %v1919_v17 = vrot.slane %v6347_v14, 2  ;;  %v7581_v8 = vrot.slane %v6355_v56, 2 }
 0x167   :  { %v1931_v21 = vsel %vm158_vm1, %v1919_v17, %v7581_v8  ;;  %v1932_v22 = vsel %vm158_vm1, %v7577_v12, %v1919_v17 }
 0x168   :  { %v5365_v23 = vpack.i.bf16 %v1931_v21, %v1932_v22 }
 0x16b   :  { %5336 = vrot.lane.b32.xlu2 %v5335_v16, %s5586_s25  ;;  %v1091_v16 = vrot.slane %v6140_v59, 2 }
 0x16d   :  { %v1102_v27 = vsel %vm158_vm1, %v1090_v0, %v1091_v16 }
 0x16e   :  { %v5290_v37 = vpack.i.bf16 %v1102_v27, %v1103_v3 }
 0x173   :  { %5346 = vrot.lane.b32.xlu2 %v5345_v57, %s5587_s26 }
 0x17b   :  { %5366 = vrot.lane.b32.xlu2 %v5365_v23, %s5587_s26 }
 0x194   :  { %v490_v46 = vpop.f32.mrf.mxu0 }
 0x195   :  { %v491_v1 = vadd.f32 %v5523_v50, %v490_v46 }
 0x197   :  { %v6375_v40 = vmax.f32 %v491_v1, 0.0  ;;  %v1076_v1 = vrot.slane %v6200_v62, 1 }
 0x199   :  { %v550_v48 = vrot.slane %v6375_v40, 3 }
 0x19c   :  { %v492_v26 = vpop.f32.mrf.mxu0 }
 0x19d   :  { %v493_v28 = vadd.f32 %v5523_v50, %v492_v26 }
 0x19f   :  { %v6373_v36 = vmax.f32 %v493_v28, 0.0 }
 0x1a1   :  { %v551_v39 = vrot.slane %v6373_v36, 3 }
 0x1a3   :  { %v564_v49 = vsel %vm192_vm2, %v550_v48, %v551_v39 }
 0x1a4   :  { %v495_v20 = vpop.f32.mrf.mxu0 }
 0x1a5   :  { %v496_v42 = vadd.f32 %v5523_v50, %v495_v20  ;;  %v1077_v20 = vrot.slane %v6202_v33, 1 }
 0x1a7   :  { %v6377_v7 = vmax.f32 %v496_v42, 0.0  ;;  %v1092_v42 = vrot.slane %v6200_v62, 2 }
 0x1a9   :  { %v552_v60 = vrot.slane %v6377_v7, 3 }
 0x1ab   :  { %v563_v18 = vsel %vm192_vm2, %v551_v39, %v552_v60  ;;  %v1093_v39 = vrot.slane %v6202_v33, 2 }
 0x1ac   :  { %v497_v51 = vpop.f32.mrf.mxu0  ;;  %v5285_v58 = vpack.i.bf16 %v563_v18, %v564_v49  ;;  %v1085_v49 = vsel %vm124_vm0, %v1075_v2, %v1076_v1 }
 0x1ad   :  { %v498_v4 = vadd.f32 %v5523_v50, %v497_v51  ;;  %v1100_v51 = vsel %vm158_vm1, %v1092_v42, %v1093_v39 }
 0x1ae   :  { %5286 = vrot.lane.b32.xlu1 %v5285_v58, %s5587_s26  ;;  %v1101_v58 = vsel %vm158_vm1, %v1091_v16, %v1092_v42  ;;  %v4219_v16 = vld [vmem:[%s7564_s0 + $0xb0] sm:$0xff]  ;;  %v5008_v42 = vld [vmem:[%s7569_s5 + $0x78] sm:$0xff] }
 0x1af   :  { %v6395_v5 = vmax.f32 %v498_v4, 0.0  ;;  %v5310_v3 = vpack.i.bf16 %v1100_v51, %v1101_v58  ;;  %815 = vmatpush.bf16.msra.mxu2 %v5008_v42  ;;  %v5015_v58 = vld [vmem:[%s7567_s3 + $0x70] sm:$0xff]  ;;  %v1903_v42 = vrot.slane %v6347_v14, 1 }
 0x1b1   :  { %v553_v21 = vrot.slane %v6395_v5, 3 }
 0x1b3   :  { %v562_v46 = vsel %vm192_vm2, %v552_v60, %v553_v21  ;;  %v1084_v60 = vsel %vm124_vm0, %v1076_v1, %v1077_v20  ;;  %v1094_v1 = vrot.slane %v6302_v10, 2 }
 0x1b4   :  { %v500_v32 = vpop.f32.mrf.mxu0  ;;  %v5305_v27 = vpack.i.bf16 %v1084_v60, %v1085_v49  ;;  %v5016_v60 = vld [vmem:[%s7567_s3 + $0x78] sm:$0xff] }
 0x1b5   :  { %v501_v57 = vadd.f32 %v5523_v50, %v500_v32  ;;  %1315 = vmatpush.bf16.msra.mxu3 %v5016_v60 }
 0x1b6   :  { %5291 = vrot.lane.b32.xlu1 %v5290_v37, %s5587_s26 }
 0x1b7   :  { %v6398_v17 = vmax.f32 %v501_v57, 0.0 }
 0x1b9   :  { %v554_v22 = vrot.slane %v6398_v17, 3  ;;  %1316 = vmatpush.bf16.msra.mxu3 %v5015_v58  ;;  %v5002_v58 = vld [vmem:[%s7569_s5 + $0x48] sm:$0xff] }
 0x1bb   :  { %v561_v23 = vsel %vm192_vm2, %v553_v21, %v554_v22 }
 0x1bc   :  { %v502_v26 = vpop.f32.mrf.mxu0  ;;  %v5300_v28 = vpack.i.bf16 %v561_v23, %v562_v46 }
 0x1bd   :  { %v503_v18 = vadd.f32 %v5523_v50, %v502_v26 }
 0x1be   :  { %5301 = vrot.lane.b32.xlu0 %v5300_v28, %s5587_s26  ;;  %1753 = vperm.xlu1 %5218, %v4217_v6   ;;  %v1079_v28 = vrot.slane %v6235_v24, 1 }
 0x1bf   :  { %v6424_v0 = vmax.f32 %v503_v18, 0.0  ;;  %v1078_v18 = vrot.slane %v6302_v10, 1 }
 0x1c1   :  { %v555_v2 = vrot.slane %v6424_v0, 3  ;;  %v1082_v51 = vsel %vm124_vm0, %v1078_v18, %v1079_v28 }
 0x1c3   :  { %v560_v46 = vsel %vm192_vm2, %v554_v22, %v555_v2  ;;  %v5007_v22 = vld [vmem:[%s7569_s5 + $0x70] sm:$0xff] }
 0x1c4   :  { %v505_v4 = vpop.f32.mrf.mxu0  ;;  %816 = vmatpush.bf16.msra.mxu2 %v5007_v22  ;;  %v5003_v22 = vld [vmem:[%s7569_s5 + $0x50] sm:$0xff] }
 0x1c5   :  { %v506_v32 = vadd.f32 %v5523_v50, %v505_v4  ;;  %v1099_v4 = vsel %vm158_vm1, %v1093_v39, %v1094_v1  ;;  %v5014_v39 = vld [vmem:[%s7567_s3 + $0x68] sm:$0xff] }
 0x1c6   :  { %5306 = vrot.lane.b32.xlu0 %v5305_v27, %s5584_s23  ;;  %5311 = vrot.lane.b32.xlu1 %v5310_v3, %s5587_s26 }
 0x1c7   :  { %v6428_v37 = vmax.f32 %v506_v32, 0.0  ;;  %v1080_v32 = vrot.slane %v6244_v47, 1  ;;  %1317 = vmatpush.bf16.msra.mxu3 %v5014_v39  ;;  %v5297_v39 = vpop.permute.xlu2 %5296 }
 0x1c9   :  { %v556_v57 = vrot.slane %v6428_v37, 3 }
 0x1cb   :  { %v559_v23 = vsel %vm192_vm2, %v555_v2, %v556_v57  ;;  %v5006_v2 = vld [vmem:[%s7569_s5 + $0x68] sm:$0xff] }
 0x1cc   :  { %v507_v21 = vpop.f32.mrf.mxu0  ;;  %v5320_v6 = vpack.i.bf16 %v559_v23, %v560_v46  ;;  %817 = vmatpush.bf16.msra.mxu2 %v5006_v2  ;;  %v5005_v23 = vld [vmem:[%s7569_s5 + $0x60] sm:$0xff] }
 0x1cd   :  { %v508_v26 = vadd.f32 %v5523_v50, %v507_v21  ;;  %v1098_v50 = vsel %vm158_vm1, %v1094_v1, %v1095_v61  ;;  %v1083_v61 = vsel %vm124_vm0, %v1077_v20, %v1078_v18  ;;  %v1081_v20 = vsel %vm124_vm0, %v1079_v28, %v1080_v32 }
 0x1ce   :  { %1763 = vperm.xlu1 %5218, %v4219_v16   ;;  %5321 = vrot.lane.b32.xlu0 %v5320_v6, %s5587_s26  ;;  %v5330_v27 = vpack.i.bf16 %v1098_v50, %v1099_v4  ;;  %v5325_v3 = vpack.i.bf16 %v1082_v51, %v1083_v61  ;;  %v1088_v21 = vsel %vm124_vm0, %v1080_v32, %v1073_v53  ;;  %v7576_v1 = vrot.slane %v6345_v45, 1 }
 0x1cf   :  { %v6456_v49 = vmax.f32 %v508_v26, 0.0  ;;  %v5013_v26 = vld [vmem:[%s7567_s3 + $0x60] sm:$0xff]  ;;  %v5340_v28 = vpack.i.bf16 %v1088_v21, %v1081_v20  ;;  %v7580_v18 = vrot.slane %v6355_v56, 1  ;;  %v7578_v4 = vrot.slane %v6345_v45, 3  ;;  %v6549_v20 = vpop.permute.xlu2 %1758 }
 0x1d0   :  { %818 = vmatpush.bf16.msra.mxu2 %v5005_v23  ;;  %1318 = vmatpush.bf16.msra.mxu3 %v5013_v26  ;;  %v1916_v50 = vsel %vm124_vm0, %v7576_v1, %v1903_v42  ;;  %v1935_v61 = vrot.slane %v6347_v14, 3  ;;  %v536_v21 = vrot.slane %v6377_v7, 2 }
 0x1d1   :  { %v557_v16 = vrot.slane %v6456_v49, 3  ;;  %v1915_v60 = vsel %vm124_vm0, %v1903_v42, %v7580_v18 }
 0x1d2   :  { %v5360_v51 = vpack.i.bf16 %v1915_v60, %v1916_v50  ;;  %v1948_v32 = vsel %vm192_vm2, %v7578_v4, %v1935_v61 }
 0x1d3   :  { %v558_v46 = vsel %vm192_vm2, %v556_v57, %v557_v16  ;;  %v565_v6 = vsel %vm192_vm2, %v557_v16, %v550_v48  ;;  %v5004_v57 = vld [vmem:[%s7569_s5 + $0x58] sm:$0xff]  ;;  %v5009_v16 = vld [vmem:[%s7567_s3 + $0x40] sm:$0xff] }
 0x1d4   :  { %v5350_v53 = vpack.i.bf16 %v565_v6, %v558_v46  ;;  %v5012_v48 = vld [vmem:[%s7567_s3 + $0x58] sm:$0xff]  ;;  %819 = vmatpush.bf16.msra.mxu2 %v5004_v57  ;;  %v535_v46 = vrot.slane %v6373_v36, 2  ;;  %v7579_v6 = vrot.slane %v6375_v40, 2 }
 0x1d5   :  { %1319 = vmatpush.bf16.msra.mxu3 %v5012_v48  ;;  %v5282_v48 = vpop.permute.xlu0 %5281 }
 0x1d6   :  { %5331 = vrot.lane.b32.xlu1 %v5330_v27, %s5587_s26  ;;  %5326 = vrot.lane.b32.xlu0 %v5325_v3, %s5584_s23  ;;  %v1936_v27 = vrot.slane %v6355_v56, 3  ;;  %v547_v42 = vsel %vm158_vm1, %v535_v46, %v536_v21  ;;  %v548_v57 = vsel %vm158_vm1, %v7579_v6, %v535_v46 }
 0x1d7   :  { %v6552_v23 = vpop.permute.xlu2 %5316 }
 0x1d8   :  { %820 = vmatpush.bf16.msra.mxu2 %v5003_v22  ;;  %v1947_v3 = vsel %vm192_vm2, %v1935_v61, %v1936_v27 }
 0x1d9   :  { %v5370_v2 = vpack.i.bf16 %v1947_v3, %v1948_v32  ;;  %1320 = vmatpush.bf16.msra.mxu3 %v5011_v19  ;;  %v5298_v19 = vunpack.i.l.bf16 %v5297_v39 }
 0x1dc   :  { %821 = vmatpush.bf16.msra.mxu2 %v5002_v58  ;;  %v5283_v58 = vunpack.i.l.bf16 %v5282_v48 }
 0x1de   :  { %5341 = vrot.lane.b32.xlu1 %v5340_v28, %s5584_s23  ;;  %5351 = vrot.lane.b32.xlu0 %v5350_v53, %s5587_s26 }
 0x1df   :  { %v6564_v61 = vpop.permute.xlu2 %1768 }
 0x1e0   :  { %822 = vmatpush.bf16.msra.mxu2 %v5001_v54  ;;  %v5299_v54 = vunpack.i.h.bf16 %v5297_v39  ;;  %v1789_v46 = vrot.slane %v6564_v61, 1 }
 0x1e6   :  { %5361 = vrot.lane.b32.xlu1 %v5360_v51, %s5584_s23  ;;  %5356 = vrot.lane.b32.xlu0 %v5355_v52, %s5586_s25  ;;  %v5010_v52 = vld [vmem:[%s7567_s3 + $0x48] sm:$0xff]  ;;  %v5284_v51 = vunpack.i.h.bf16 %v5282_v48  ;;  %v1822_v48 = vrot.slane %v6564_v61, 2 }
 0x1e7   :  { %1321 = vmatpush.bf16.msra.mxu3 %v5010_v52 }
 0x1e8   :  { %v1218_v52 = vsel %vm382_vm3, %v6138_v13, %v5284_v51 }
 0x1eb   :  { %1322 = vmatpush.bf16.msra.mxu3 %v5009_v16  ;;  %v1217_v16 = vsel %vm382_vm3, %v6132_v25, %v5283_v58  ;;  %v5040_v25 = vld [vmem:[%s7567_s3 + $0xb8] sm:$0xff]  ;;  %v7583_v58 = vrot.slane %v6549_v20, 2 }
 0x1ec   :  { %2144 = vmatpush.bf16.msrb.mxu2 %v5040_v25 }
 0x1ee   :  { %5371 = vrot.lane.b32.xlu0 %v5370_v2, %s5586_s25 }
 0x220   :  { %v5287_v26 = vpop.permute.xlu1 %5286 }
 0x221   :  { %v5289_v28 = vunpack.i.h.bf16 %v5287_v26  ;;  %v5288_v53 = vunpack.i.l.bf16 %v5287_v26 }
 0x223   :  { %v638_v60 = vsel %vm391_vm4, %v548_v57, %v5288_v53  ;;  %v639_v50 = vsel %vm391_vm4, %v547_v42, %v5289_v28  ;;  %v537_v53 = vrot.slane %v6395_v5, 2  ;;  %v538_v42 = vrot.slane %v6398_v17, 2 }
 0x224   :  { %v647_v22 = vpack.c.bf16 %v639_v50, %v638_v60  ;;  %v1777_v60 = vmul.f32 %v6230_v38, %v6228_v44  ;;  %v1787_v50 = vrot.slane %v6549_v20, 1 }
 0x225   :  { %v546_v51 = vsel %vm158_vm1, %v536_v21, %v537_v53  ;;  %v1830_v21 = vsel %vm158_vm1, %v1822_v48, %v1815_v34 }
 0x226   :  { %823 = vmatmul.bf16.vlgmr.msra.gmra.mxu2 %v647_v22  ;;  %v1797_v22 = vsel %vm124_vm0, %v1789_v46, %v1782_v29  ;;  %v5039_v29 = vld [vmem:[%s7567_s3 + $0xb0] sm:$0xff]  ;;  %v1839_v4 = vmul.f32 %v6259_v63, %v1830_v21 }
 0x227   :  { %2145 = vmatpush.bf16.msrb.mxu2 %v5039_v29 }
 0x228   :  { %v5292_v3 = vpop.permute.xlu1 %5291 }
 0x229   :  { %v5294_v32 = vunpack.i.h.bf16 %v5292_v3  ;;  %v5293_v2 = vunpack.i.l.bf16 %v5292_v3  ;;  %v7582_v3 = vrot.slane %v6549_v20, 3 }
 0x22b   :  { %v1225_v26 = vsel %vm391_vm4, %v1217_v16, %v5293_v2  ;;  %v1226_v28 = vsel %vm391_vm4, %v1218_v52, %v5294_v32  ;;  %v5319_v32 = vunpack.i.h.bf16 %v6552_v23 }
 0x22c   :  { %v1233_v57 = vsel %vm400_vm5, %v1225_v26, %v5298_v19  ;;  %v1234_v39 = vsel %vm400_vm5, %v1226_v28, %v5299_v54  ;;  %v545_v19 = vsel %vm158_vm1, %v537_v53, %v538_v42  ;;  %v1806_v28 = vmul.f32 %v6252_v30, %v1797_v22 }
 0x22d   :  { %v1241_v13 = vpack.c.bf16 %v1234_v39, %v1233_v57 }
 0x22f   :  { %1323 = vmatmul.bf16.vlgmr.msra.gmra.mxu3 %v1241_v13 }
 0x230   :  { %v5302_v2 = vpop.permute.xlu0 %5301  ;;  %v1754_v54 = vpop.permute.xlu1 %1753 }
 0x231   :  { %v5304_v52 = vunpack.i.h.bf16 %v5302_v2  ;;  %v5303_v16 = vunpack.i.l.bf16 %v5302_v2  ;;  %v1786_v26 = vrot.slane %v1754_v54, 1  ;;  %v1778_v57 = vmul.f32 %v6230_v38, %v1754_v54 }
 0x232   :  { %v1819_v53 = vrot.slane %v1754_v54, 2  ;;  %v1852_v39 = vrot.slane %v1754_v54, 3 }
 0x233   :  { %v1792_v13 = vsel %vm124_vm0, %v1786_v26, %v1787_v50  ;;  %v1793_v25 = vsel %vm124_vm0, %v1785_v41, %v1786_v26  ;;  %v640_v34 = vsel %vm391_vm4, %v546_v51, %v5303_v16  ;;  %v641_v2 = vsel %vm391_vm4, %v545_v19, %v5304_v52  ;;  %v5038_v41 = vld [vmem:[%s7567_s3 + $0xa8] sm:$0xff] }
 0x234   :  { %v1802_v22 = vmul.f32 %v6252_v30, %v1793_v25  ;;  %v1803_v1 = vmul.f32 %v6252_v30, %v1792_v13  ;;  %v1825_v54 = vsel %vm158_vm1, %v1819_v53, %v7583_v58  ;;  %v1826_v12 = vsel %vm158_vm1, %v1818_v35, %v1819_v53  ;;  %2146 = vmatpush.bf16.msrb.mxu2 %v5038_v41 }
 0x235   :  { %v1781_v51 = vmul.f32 %v6230_v38, %v6564_v61  ;;  %v1855_v19 = vrot.slane %v6564_v61, 3  ;;  %v1858_v52 = vsel %vm192_vm2, %v1852_v39, %v7582_v3  ;;  %v1859_v35 = vsel %vm192_vm2, %v1851_v31, %v1852_v39 }
 0x236   :  { %v1810_v29 = vadd.f32 %v1802_v22, %v1777_v60  ;;  %v1811_v16 = vadd.f32 %v1803_v1, %v1778_v57  ;;  %v1835_v26 = vmul.f32 %v6259_v63, %v1826_v12  ;;  %v1836_v53 = vmul.f32 %v6259_v63, %v1825_v54  ;;  %v5037_v12 = vld [vmem:[%s7567_s3 + $0xa0] sm:$0xff] }
 0x237   :  { %v5318_v13 = vunpack.i.l.bf16 %v6552_v23  ;;  %v1814_v25 = vadd.f32 %v1806_v28, %v1781_v51  ;;  %v649_v6 = vpack.c.bf16 %v641_v2, %v640_v34  ;;  %v1868_v3 = vmul.f32 %v6316_v43, %v1859_v35 }
 0x238   :  { %v1843_v18 = vadd.f32 %v1835_v26, %v1810_v29  ;;  %v1844_v8 = vadd.f32 %v1836_v53, %v1811_v16  ;;  %v1869_v44 = vmul.f32 %v6316_v43, %v1858_v52  ;;  %v5307_v58 = vpop.permute.xlu0 %5306  ;;  %v5312_v31 = vpop.permute.xlu1 %5311  ;;  %v1863_v21 = vsel %vm192_vm2, %v1855_v19, %v1848_v15  ;;  %2147 = vmatpush.bf16.msrb.mxu2 %v5037_v12 }
 0x239   :  { %828 = vmatmul.bf16.gmra.mxu2 %v649_v6  ;;  %v5309_v1 = vunpack.i.h.bf16 %v5307_v58  ;;  %v5308_v60 = vunpack.i.l.bf16 %v5307_v58  ;;  %v5314_v28 = vunpack.i.h.bf16 %v5312_v31  ;;  %v5313_v57 = vunpack.i.l.bf16 %v5312_v31 }
 0x23a   :  { %v1876_v39 = vadd.f32 %v1868_v3, %v1843_v18  ;;  %v1877_v34 = vadd.f32 %v1869_v44, %v1844_v8  ;;  %v539_v2 = vrot.slane %v6424_v0, 2  ;;  %v1847_v22 = vadd.f32 %v1839_v4, %v1814_v25  ;;  %v5036_v8 = vld [vmem:[%s7567_s3 + $0x98] sm:$0xff]  ;;  %v5035_v44 = vld [vmem:[%s7567_s3 + $0x90] sm:$0xff] }
 0x23b   :  { %v540_v54 = vrot.slane %v6428_v37, 2  ;;  %v1220_v6 = vsel %vm382_vm3, %v6200_v62, %v5309_v1  ;;  %v1219_v58 = vsel %vm382_vm3, %v6140_v59, %v5308_v60  ;;  %v1872_v18 = vmul.f32 %v6316_v43, %v1863_v21 }
 0x23c   :  { %v1889_v9 = vadd.f32 %v6332_v55, %v1876_v39  ;;  %v1890_v41 = vadd.f32 %v6332_v55, %v1877_v34  ;;  %v1227_v51 = vsel %vm391_vm4, %v1219_v58, %v5313_v57  ;;  %v1228_v15 = vsel %vm391_vm4, %v1220_v6, %v5314_v28  ;;  %2148 = vmatpush.bf16.msrb.mxu2 %v5036_v8 }
 0x23d   :  { %v1235_v62 = vsel %vm400_vm5, %v1227_v51, %v5318_v13  ;;  %v1236_v59 = vsel %vm400_vm5, %v1228_v15, %v5319_v32  ;;  %v1779_v35 = vmul.f32 %v6230_v38, %v6549_v20  ;;  %v6683_v29 = vadd.f32 %v1872_v18, %v1847_v22 }
 0x23e   :  { %v6677_v4 = vmax.f32 %v1889_v9, 0.0  ;;  %v6679_v3 = vmax.f32 %v1890_v41, 0.0  ;;  %v1242_v52 = vpack.c.bf16 %v1236_v59, %v1235_v62  ;;  %v543_v16 = vsel %vm158_vm1, %v539_v2, %v540_v54 }
 0x23f   :  { %v544_v23 = vsel %vm158_vm1, %v538_v42, %v539_v2  ;;  %v7584_v22 = vrot.slane %v6549_v20, 2  ;;  %v7585_v41 = vrot.slane %v6549_v20, 3 }
 0x240   :  { %v1764_v32 = vpop.permute.xlu1 %1763  ;;  %1328 = vmatmul.bf16.gmra.mxu3 %v1242_v52  ;;  %v1937_v26 = vrot.slane %v6677_v4, 3  ;;  %v1938_v53 = vrot.slane %v6679_v3, 3  ;;  %v1921_v13 = vrot.slane %v6677_v4, 2  ;;  %v1922_v25 = vrot.slane %v6679_v3, 2  ;;  %v5322_v31 = vpop.permute.xlu0 %5321  ;;  %2149 = vmatpush.bf16.msrb.mxu2 %v5035_v44 }
 0x241   :  { %v1780_v12 = vmul.f32 %v6230_v38, %v1764_v32  ;;  %v1788_v1 = vrot.slane %v1764_v32, 1  ;;  %v1821_v42 = vrot.slane %v1764_v32, 2  ;;  %v1854_v60 = vrot.slane %v1764_v32, 3 }
 0x242   :  { %v5324_v28 = vunpack.i.h.bf16 %v5322_v31  ;;  %v5323_v57 = vunpack.i.l.bf16 %v5322_v31  ;;  %v1945_v21 = vsel %vm192_vm2, %v1937_v26, %v1938_v53  ;;  %v1946_v39 = vsel %vm192_vm2, %v1936_v27, %v1937_v26 }
 0x243   :  { %v1790_v38 = vsel %vm124_vm0, %v1788_v1, %v1789_v46  ;;  %v1791_v34 = vsel %vm124_vm0, %v1787_v50, %v1788_v1  ;;  %v1823_v2 = vsel %vm158_vm1, %v1821_v42, %v1822_v48  ;;  %v1824_v27 = vsel %vm158_vm1, %v7584_v22, %v1821_v42  ;;  %v5034_v50 = vld [vmem:[%s7567_s3 + $0x88] sm:$0xff] }
 0x244   :  { %v1804_v6 = vmul.f32 %v6252_v30, %v1791_v34  ;;  %v1805_v58 = vmul.f32 %v6252_v30, %v1790_v38  ;;  %v1837_v46 = vmul.f32 %v6259_v63, %v1824_v27  ;;  %v1838_v9 = vmul.f32 %v6259_v63, %v1823_v2  ;;  %2150 = vmatpush.bf16.msrb.mxu2 %v5034_v50 }
 0x245   :  { %v1856_v48 = vsel %vm192_vm2, %v1854_v60, %v1855_v19  ;;  %v1857_v51 = vsel %vm192_vm2, %v7585_v41, %v1854_v60  ;;  %v5385_v30 = vpack.i.bf16 %v1945_v21, %v1946_v39  ;;  %v1929_v63 = vsel %vm158_vm1, %v1921_v13, %v1922_v25 }
 0x246   :  { %v1812_v15 = vadd.f32 %v1804_v6, %v1779_v35  ;;  %v1813_v8 = vadd.f32 %v1805_v58, %v1780_v12  ;;  %v1870_v18 = vmul.f32 %v6316_v43, %v1857_v51  ;;  %v1871_v61 = vmul.f32 %v6316_v43, %v1856_v48  ;;  %v5033_v43 = vld [vmem:[%s7567_s3 + $0x80] sm:$0xff]  ;;  %v5337_v12 = vpop.permute.xlu2 %5336 }
 0x247   :  { %5386 = vrot.lane.b32.xlu0 %v5385_v30, %s5586_s25  ;;  %v7586_v19 = vrot.slane %v6355_v56, 2  ;;  %v1905_v62 = vrot.slane %v6677_v4, 1  ;;  %v1906_v59 = vrot.slane %v6679_v3, 1  ;;  %v642_v52 = vsel %vm391_vm4, %v544_v23, %v5323_v57 }
 0x248   :  { %v1845_v32 = vadd.f32 %v1837_v46, %v1812_v15  ;;  %v1846_v35 = vadd.f32 %v1838_v9, %v1813_v8  ;;  %v643_v44 = vsel %vm391_vm4, %v543_v16, %v5324_v28  ;;  %v5332_v31 = vpop.permute.xlu1 %5331  ;;  %v7587_v1 = vrot.slane %v6355_v56, 1  ;;  %v5327_v60 = vpop.permute.xlu0 %5326  ;;  %2151 = vmatpush.bf16.msrb.mxu2 %v5033_v43 }
 0x249   :  { %v1930_v20 = vsel %vm158_vm1, %v7586_v19, %v1921_v13  ;;  %v1913_v13 = vsel %vm124_vm0, %v1905_v62, %v1906_v59  ;;  %v651_v42 = vpack.c.bf16 %v643_v44, %v642_v52  ;;  %v5334_v57 = vunpack.i.h.bf16 %v5332_v31 }
 0x24a   :  { %v5380_v26 = vpack.i.bf16 %v1929_v63, %v1930_v20  ;;  %v1914_v23 = vsel %vm124_vm0, %v7587_v1, %v1905_v62  ;;  %v1878_v21 = vadd.f32 %v1870_v18, %v1845_v32  ;;  %v1879_v16 = vadd.f32 %v1871_v61, %v1846_v35 }
 0x24b   :  { %v5375_v28 = vpack.i.bf16 %v1913_v13, %v1914_v23  ;;  %v5329_v39 = vunpack.i.h.bf16 %v5327_v60  ;;  %833 = vmatmul.bf16.gmra.mxu2 %v651_v42  ;;  %v5328_v38 = vunpack.i.l.bf16 %v5327_v60  ;;  %v5333_v34 = vunpack.i.l.bf16 %v5332_v31 }
 0x24c   :  { %5381 = vrot.lane.b32.xlu2 %v5380_v26, %s5587_s26  ;;  %v5339_v2 = vunpack.i.h.bf16 %v5337_v12  ;;  %v1891_v22 = vadd.f32 %v6332_v55, %v1878_v21  ;;  %v1892_v27 = vadd.f32 %v6332_v55, %v1879_v16  ;;  %v1893_v58 = vadd.f32 %v6332_v55, %v6683_v29 }
 0x24d   :  { %5376 = vrot.lane.b32.xlu1 %v5375_v28, %s5584_s23  ;;  %v1222_v6 = vsel %vm382_vm3, %v6302_v10, %v5329_v39  ;;  %v5338_v46 = vunpack.i.l.bf16 %v5337_v12  ;;  %v1221_v9 = vsel %vm382_vm3, %v6202_v33, %v5328_v38  ;;  %v541_v63 = vrot.slane %v6456_v49, 2 }
 0x24e   :  { %v1230_v50 = vsel %vm391_vm4, %v1222_v6, %v5334_v57  ;;  %v6775_v48 = vmax.f32 %v1891_v22, 0.0  ;;  %v6777_v41 = vmax.f32 %v1892_v27, 0.0  ;;  %v1229_v51 = vsel %vm391_vm4, %v1221_v9, %v5333_v34  ;;  %v5347_v13 = vpop.permute.xlu2 %5346 }
 0x24f   :  { %v1238_v30 = vsel %vm400_vm5, %v1230_v50, %v5339_v2  ;;  %v1237_v10 = vsel %vm400_vm5, %v1229_v51, %v5338_v46  ;;  %v6786_v18 = vmax.f32 %v1893_v58, 0.0  ;;  %v542_v31 = vsel %vm158_vm1, %v540_v54, %v541_v63 }
 0x250   :  { %v5342_v15 = vpop.permute.xlu1 %5341  ;;  %v1243_v55 = vpack.c.bf16 %v1238_v30, %v1237_v10  ;;  %v1939_v29 = vrot.slane %v6775_v48, 3  ;;  %v1940_v33 = vrot.slane %v6777_v41, 3  ;;  %v1923_v8 = vrot.slane %v6775_v48, 2  ;;  %v5352_v61 = vpop.permute.xlu0 %5351 }
 0x251   :  { %v1924_v19 = vrot.slane %v6777_v41, 2  ;;  %v1907_v20 = vrot.slane %v6775_v48, 1  ;;  %v5354_v62 = vunpack.i.h.bf16 %v5352_v61  ;;  %v5353_v52 = vunpack.i.l.bf16 %v5352_v61 }
 0x252   :  { %1333 = vmatmul.bf16.gmra.mxu3 %v1243_v55  ;;  %v1943_v32 = vsel %vm192_vm2, %v1939_v29, %v1940_v33  ;;  %v1944_v35 = vsel %vm192_vm2, %v1938_v53, %v1939_v29  ;;  %v7588_v43 = vrot.slane %v6375_v40, 2  ;;  %v1928_v53 = vsel %vm158_vm1, %v1922_v25, %v1923_v8 }
 0x253   :  { %v5400_v26 = vpack.i.bf16 %v1943_v32, %v1944_v35  ;;  %v1927_v44 = vsel %vm158_vm1, %v1923_v8, %v1924_v19  ;;  %v1908_v1 = vrot.slane %v6777_v41, 1  ;;  %v1912_v23 = vsel %vm124_vm0, %v1906_v59, %v1907_v20 }
 0x254   :  { %v549_v12 = vsel %vm158_vm1, %v541_v63, %v7588_v43  ;;  %v644_v42 = vsel %vm391_vm4, %v542_v31, %v5353_v52  ;;  %v5344_v60 = vunpack.i.h.bf16 %v5342_v15  ;;  %v5343_v54 = vunpack.i.l.bf16 %v5342_v15 }
 0x255   :  { %5401 = vrot.lane.b32.xlu0 %v5400_v26, %s5586_s25  ;;  %v5395_v57 = vpack.i.bf16 %v1927_v44, %v1928_v53  ;;  %v645_v21 = vsel %vm391_vm4, %v549_v12, %v5354_v62  ;;  %v1911_v16 = vsel %vm124_vm0, %v1907_v20, %v1908_v1  ;;  %v1941_v28 = vrot.slane %v6786_v18, 3 }
 0x256   :  { %v5390_v25 = vpack.i.bf16 %v1911_v16, %v1912_v23  ;;  %v653_v39 = vpack.c.bf16 %v645_v21, %v644_v42  ;;  %v1925_v59 = vrot.slane %v6786_v18, 2  ;;  %v1909_v34 = vrot.slane %v6786_v18, 1  ;;  %v5367_v52 = vpop.permute.xlu2 %5366 }
 0x257   :  { %5396 = vrot.lane.b32.xlu2 %v5395_v57, %s5587_s26  ;;  %v1942_v38 = vsel %vm192_vm2, %v1940_v33, %v1941_v28  ;;  %v5349_v2 = vunpack.i.h.bf16 %v5347_v13  ;;  %v5348_v22 = vunpack.i.l.bf16 %v5347_v13  ;;  %v1224_v27 = vsel %vm382_vm3, %v6244_v47, %v5344_v60 }
 0x258   :  { %v1223_v6 = vsel %vm382_vm3, %v6235_v24, %v5343_v54  ;;  %5391 = vrot.lane.b32.xlu1 %v5390_v25, %s5584_s23  ;;  %v5357_v58 = vpop.permute.xlu0 %5356  ;;  %v5362_v46 = vpop.permute.xlu1 %5361  ;;  %v7589_v51 = vrot.slane %v6345_v45, 3  ;;  %v1926_v10 = vsel %vm158_vm1, %v1924_v19, %v1925_v59  ;;  %v7590_v47 = vrot.slane %v6345_v45, 2 }
 0x259   :  { %v5359_v9 = vunpack.i.h.bf16 %v5357_v58  ;;  %v5358_v50 = vunpack.i.l.bf16 %v5357_v58  ;;  %v1910_v15 = vsel %vm124_vm0, %v1908_v1, %v1909_v34  ;;  %v5364_v55 = vunpack.i.h.bf16 %v5362_v46 }
 0x25a   :  { %v1949_v30 = vsel %vm192_vm2, %v1941_v28, %v7589_v51  ;;  %v1933_v24 = vsel %vm158_vm1, %v1925_v59, %v7590_v47  ;;  %v5363_v29 = vunpack.i.l.bf16 %v5362_v46  ;;  %v1231_v33 = vsel %vm391_vm4, %v1223_v6, %v5348_v22  ;;  %v4999_v59 = vld [vmem:[%s7569_s5 + $0x30] sm:$0xff]  ;;  %v4993_v6 = vld [vmem:[%s7569_s5] sm:$0xff] }
 0x25b   :  { %838 = vmatmul.bf16.gmra.mxu2 %v653_v39  ;;  %v5415_v63 = vpack.i.bf16 %v1949_v30, %v1942_v38  ;;  %v1232_v8 = vsel %vm391_vm4, %v1224_v27, %v5349_v2  ;;  %v5410_v61 = vpack.i.bf16 %v1933_v24, %v1926_v10  ;;  %v1239_v19 = vsel %vm400_vm5, %v1231_v33, %v5358_v50  ;;  %v5000_v39 = vld [vmem:[%s7569_s5 + $0x38] sm:$0xff]  ;;  %v4998_v38 = vld [vmem:[%s7569_s5 + $0x28] sm:$0xff]  ;;  %v4995_v22 = vld [vmem:[%s7569_s5 + $0x10] sm:$0xff] }
 0x25c   :  { %v1240_v20 = vsel %vm400_vm5, %v1232_v8, %v5359_v9  ;;  %v520_v62 = vrot.slane %v6377_v7, 1  ;;  %v7591_v32 = vrot.slane %v6345_v45, 1  ;;  %v2047_v44 = vsel %vm382_vm3, %v6347_v14, %v5364_v55  ;;  %786 = vmatpush.bf16.msra.mxu1 %v5000_v39  ;;  %v4996_v2 = vld [vmem:[%s7569_s5 + $0x18] sm:$0xff]  ;;  %v4994_v27 = vld [vmem:[%s7569_s5 + $0x8] sm:$0xff] }
 0x25d   :  { %5416 = vrot.lane.b32.xlu0 %v5415_v63, %s5586_s25  ;;  %v2046_v31 = vsel %vm382_vm3, %v6345_v45, %v5363_v29  ;;  %v1244_v43 = vpack.c.bf16 %v1240_v20, %v1239_v19  ;;  %v519_v12 = vrot.slane %v6373_v36, 1  ;;  %v5369_v13 = vunpack.i.h.bf16 %v5367_v52  ;;  %v6905_v63 = vld [vmem:[%s7568_s4 + $0x1] ss:$0 sm:$0xff] }
 0x25e   :  { %v1917_v35 = vsel %vm124_vm0, %v1909_v34, %v7591_v32  ;;  %v5368_v53 = vunpack.i.l.bf16 %v5367_v52  ;;  %v518_v23 = vrot.slane %v6375_v40, 1  ;;  %v4997_v34 = vld [vmem:[%s7569_s5 + $0x20] sm:$0xff] }
 0x25f   :  { %5411 = vrot.lane.b32.xlu2 %v5410_v61, %s5587_s26  ;;  %v5405_v26 = vpack.i.bf16 %v1917_v35, %v1910_v15  ;;  %v531_v14 = vsel %vm124_vm0, %v519_v12, %v520_v62  ;;  %v2055_v54 = vsel %vm391_vm4, %v2047_v44, %v5369_v13 }
 0x260   :  { %v5372_v1 = vpop.permute.xlu0 %5371  ;;  %v2054_v45 = vsel %vm391_vm4, %v2046_v31, %v5368_v53  ;;  %v532_v57 = vsel %vm124_vm0, %v518_v23, %v519_v12  ;;  %787 = vmatpush.bf16.msra.mxu1 %v4999_v59 }
 0x261   :  { %5406 = vrot.lane.b32.xlu1 %v5405_v26, %s5584_s23  ;;  %v5374_v42 = vunpack.i.h.bf16 %v5372_v1  ;;  %v5373_v60 = vunpack.i.l.bf16 %v5372_v1  ;;  %v5425_v28 = vpack.i.bf16 %v531_v14, %v532_v57 }
 0x262   :  { %1338 = vmatmul.bf16.gmra.mxu3 %v1244_v43 }
 0x263   :  { %v2062_v21 = vsel %vm400_vm5, %v2054_v45, %v5373_v60  ;;  %v2063_v16 = vsel %vm400_vm5, %v2055_v54, %v5374_v42 }
 0x264   :  { %v2070_v25 = vpack.c.bf16 %v2063_v16, %v2062_v21  ;;  %788 = vmatpush.bf16.msra.mxu1 %v4998_v38 }
 0x267   :  { %5426 = vrot.lane.b32.xlu2 %v5425_v28, %s5587_s26 }
 0x268   :  { %789 = vmatpush.bf16.msra.mxu1 %v4997_v34 }
 0x26b   :  { %2152 = vmatmul.bf16.vlgmr.msrb.gmra.mxu2 %v2070_v25 }
 0x26c   :  { %790 = vmatpush.bf16.msra.mxu1 %v4996_v2 }
 0x270   :  { %791 = vmatpush.bf16.msra.mxu1 %v4995_v22  ;;  %v522_v22 = vrot.slane %v6398_v17, 1 }
 0x274   :  { %792 = vmatpush.bf16.msra.mxu1 %v4994_v27 }
 0x278   :  { %793 = vmatpush.bf16.msra.mxu1 %v4993_v6 }
 0x2a6   :  { %v5382_v58 = vpop.permute.xlu2 %5381 }
 0x2a7   :  { %v5384_v61 = vunpack.i.h.bf16 %v5382_v58  ;;  %v5383_v19 = vunpack.i.l.bf16 %v5382_v58 }
 0x2a9   :  { %v6896_v46 = vpop.f32.mrf.mxu2 }
 0x2b1   :  { %v5397_v9 = vpop.permute.xlu2 %5396  ;;  %v6898_v50 = vpop.f32.mrf.mxu2 }
 0x2b2   :  { %v1324_v51 = vpop.f32.mrf.mxu3  ;;  %v5399_v58 = vunpack.i.h.bf16 %v5397_v9 }
 0x2b3   :  { %v1325_v29 = vadd.f32 %v6905_v63, %v1324_v51  ;;  %v5398_v51 = vunpack.i.l.bf16 %v5397_v9 }
 0x2b5   :  { %v6919_v53 = vmax.f32 %v1325_v29, 0.0 }
 0x2b7   :  { %v1352_v28 = vrot.slane %v6919_v53, 1 }
 0x2b9   :  { %v6900_v30 = vpop.permute.xlu2 %5411  ;;  %v5387_v24 = vpop.permute.xlu0 %5386 }
 0x2ba   :  { %v1326_v10 = vpop.f32.mrf.mxu3  ;;  %v5389_v20 = vunpack.i.h.bf16 %v5387_v24  ;;  %v5388_v52 = vunpack.i.l.bf16 %v5387_v24 }
 0x2bb   :  { %v1327_v15 = vadd.f32 %v6905_v63, %v1326_v10  ;;  %v521_v10 = vrot.slane %v6395_v5, 1 }
 0x2bc   :  { %v6907_v47 = vpop.f32.mrf.mxu2 }
 0x2bd   :  { %v6915_v26 = vmax.f32 %v1327_v15, 0.0 }
 0x2bf   :  { %v5377_v55 = vpop.permute.xlu1 %5376  ;;  %v1353_v16 = vrot.slane %v6915_v26, 1 }
 0x2c0   :  { %v5379_v33 = vunpack.i.h.bf16 %v5377_v55  ;;  %v5378_v8 = vunpack.i.l.bf16 %v5377_v55 }
 0x2c1   :  { %v5427_v44 = vpop.permute.xlu2 %5426 }
 0x2c2   :  { %v2049_v32 = vsel %vm382_vm3, %v6677_v4, %v5379_v33  ;;  %v2048_v35 = vsel %vm382_vm3, %v6355_v56, %v5378_v8  ;;  %v5429_v12 = vunpack.i.h.bf16 %v5427_v44  ;;  %v5428_v13 = vunpack.i.l.bf16 %v5427_v44 }
 0x2c3   :  { %v2056_v31 = vsel %vm391_vm4, %v2048_v35, %v5383_v19  ;;  %v2057_v43 = vsel %vm391_vm4, %v2049_v32, %v5384_v61  ;;  %v1329_v60 = vpop.f32.mrf.mxu3 }
 0x2c4   :  { %v2064_v1 = vsel %vm400_vm5, %v2056_v31, %v5388_v52  ;;  %v2065_v42 = vsel %vm400_vm5, %v2057_v43, %v5389_v20  ;;  %v831_v14 = vpop.f32.mrf.mxu2  ;;  %v1330_v56 = vadd.f32 %v6905_v63, %v1329_v60  ;;  %v630_v45 = vsel %vm391_vm4, %v6375_v40, %v5428_v13  ;;  %v5024_v40 = vld [vmem:[%s7569_s5 + $0xb8] sm:$0xff] }
 0x2c5   :  { %v2071_v4 = vpack.c.bf16 %v2065_v42, %v2064_v1  ;;  %v631_v54 = vsel %vm391_vm4, %v6373_v36, %v5429_v12  ;;  %v1366_v36 = vsel %vm124_vm0, %v1352_v28, %v1353_v16  ;;  %v529_v52 = vsel %vm124_vm0, %v521_v10, %v522_v22  ;;  %1622 = vmatpush.bf16.msrb.mxu0 %v5024_v40  ;;  %v5031_v40 = vld [vmem:[%s7569_s5 + $0xf0] sm:$0xff] }
 0x2c6   :  { %v646_v57 = vpack.c.bf16 %v631_v54, %v630_v45  ;;  %v6928_v21 = vmax.f32 %v1330_v56, 0.0  ;;  %v5414_v56 = vunpack.i.h.bf16 %v6900_v30  ;;  %v5413_v45 = vunpack.i.l.bf16 %v6900_v30 }
 0x2c7   :  { %2157 = vmatmul.bf16.gmra.mxu2 %v2071_v4  ;;  %v5402_v39 = vpop.permute.xlu0 %5401 }
 0x2c8   :  { %794 = vmatmul.bf16.vlgmr.msra.gmra.mxu1 %v646_v57  ;;  %v1354_v25 = vrot.slane %v6928_v21, 1  ;;  %v5404_v24 = vunpack.i.h.bf16 %v5402_v39  ;;  %v5403_v15 = vunpack.i.l.bf16 %v5402_v39 }
 0x2ca   :  { %v1365_v59 = vsel %vm124_vm0, %v1353_v16, %v1354_v25  ;;  %v5392_v38 = vpop.permute.xlu1 %5391 }
 0x2cb   :  { %v1331_v34 = vpop.f32.mrf.mxu3  ;;  %v5420_v2 = vpack.i.bf16 %v1365_v59, %v1366_v36  ;;  %v5394_v27 = vunpack.i.h.bf16 %v5392_v38  ;;  %v5393_v6 = vunpack.i.l.bf16 %v5392_v38  ;;  %v524_v36 = vrot.slane %v6428_v37, 1 }
 0x2cc   :  { %v1332_v9 = vadd.f32 %v6905_v63, %v1331_v34 }
 0x2cd   :  { %5421 = vrot.lane.b32.xlu1 %v5420_v2, %s5587_s26  ;;  %v2051_v55 = vsel %vm382_vm3, %v6775_v48, %v5394_v27  ;;  %v2050_v29 = vsel %vm382_vm3, %v6679_v3, %v5393_v6  ;;  %v530_v3 = vsel %vm124_vm0, %v520_v62, %v521_v10  ;;  %v523_v27 = vrot.slane %v6424_v0, 1 }
 0x2ce   :  { %v6946_v33 = vpop.f32.mrf.mxu2  ;;  %v2058_v8 = vsel %vm391_vm4, %v2050_v29, %v5398_v51  ;;  %v2059_v61 = vsel %vm391_vm4, %v2051_v55, %v5399_v58  ;;  %v5435_v48 = vpack.i.bf16 %v529_v52, %v530_v3  ;;  %v6959_v35 = vmax.f32 %v1332_v9, 0.0 }
 0x2cf   :  { %v2066_v19 = vsel %vm400_vm5, %v2058_v8, %v5403_v15  ;;  %v2067_v20 = vsel %vm400_vm5, %v2059_v61, %v5404_v24  ;;  %v5417_v54 = vpop.permute.xlu0 %5416  ;;  %v527_v58 = vsel %vm124_vm0, %v523_v27, %v524_v36  ;;  %v528_v24 = vsel %vm124_vm0, %v522_v22, %v523_v27  ;;  %v5019_v27 = vld [vmem:[%s7569_s5 + $0x90] sm:$0xff] }
 0x2d0   :  { %v2072_v32 = vpack.c.bf16 %v2067_v20, %v2066_v19  ;;  %v1355_v60 = vrot.slane %v6959_v35, 1  ;;  %v5419_v34 = vunpack.i.h.bf16 %v5417_v54  ;;  %v5418_v2 = vunpack.i.l.bf16 %v5417_v54 }
 0x2d1   :  { %v5445_v55 = vpack.i.bf16 %v527_v58, %v528_v24 }
 0x2d2   :  { %v1364_v16 = vsel %vm124_vm0, %v1354_v25, %v1355_v60 }
 0x2d3   :  { %v5407_v44 = vpop.permute.xlu1 %5406 }
 0x2d4   :  { %v5409_v13 = vunpack.i.h.bf16 %v5407_v44  ;;  %v5408_v1 = vunpack.i.l.bf16 %v5407_v44 }
 0x2d5   :  { %v1334_v31 = vpop.f32.mrf.mxu3  ;;  %5436 = vrot.lane.b32.xlu1 %v5435_v48, %s5587_s26  ;;  %v525_v48 = vrot.slane %v6456_v49, 1 }
 0x2d6   :  { %v6962_v43 = vpop.f32.mrf.mxu2  ;;  %v1335_v12 = vadd.f32 %v6905_v63, %v1334_v31  ;;  %v2053_v4 = vsel %vm382_vm3, %v6786_v18, %v5409_v13  ;;  %v2052_v14 = vsel %vm382_vm3, %v6777_v41, %v5408_v1 }
 0x2d7   :  { %2162 = vmatmul.bf16.gmra.mxu2 %v2072_v32  ;;  %v2060_v18 = vsel %vm391_vm4, %v2052_v14, %v5413_v45  ;;  %v2061_v41 = vsel %vm391_vm4, %v2053_v4, %v5414_v56  ;;  %v533_v13 = vsel %vm124_vm0, %v525_v48, %v518_v23  ;;  %v1386_v4 = vrot.slane %v6928_v21, 3  ;;  %v5023_v14 = vld [vmem:[%s7569_s5 + $0xb0] sm:$0xff] }
 0x2d8   :  { %v6965_v42 = vmax.f32 %v1335_v12, 0.0  ;;  %v2068_v25 = vsel %vm400_vm5, %v2060_v18, %v5418_v2  ;;  %v2069_v6 = vsel %vm400_vm5, %v2061_v41, %v5419_v34  ;;  %v526_v12 = vsel %vm124_vm0, %v524_v36, %v525_v48  ;;  %1623 = vmatpush.bf16.msrb.mxu0 %v5023_v14  ;;  %v5020_v34 = vld [vmem:[%s7569_s5 + $0x98] sm:$0xff] }
 0x2d9   :  { %v2073_v10 = vpack.c.bf16 %v2069_v6, %v2068_v25  ;;  %v1385_v23 = vrot.slane %v6915_v26, 3 }
 0x2da   :  { %v1356_v62 = vrot.slane %v6965_v42, 1 }
 0x2db   :  { %v1397_v56 = vsel %vm192_vm2, %v1385_v23, %v1386_v4 }
 0x2dc   :  { %v1363_v57 = vsel %vm124_vm0, %v1355_v60, %v1356_v62 }
 0x2dd   :  { %v1336_v39 = vpop.f32.mrf.mxu3  ;;  %v5430_v59 = vpack.i.bf16 %v1363_v57, %v1364_v16  ;;  %v5022_v57 = vld [vmem:[%s7569_s5 + $0xa8] sm:$0xff]  ;;  %v1388_v16 = vrot.slane %v6965_v42, 3 }
 0x2de   :  { %v6980_v38 = vpop.f32.mrf.mxu2  ;;  %v1337_v30 = vadd.f32 %v6905_v63, %v1336_v39  ;;  %v1387_v39 = vrot.slane %v6959_v35, 3  ;;  %1624 = vmatpush.bf16.msrb.mxu0 %v5022_v57 }
 0x2df   :  { %5431 = vrot.lane.b32.xlu0 %v5430_v59, %s5587_s26  ;;  %v5021_v59 = vld [vmem:[%s7569_s5 + $0xa0] sm:$0xff] }
 0x2e0   :  { %v6991_v51 = vmax.f32 %v1337_v30, 0.0  ;;  %v1395_v36 = vsel %vm192_vm2, %v1387_v39, %v1388_v16  ;;  %v1396_v18 = vsel %vm192_vm2, %v1386_v4, %v1387_v39 }
 0x2e1   :  { %v5485_v41 = vpack.i.bf16 %v1395_v36, %v1396_v18 }
 0x2e2   :  { %v1357_v9 = vrot.slane %v6991_v51, 1  ;;  %1625 = vmatpush.bf16.msrb.mxu0 %v5021_v59  ;;  %v1389_v30 = vrot.slane %v6991_v51, 3 }
 0x2e4   :  { %v1362_v22 = vsel %vm124_vm0, %v1356_v62, %v1357_v9  ;;  %v5455_v62 = vpack.i.bf16 %v533_v13, %v526_v12  ;;  %v1394_v6 = vsel %vm192_vm2, %v1388_v16, %v1389_v30 }
 0x2e5   :  { %v1339_v15 = vpop.f32.mrf.mxu3 }
 0x2e6   :  { %v841_v29 = vpop.f32.mrf.mxu2  ;;  %v1340_v8 = vadd.f32 %v6905_v63, %v1339_v15  ;;  %1626 = vmatpush.bf16.msrb.mxu0 %v5020_v34 }
 0x2e7   :  { %2167 = vmatmul.bf16.gmra.mxu2 %v2073_v10  ;;  %5446 = vrot.lane.b32.xlu0 %v5445_v55, %s5587_s26  ;;  %v5018_v10 = vld [vmem:[%s7569_s5 + $0x88] sm:$0xff] }
 0x2e8   :  { %v6997_v61 = vmax.f32 %v1340_v8, 0.0  ;;  %v5017_v8 = vld [vmem:[%s7569_s5 + $0x80] sm:$0xff] }
 0x2ea   :  { %v1358_v19 = vrot.slane %v6997_v61, 1  ;;  %v1390_v2 = vrot.slane %v6997_v61, 3  ;;  %1627 = vmatpush.bf16.msrb.mxu0 %v5019_v27  ;;  %v5029_v27 = vld [vmem:[%s7569_s5 + $0xe0] sm:$0xff] }
 0x2ec   :  { %v1361_v20 = vsel %vm124_vm0, %v1357_v9, %v1358_v19  ;;  %v1393_v25 = vsel %vm192_vm2, %v1389_v30, %v1390_v2 }
 0x2ed   :  { %v1341_v52 = vpop.f32.mrf.mxu3  ;;  %v5440_v32 = vpack.i.bf16 %v1361_v20, %v1362_v22  ;;  %v5500_v58 = vpack.i.bf16 %v1393_v25, %v1394_v6 }
 0x2ee   :  { %v1342_v3 = vadd.f32 %v6905_v63, %v1341_v52  ;;  %1628 = vmatpush.bf16.msrb.mxu0 %v5018_v10  ;;  %v2153_v9 = vpop.f32.mrf.mxu2 }
 0x2ef   :  { %5441 = vrot.lane.b32.xlu2 %v5440_v32, %s5587_s26  ;;  %v7080_v32 = vld [vmem:[%s7568_s4 + $0x2] ss:$0 sm:$0xff] }
 0x2f0   :  { %v7008_v44 = vmax.f32 %v1342_v3, 0.0  ;;  %v2154_v13 = vadd.f32 %v7080_v32, %v2153_v9 }
 0x2f2   :  { %v1359_v31 = vrot.slane %v7008_v44, 1  ;;  %v1391_v24 = vrot.slane %v7008_v44, 3  ;;  %1629 = vmatpush.bf16.msrb.mxu0 %v5017_v8  ;;  %v7096_v14 = vmax.f32 %v2154_v13, 0.0 }
 0x2f4   :  { %v1360_v1 = vsel %vm124_vm0, %v1358_v19, %v1359_v31  ;;  %v1367_v63 = vsel %vm124_vm0, %v1359_v31, %v1352_v28  ;;  %v1384_v28 = vrot.slane %v6919_v53, 3  ;;  %v1392_v15 = vsel %vm192_vm2, %v1390_v2, %v1391_v24 }
 0x2f5   :  { %v5450_v60 = vpack.i.bf16 %v1367_v63, %v1360_v1  ;;  %v5032_v1 = vld [vmem:[%s7569_s5 + $0xf8] sm:$0xff]  ;;  %v2181_v59 = vrot.slane %v7096_v14, 1  ;;  %v2213_v36 = vrot.slane %v7096_v14, 3 }
 0x2f6   :  { %v1398_v45 = vsel %vm192_vm2, %v1384_v28, %v1385_v23  ;;  %v1399_v55 = vsel %vm192_vm2, %v1391_v24, %v1384_v28  ;;  %v2155_v52 = vpop.f32.mrf.mxu2  ;;  %1651 = vmatpush.bf16.msrb.mxu1 %v5032_v1 }
 0x2f7   :  { %5451 = vrot.lane.b32.xlu1 %v5450_v60, %s5587_s26  ;;  %5456 = vrot.lane.b32.xlu2 %v5455_v62, %s5587_s26  ;;  %v5470_v54 = vpack.i.bf16 %v1397_v56, %v1398_v45  ;;  %v5515_v29 = vpack.i.bf16 %v1399_v55, %v1392_v15  ;;  %v2156_v12 = vadd.f32 %v7080_v32, %v2155_v52  ;;  %v5027_v52 = vld [vmem:[%s7569_s5 + $0xd0] sm:$0xff] }
 0x2f9   :  { %v7091_v60 = vmax.f32 %v2156_v12, 0.0 }
 0x2fa   :  { %1652 = vmatpush.bf16.msrb.mxu1 %v5031_v40 }
 0x2fb   :  { %v2214_v57 = vrot.slane %v7091_v60, 3 }
 0x2fd   :  { %v2227_v34 = vsel %vm192_vm2, %v2213_v36, %v2214_v57 }
 0x2ff   :  { %5471 = vrot.lane.b32.xlu2 %v5470_v54, %s5587_s26  ;;  %v2182_v54 = vrot.slane %v7091_v60, 1 }
 0x301   :  { %v2195_v30 = vsel %vm124_vm0, %v2181_v59, %v2182_v54 }
 0x307   :  { %5486 = vrot.lane.b32.xlu2 %v5485_v41, %s5587_s26 }
 0x30f   :  { %5501 = vrot.lane.b32.xlu2 %v5500_v58, %s5587_s26 }
 0x317   :  { %5516 = vrot.lane.b32.xlu2 %v5515_v29, %s5587_s26 }
 0x33f   :  { %v5422_v19 = vpop.permute.xlu1 %5421 }
 0x340   :  { %v5424_v20 = vunpack.i.h.bf16 %v5422_v19  ;;  %v5423_v22 = vunpack.i.l.bf16 %v5422_v19  ;;  %v5028_v19 = vld [vmem:[%s7569_s5 + $0xd8] sm:$0xff] }
 0x342   :  { %v1464_v3 = vsel %vm391_vm4, %v6919_v53, %v5423_v22  ;;  %v1465_v48 = vsel %vm391_vm4, %v6915_v26, %v5424_v20 }
 0x343   :  { %v1480_v31 = vpack.c.bf16 %v1465_v48, %v1464_v3 }
 0x345   :  { %1630 = vmatmul.bf16.vlgmr.msrb.gmra.mxu0 %v1480_v31 }
 0x347   :  { %v5437_v63 = vpop.permute.xlu1 %5436 }
 0x348   :  { %v5439_v62 = vunpack.i.h.bf16 %v5437_v63  ;;  %v5438_v4 = vunpack.i.l.bf16 %v5437_v63 }
 0x349   :  { %v5442_v22 = vpop.permute.xlu2 %5441 }
 0x34a   :  { %v2158_v23 = vpop.f32.mrf.mxu2  ;;  %v632_v56 = vsel %vm391_vm4, %v6377_v7, %v5438_v4  ;;  %v633_v45 = vsel %vm391_vm4, %v6395_v5, %v5439_v62  ;;  %v5030_v7 = vld [vmem:[%s7569_s5 + $0xe8] sm:$0xff] }
 0x34b   :  { %v2159_v28 = vadd.f32 %v7080_v32, %v2158_v23  ;;  %v648_v39 = vpack.c.bf16 %v633_v45, %v632_v56  ;;  %1653 = vmatpush.bf16.msrb.mxu1 %v5030_v7  ;;  %v5026_v23 = vld [vmem:[%s7569_s5 + $0xc8] sm:$0xff]  ;;  %v5444_v56 = vunpack.i.h.bf16 %v5442_v22  ;;  %v5443_v45 = vunpack.i.l.bf16 %v5442_v22 }
 0x34d   :  { %v7105_v16 = vmax.f32 %v2159_v28, 0.0  ;;  %799 = vmatmul.bf16.gmra.mxu1 %v648_v39 }
 0x34f   :  { %v2183_v18 = vrot.slane %v7105_v16, 1  ;;  %v2215_v41 = vrot.slane %v7105_v16, 3  ;;  %1654 = vmatpush.bf16.msrb.mxu1 %v5029_v27  ;;  %v1468_v27 = vsel %vm391_vm4, %v6965_v42, %v5443_v45  ;;  %v5047_v45 = vld [vmem:[%s7569_s5 + $0x130] sm:$0xff] }
 0x351   :  { %v2226_v5 = vsel %vm192_vm2, %v2214_v57, %v2215_v41  ;;  %v2194_v2 = vsel %vm124_vm0, %v2182_v54, %v2183_v18  ;;  %v5432_v10 = vpop.permute.xlu0 %5431 }
 0x352   :  { %v2160_v25 = vpop.f32.mrf.mxu2  ;;  %v5465_v6 = vpack.i.bf16 %v2226_v5, %v2227_v34  ;;  %v5460_v58 = vpack.i.bf16 %v2194_v2, %v2195_v30  ;;  %v5434_v24 = vunpack.i.h.bf16 %v5432_v10  ;;  %v5433_v15 = vunpack.i.l.bf16 %v5432_v10  ;;  %v5025_v5 = vld [vmem:[%s7569_s5 + $0xc0] sm:$0xff] }
 0x353   :  { %v2161_v55 = vadd.f32 %v7080_v32, %v2160_v25  ;;  %1655 = vmatpush.bf16.msrb.mxu1 %v5028_v19  ;;  %v5457_v25 = vpop.permute.xlu2 %5456 }
 0x354   :  { %5466 = vrot.lane.b32.xlu1 %v5465_v6, %s5587_s26  ;;  %5461 = vrot.lane.b32.xlu0 %v5460_v58, %s5587_s26  ;;  %v1466_v29 = vsel %vm391_vm4, %v6928_v21, %v5433_v15  ;;  %v1467_v8 = vsel %vm391_vm4, %v6959_v35, %v5434_v24  ;;  %v5459_v58 = vunpack.i.h.bf16 %v5457_v25  ;;  %v5458_v10 = vunpack.i.l.bf16 %v5457_v25 }
 0x355   :  { %v1482_v9 = vpack.c.bf16 %v1467_v8, %v1466_v29  ;;  %v7139_v20 = vmax.f32 %v2161_v55, 0.0 }
 0x356   :  { %v636_v29 = vsel %vm391_vm4, %v6428_v37, %v5458_v10  ;;  %v637_v8 = vsel %vm391_vm4, %v6456_v49, %v5459_v58  ;;  %v5048_v37 = vld [vmem:[%s7569_s5 + $0x138] sm:$0xff] }
 0x357   :  { %1635 = vmatmul.bf16.gmra.mxu0 %v1482_v9  ;;  %v2184_v1 = vrot.slane %v7139_v20, 1  ;;  %v2216_v63 = vrot.slane %v7139_v20, 3  ;;  %1656 = vmatpush.bf16.msrb.mxu1 %v5027_v52  ;;  %v5056_v49 = vld [vmem:[%s7569_s5 + $0x178] sm:$0xff] }
 0x358   :  { %2451 = vmatpush.bf16.msrb.mxu3 %v5048_v37  ;;  %2480 = vmatpush.bf16.msra.mxu0 %v5056_v49 }
 0x359   :  { %v5447_v48 = vpop.permute.xlu0 %5446  ;;  %v2193_v7 = vsel %vm124_vm0, %v2183_v18, %v2184_v1 }
 0x35a   :  { %v2163_v3 = vpop.f32.mrf.mxu2  ;;  %v5449_v12 = vunpack.i.h.bf16 %v5447_v48  ;;  %v5448_v13 = vunpack.i.l.bf16 %v5447_v48 }
 0x35b   :  { %v2164_v31 = vadd.f32 %v7080_v32, %v2163_v3  ;;  %1657 = vmatpush.bf16.msrb.mxu1 %v5026_v23  ;;  %v652_v3 = vpack.c.bf16 %v637_v8, %v636_v29  ;;  %v5055_v8 = vld [vmem:[%s7569_s5 + $0x170] sm:$0xff] }
 0x35c   :  { %v634_v4 = vsel %vm391_vm4, %v6398_v17, %v5448_v13  ;;  %v635_v40 = vsel %vm391_vm4, %v6424_v0, %v5449_v12  ;;  %v2225_v17 = vsel %vm192_vm2, %v2215_v41, %v2216_v63  ;;  %v1469_v41 = vsel %vm391_vm4, %v6991_v51, %v5444_v56  ;;  %2452 = vmatpush.bf16.msrb.mxu3 %v5047_v45  ;;  %v5051_v45 = vld [vmem:[%s7569_s5 + $0x150] sm:$0xff] }
 0x35d   :  { %v7147_v62 = vmax.f32 %v2164_v31, 0.0  ;;  %v650_v28 = vpack.c.bf16 %v635_v40, %v634_v4  ;;  %v1484_v6 = vpack.c.bf16 %v1469_v41, %v1468_v27  ;;  %v1368_v41 = vrot.slane %v6919_v53, 2  ;;  %2481 = vmatpush.bf16.msra.mxu0 %v5055_v8  ;;  %v795_v53 = vpop.f32.mrf.mxu1 }
 0x35f   :  { %v2185_v54 = vrot.slane %v7147_v62, 1  ;;  %v2217_v57 = vrot.slane %v7147_v62, 3  ;;  %804 = vmatmul.bf16.gmra.mxu1 %v650_v28 }
 0x360   :  { %1658 = vmatpush.bf16.msrb.mxu1 %v5025_v5  ;;  %v1370_v5 = vrot.slane %v6928_v21, 2 }
 0x361   :  { %v2224_v39 = vsel %vm192_vm2, %v2216_v63, %v2217_v57  ;;  %v2192_v0 = vsel %vm124_vm0, %v2184_v1, %v2185_v54 }
 0x362   :  { %v2165_v34 = vpop.f32.mrf.mxu2  ;;  %v5480_v2 = vpack.i.bf16 %v2224_v39, %v2225_v17  ;;  %v5475_v30 = vpack.i.bf16 %v2192_v0, %v2193_v7  ;;  %v5472_v0 = vpop.permute.xlu2 %5471  ;;  %v1369_v7 = vrot.slane %v6915_v26, 2 }
 0x363   :  { %v2166_v18 = vadd.f32 %v7080_v32, %v2165_v34 }
 0x364   :  { %5481 = vrot.lane.b32.xlu1 %v5480_v2, %s5587_s26  ;;  %5476 = vrot.lane.b32.xlu0 %v5475_v30, %s5587_s26  ;;  %v5473_v2 = vunpack.i.l.bf16 %v5472_v0  ;;  %v1381_v10 = vsel %vm158_vm1, %v1369_v7, %v1370_v5 }
 0x365   :  { %v7176_v24 = vmax.f32 %v2166_v18, 0.0 }
 0x367   :  { %1640 = vmatmul.bf16.gmra.mxu0 %v1484_v6  ;;  %v2186_v19 = vrot.slane %v7176_v24, 1  ;;  %v2218_v22 = vrot.slane %v7176_v24, 3 }
 0x369   :  { %v5452_v9 = vpop.permute.xlu1 %5451  ;;  %v2223_v63 = vsel %vm192_vm2, %v2217_v57, %v2218_v22  ;;  %v2191_v40 = vsel %vm124_vm0, %v2185_v54, %v2186_v19 }
 0x36a   :  { %v2168_v15 = vpop.f32.mrf.mxu2  ;;  %v5454_v12 = vunpack.i.h.bf16 %v5452_v9  ;;  %v5453_v13 = vunpack.i.l.bf16 %v5452_v9  ;;  %v5045_v9 = vld [vmem:[%s7569_s5 + $0x120] sm:$0xff] }
 0x36b   :  { %v2169_v55 = vadd.f32 %v7080_v32, %v2168_v15  ;;  %v1382_v15 = vsel %vm158_vm1, %v1368_v41, %v1369_v7 }
 0x36c   :  { %v1470_v57 = vsel %vm391_vm4, %v6997_v61, %v5453_v13  ;;  %v1471_v17 = vsel %vm391_vm4, %v7008_v44, %v5454_v12 }
 0x36d   :  { %v7185_v52 = vmax.f32 %v2169_v55, 0.0  ;;  %v1486_v34 = vpack.c.bf16 %v1471_v17, %v1470_v57 }
 0x36f   :  { %v2187_v48 = vrot.slane %v7185_v52, 1  ;;  %v2219_v31 = vrot.slane %v7185_v52, 3  ;;  %809 = vmatmul.bf16.gmra.mxu1 %v652_v3  ;;  %v1372_v3 = vrot.slane %v6965_v42, 2  ;;  %v5053_v42 = vld [vmem:[%s7569_s5 + $0x160] sm:$0xff] }
 0x371   :  { %v2222_v1 = vsel %vm192_vm2, %v2218_v22, %v2219_v31  ;;  %v2190_v4 = vsel %vm124_vm0, %v2186_v19, %v2187_v48  ;;  %v5054_v19 = vld [vmem:[%s7569_s5 + $0x168] sm:$0xff]  ;;  %v5487_v22 = vpop.permute.xlu2 %5486 }
 0x372   :  { %v2170_v23 = vpop.f32.mrf.mxu2  ;;  %v5495_v28 = vpack.i.bf16 %v2222_v1, %v2223_v63  ;;  %v5490_v56 = vpack.i.bf16 %v2190_v4, %v2191_v40  ;;  %2482 = vmatpush.bf16.msra.mxu0 %v5054_v19  ;;  %v5488_v12 = vunpack.i.l.bf16 %v5487_v22  ;;  %v5052_v4 = vld [vmem:[%s7569_s5 + $0x158] sm:$0xff]  ;;  %v5043_v40 = vld [vmem:[%s7569_s5 + $0x110] sm:$0xff] }
 0x373   :  { %v2171_v39 = vadd.f32 %v7080_v32, %v2170_v23  ;;  %v5474_v32 = vunpack.i.h.bf16 %v5472_v0 }
 0x374   :  { %5496 = vrot.lane.b32.xlu1 %v5495_v28, %s5587_s26  ;;  %5491 = vrot.lane.b32.xlu0 %v5490_v56, %s5587_s26  ;;  %v1374_v28 = vrot.slane %v6997_v61, 2  ;;  %v1373_v56 = vrot.slane %v6991_v51, 2  ;;  %v5050_v51 = vld [vmem:[%s7569_s5 + $0x148] sm:$0xff] }
 0x375   :  { %v7213_v54 = vmax.f32 %v2171_v39, 0.0  ;;  %v1473_v55 = vsel %vm391_vm4, %v1381_v10, %v5474_v32  ;;  %v5042_v39 = vld [vmem:[%s7569_s5 + $0x108] sm:$0xff] }
 0x376   :  { %2483 = vmatpush.bf16.msra.mxu0 %v5053_v42  ;;  %v1377_v0 = vsel %vm158_vm1, %v1373_v56, %v1374_v28  ;;  %v1378_v61 = vsel %vm158_vm1, %v1372_v3, %v1373_v56 }
 0x377   :  { %v2188_v30 = vrot.slane %v7213_v54, 1  ;;  %v2220_v27 = vrot.slane %v7213_v54, 3  ;;  %1645 = vmatmul.bf16.gmra.mxu0 %v1486_v34 }
 0x379   :  { %v2221_v25 = vsel %vm192_vm2, %v2219_v31, %v2220_v27  ;;  %v2228_v26 = vsel %vm192_vm2, %v2220_v27, %v2213_v36  ;;  %v2189_v21 = vsel %vm124_vm0, %v2187_v48, %v2188_v30  ;;  %v2196_v18 = vsel %vm124_vm0, %v2188_v30, %v2181_v59  ;;  %v5046_v59 = vld [vmem:[%s7569_s5 + $0x128] sm:$0xff]  ;;  %v5502_v23 = vpop.permute.xlu2 %5501 }
 0x37a   :  { %v5510_v6 = vpack.i.bf16 %v2228_v26, %v2221_v25  ;;  %v5505_v58 = vpack.i.bf16 %v2196_v18, %v2189_v21  ;;  %v1472_v36 = vsel %vm391_vm4, %v1382_v15, %v5473_v2  ;;  %2453 = vmatpush.bf16.msrb.mxu3 %v5046_v59  ;;  %v1371_v48 = vrot.slane %v6959_v35, 2  ;;  %v5044_v35 = vld [vmem:[%s7569_s5 + $0x118] sm:$0xff]  ;;  %2484 = vmatpush.bf16.msra.mxu0 %v5052_v4  ;;  %v5041_v21 = vld [vmem:[%s7569_s5 + $0x100] sm:$0xff] }
 0x37b   :  { %v1481_v29 = vpack.c.bf16 %v1473_v55, %v1472_v36  ;;  %v5489_v31 = vunpack.i.h.bf16 %v5487_v22  ;;  %v5504_v57 = vunpack.i.h.bf16 %v5502_v23  ;;  %v5503_v17 = vunpack.i.l.bf16 %v5502_v23  ;;  %v5049_v18 = vld [vmem:[%s7569_s5 + $0x140] sm:$0xff]  ;;  %v797_v55 = vpop.f32.mrf.mxu1 }
 0x37c   :  { %5511 = vrot.lane.b32.xlu1 %v5510_v6, %s5587_s26  ;;  %5506 = vrot.lane.b32.xlu0 %v5505_v58, %s5587_s26  ;;  %v1379_v13 = vsel %vm158_vm1, %v1371_v48, %v1372_v3  ;;  %v1380_v37 = vsel %vm158_vm1, %v1370_v5, %v1371_v48  ;;  %v1375_v2 = vrot.slane %v7008_v44, 2  ;;  %v7312_v15 = vld [vmem:[%s7570_s6] ss:$0 sm:$0xff]  ;;  %v2199_v36 = vrot.slane %v7105_v16, 2 }
 0x37d   :  { %v1474_v49 = vsel %vm391_vm4, %v1380_v37, %v5488_v12  ;;  %v1475_v1 = vsel %vm391_vm4, %v1379_v13, %v5489_v31  ;;  %v1476_v7 = vsel %vm391_vm4, %v1378_v61, %v5503_v17  ;;  %v1477_v5 = vsel %vm391_vm4, %v1377_v0, %v5504_v57 }
 0x37e   :  { %2454 = vmatpush.bf16.msrb.mxu3 %v5045_v9  ;;  %v1483_v63 = vpack.c.bf16 %v1475_v1, %v1474_v49  ;;  %2485 = vmatpush.bf16.msra.mxu0 %v5051_v45  ;;  %v1485_v34 = vpack.c.bf16 %v1477_v5, %v1476_v7  ;;  %v1376_v25 = vsel %vm158_vm1, %v1374_v28, %v1375_v2  ;;  %v7333_v23 = vadd.s32 16, %v5678_v11 }
 0x37f   :  { %1659 = vmatmul.bf16.vlgmr.msrb.gmra.mxu1 %v1481_v29  ;;  %v1383_v26 = vsel %vm158_vm1, %v1375_v2, %v1368_v41  ;;  %v2198_v41 = vrot.slane %v7091_v60, 2  ;;  %v2197_v29 = vrot.slane %v7096_v14, 2  ;;  %v796_v48 = vadd.f32 %v7312_v15, %v795_v53 }
 0x380   :  { %vm857_vm6 = vcmp.lt.s32.totalorder %v7333_v23, 23  ;;  %v2201_v17 = vrot.slane %v7147_v62, 2 }
 0x381   :  { %v5517_v32 = vpop.permute.xlu2 %5516  ;;  %v2210_v31 = vsel %vm158_vm1, %v2198_v41, %v2199_v36  ;;  %v2211_v12 = vsel %vm158_vm1, %v2197_v29, %v2198_v41  ;;  %v825_v4 = vadd.f32 %v6896_v46, %v796_v48  ;;  %v2200_v46 = vrot.slane %v7139_v20, 2 }
 0x382   :  { %2455 = vmatpush.bf16.msrb.mxu3 %v5044_v35  ;;  %2486 = vmatpush.bf16.msra.mxu0 %v5050_v51  ;;  %v5519_v30 = vunpack.i.h.bf16 %v5517_v32  ;;  %v5518_v27 = vunpack.i.l.bf16 %v5517_v32 }
 0x383   :  { %v844_v45 = vmax.f32 %v825_v4, 0.0 }
 0x384   :  { %v1478_v44 = vsel %vm391_vm4, %v1376_v25, %v5518_v27  ;;  %v1479_v6 = vsel %vm391_vm4, %v1383_v26, %v5519_v30  ;;  %v2208_v27 = vsel %vm158_vm1, %v2200_v46, %v2201_v17  ;;  %v2209_v25 = vsel %vm158_vm1, %v2199_v36, %v2200_v46 }
 0x385   :  { %v1487_v58 = vpack.c.bf16 %v1479_v6, %v1478_v44  ;;  %v867_v57 = vsel %vm400_vm5, %v844_v45, -inf  ;;  %v798_v44 = vadd.f32 %v7312_v15, %v797_v55 }
 0x386   :  { %2456 = vmatpush.bf16.msrb.mxu3 %v5043_v40  ;;  %2487 = vmatpush.bf16.msra.mxu0 %v5049_v18 }
 0x387   :  { %v827_v36 = vadd.f32 %v6898_v50, %v798_v44 }
 0x38a   :  { %2457 = vmatpush.bf16.msrb.mxu3 %v5042_v39 }
 0x38e   :  { %2458 = vmatpush.bf16.msrb.mxu3 %v5041_v21 }
 0x38f   :  { %1664 = vmatmul.bf16.gmra.mxu1 %v1483_v63 }
 0x39f   :  { %1669 = vmatmul.bf16.gmra.mxu1 %v1485_v34 }
 0x3af   :  { %1674 = vmatmul.bf16.gmra.mxu1 %v1487_v58 }
 0x3c2   :  { %v7306_v10 = vpop.f32.mrf.mxu0 }
 0x3c6   :  { %v5467_v59 = vpop.permute.xlu1 %5466  ;;  %v5462_v8 = vpop.permute.xlu0 %5461 }
 0x3c7   :  { %v5469_v9 = vunpack.i.h.bf16 %v5467_v59  ;;  %v5468_v19 = vunpack.i.l.bf16 %v5467_v59  ;;  %v5464_v22 = vunpack.i.h.bf16 %v5462_v8  ;;  %v5463_v3 = vunpack.i.l.bf16 %v5462_v8 }
 0x3c8   :  { %v845_v8 = vmax.f32 %v827_v36, 0.0 }
 0x3c9   :  { %v2302_v13 = vsel %vm391_vm4, %v2210_v31, %v5469_v9  ;;  %v2301_v37 = vsel %vm391_vm4, %v2211_v12, %v5468_v19  ;;  %v2293_v49 = vsel %vm391_vm4, %v7096_v14, %v5463_v3  ;;  %v2294_v1 = vsel %vm391_vm4, %v7091_v60, %v5464_v22 }
 0x3ca   :  { %v2310_v63 = vpack.c.bf16 %v2302_v13, %v2301_v37  ;;  %v2309_v35 = vpack.c.bf16 %v2294_v1, %v2293_v49  ;;  %v7329_v42 = vpop.f32.mrf.mxu0  ;;  %v800_v40 = vpop.f32.mrf.mxu1  ;;  %v2203_v9 = vrot.slane %v7185_v52, 2  ;;  %v868_v55 = vsel %vm400_vm5, %v845_v8, -inf }
 0x3cb   :  { %v801_v28 = vadd.f32 %v7312_v15, %v800_v40  ;;  %v5588_v3 = vmov -inf  }
 0x3cc   :  { %2459 = vmatmul.bf16.vlgmr.msrb.gmra.mxu3 %v2309_v35  ;;  %2488 = vmatmul.bf16.vlgmr.msra.gmra.mxu0 %v2310_v63 }
 0x3cd   :  { %v830_v56 = vadd.f32 %v6907_v47, %v801_v28 }
 0x3cf   :  { %v846_v60 = vmax.f32 %v830_v56, 0.0 }
 0x3d1   :  { %v861_v39 = vsel %vm857_vm6, %v846_v60, 0.0 }
 0x3d2   :  { %v869_v0 = vsel %vm400_vm5, %v861_v39, -inf  ;;  %v802_v61 = vpop.f32.mrf.mxu1 }
 0x3d3   :  { %v870_v51 = vmax.f32 %v867_v57, %v869_v0 }
 0x3d4   :  { %v7344_v7 = vpop.f32.mrf.mxu0 }
 0x3d6   :  { %v5482_v47 = vpop.permute.xlu1 %5481  ;;  %v5477_v5 = vpop.permute.xlu0 %5476 }
 0x3d7   :  { %v5484_v34 = vunpack.i.h.bf16 %v5482_v47  ;;  %v5483_v32 = vunpack.i.l.bf16 %v5482_v47  ;;  %v5479_v2 = vunpack.i.h.bf16 %v5477_v5  ;;  %v5478_v30 = vunpack.i.l.bf16 %v5477_v5 }
 0x3d9   :  { %v2296_v26 = vsel %vm391_vm4, %v7139_v20, %v5479_v2  ;;  %v2303_v21 = vsel %vm391_vm4, %v2209_v25, %v5483_v32  ;;  %v2304_v18 = vsel %vm391_vm4, %v2208_v27, %v5484_v34  ;;  %v2295_v6 = vsel %vm391_vm4, %v7105_v16, %v5478_v30 }
 0x3da   :  { %v2312_v58 = vpack.c.bf16 %v2304_v18, %v2303_v21  ;;  %v2311_v53 = vpack.c.bf16 %v2296_v26, %v2295_v6  ;;  %v2202_v20 = vrot.slane %v7176_v24, 2  ;;  %v7364_v16 = vsel %vm400_vm5, 0.0, %v5588_v3 }
 0x3db   :  { %v872_v45 = vmax.f32 %v868_v55, %v7364_v16  ;;  %v2204_v30 = vrot.slane %v7213_v54, 2 }
 0x3dc   :  { %2493 = vmatmul.bf16.gmra.mxu0 %v2312_v58  ;;  %2464 = vmatmul.bf16.gmra.mxu3 %v2311_v53  ;;  %v805_v41 = vpop.f32.mrf.mxu1  ;;  %v1638_v59 = vpop.f32.mrf.mxu0  ;;  %v2206_v63 = vsel %vm158_vm1, %v2202_v20, %v2203_v9  ;;  %v2207_v35 = vsel %vm158_vm1, %v2201_v17, %v2202_v20 }
 0x3dd   :  { %v806_v1 = vadd.f32 %v7312_v15, %v805_v41  ;;  %v873_v46 = vmax.f32 %v870_v51, %v872_v45  ;;  %v2205_v41 = vsel %vm158_vm1, %v2203_v9, %v2204_v30  ;;  %v2212_v59 = vsel %vm158_vm1, %v2204_v30, %v2197_v29 }
 0x3df   :  { %v835_v17 = vadd.f32 %v6946_v33, %v806_v1  ;;  %v874_v47 = vrot.slane %v873_v46, 4 }
 0x3e1   :  { %v848_v32 = vmax.f32 %v835_v17, 0.0  ;;  %v875_v25 = vmax.f32 %v873_v46, %v874_v47 }
 0x3e3   :  { %v880_v18 = vsel %vm400_vm5, %v848_v32, -inf  ;;  %v876_v3 = vrot.slane %v875_v25, 2 }
 0x3e4   :  { %v807_v19 = vpop.f32.mrf.mxu1  ;;  %v7360_v22 = vpop.f32.mrf.mxu0 }
 0x3e5   :  { %v808_v12 = vadd.f32 %v7312_v15, %v807_v19  ;;  %v877_v14 = vmax.f32 %v875_v25, %v876_v3 }
 0x3e6   :  { %v5497_v48 = vpop.permute.xlu1 %5496  ;;  %v5492_v31 = vpop.permute.xlu0 %5491 }
 0x3e7   :  { %v5499_v13 = vunpack.i.h.bf16 %v5497_v48  ;;  %v5498_v50 = vunpack.i.l.bf16 %v5497_v48  ;;  %v5494_v37 = vunpack.i.h.bf16 %v5492_v31  ;;  %v5493_v49 = vunpack.i.l.bf16 %v5492_v31 }
 0x3e8   :  { %v837_v57 = vadd.f32 %v6962_v43, %v808_v12 }
 0x3e9   :  { %v2297_v4 = vsel %vm391_vm4, %v7147_v62, %v5493_v49  ;;  %v2298_v40 = vsel %vm391_vm4, %v7176_v24, %v5494_v37  ;;  %v2305_v28 = vsel %vm391_vm4, %v2207_v35, %v5498_v50  ;;  %v2306_v56 = vsel %vm391_vm4, %v2206_v63, %v5499_v13 }
 0x3ea   :  { %v2313_v60 = vpack.c.bf16 %v2298_v40, %v2297_v4  ;;  %v2314_v39 = vpack.c.bf16 %v2306_v56, %v2305_v28  ;;  %v849_v61 = vmax.f32 %v837_v57, 0.0  ;;  %v878_v50 = vrot.slane %v877_v14, 1 }
 0x3ec   :  { %2498 = vmatmul.bf16.gmra.mxu0 %v2314_v39  ;;  %2469 = vmatmul.bf16.gmra.mxu3 %v2313_v60  ;;  %v810_v0 = vpop.f32.mrf.mxu1  ;;  %v7381_v62 = vpop.f32.mrf.mxu0  ;;  %v881_v51 = vsel %vm400_vm5, %v849_v61, -inf  ;;  %v879_v1 = vmax.f32 %v877_v14, %v878_v50 }
 0x3ed   :  { %v811_v24 = vadd.f32 %v7312_v15, %v810_v0  ;;  %v885_v58 = vmax.f32 %v881_v51, %v7364_v16 }
 0x3ee   :  { %v5512_v5 = vpop.permute.xlu1 %5511  ;;  %v5507_v2 = vpop.permute.xlu0 %5506 }
 0x3ef   :  { %v840_v34 = vadd.f32 %v6980_v38, %v811_v24  ;;  %v5514_v27 = vunpack.i.h.bf16 %v5512_v5  ;;  %v5513_v33 = vunpack.i.l.bf16 %v5512_v5  ;;  %v5509_v26 = vunpack.i.h.bf16 %v5507_v2 }
 0x3f0   :  { %v5508_v21 = vunpack.i.l.bf16 %v5507_v2 }
 0x3f1   :  { %v850_v43 = vmax.f32 %v840_v34, 0.0  ;;  %v2307_v36 = vsel %vm391_vm4, %v2205_v41, %v5513_v33  ;;  %v2308_v8 = vsel %vm391_vm4, %v2212_v59, %v5514_v27  ;;  %v2300_v55 = vsel %vm391_vm4, %v7213_v54, %v5509_v26  ;;  %v5527_v54 = vld [vmem:[%s7570_s6 + $0x1] ss:$0 sm:$0xff] }
 0x3f2   :  { %v2299_v19 = vsel %vm391_vm4, %v7185_v52, %v5508_v21  ;;  %v2316_v31 = vpack.c.bf16 %v2308_v8, %v2307_v36  ;;  %v1632_v4 = vadd.f32 %v5527_v54, %v7306_v10  ;;  %v1637_v28 = vadd.f32 %v5527_v54, %v7344_v7 }
 0x3f3   :  { %v865_v15 = vsel %vm857_vm6, %v850_v43, 0.0  ;;  %v2315_v9 = vpack.c.bf16 %v2300_v55, %v2299_v19  ;;  %v1634_v61 = vadd.f32 %v5527_v54, %v7329_v42  ;;  %v1644_v32 = vadd.f32 %v5527_v54, %v7381_v62 }
 0x3f4   :  { %v882_v44 = vsel %vm400_vm5, %v865_v15, -inf  ;;  %v812_v38 = vpop.f32.mrf.mxu1  ;;  %v1646_v6 = vpop.f32.mrf.mxu0  ;;  %v1642_v30 = vadd.f32 %v5527_v54, %v7360_v22 }
 0x3f5   :  { %v883_v53 = vmax.f32 %v880_v18, %v882_v44  ;;  %v1647_v33 = vadd.f32 %v5527_v54, %v1646_v6 }
 0x3f7   :  { %v886_v20 = vmax.f32 %v883_v53, %v885_v58 }
 0x3f9   :  { %v887_v48 = vrot.slane %v886_v20, 4 }
 0x3fb   :  { %v888_v12 = vmax.f32 %v886_v20, %v887_v48 }
 0x3fc   :  { %2503 = vmatmul.bf16.gmra.mxu0 %v2316_v31  ;;  %2474 = vmatmul.bf16.gmra.mxu3 %v2315_v9  ;;  %v1648_v11 = vpop.f32.mrf.mxu0  ;;  %v1660_v29 = vpop.f32.mrf.mxu1 }
 0x3fd   :  { %v889_v13 = vrot.slane %v888_v12, 2  ;;  %v1661_v40 = vadd.f32 %v1660_v29, %v1632_v4 }
 0x3ff   :  { %v890_v37 = vmax.f32 %v888_v12, %v889_v13  ;;  %v1680_v60 = vmax.f32 %v1661_v40, 0.0 }
 0x401   :  { %v891_v49 = vrot.slane %v890_v37, 1  ;;  %v1696_v46 = vsel %vm400_vm5, %v1680_v60, -inf  ;;  %v5117_v60 = vld [vmem:[#allocation2 + $0x1dc] sm:$0xf0] }
 0x403   :  { %v892_v52 = vmax.f32 %v890_v37, %v891_v49 }
 0x404   :  { %v1662_v63 = vpop.f32.mrf.mxu1 }
 0x405   :  { %v7408_v35 = vsel %vm2553_vm7, %v892_v52, %v879_v1  ;;  %v1663_v47 = vadd.f32 %v1662_v63, %v1634_v61  ;;  %v5528_v52 = vld [vmem:[%s7570_s6 + $0x2] ss:$0 sm:$0xff] }
 0x407   :  { %v1681_v5 = vmax.f32 %v1663_v47, 0.0 }
 0x409   :  { %v1697_v7 = vsel %vm400_vm5, %v1681_v5, -inf }
 0x40a   :  { %v1701_v2 = vmax.f32 %v1697_v7, %v7364_v16 }
 0x40c   :  { %v1665_v56 = vpop.f32.mrf.mxu1 }
 0x40d   :  { %v1666_v45 = vadd.f32 %v1665_v56, %v1637_v28 }
 0x40f   :  { %v1682_v39 = vmax.f32 %v1666_v45, 0.0  ;;  %v4595_v45 = vld [vmem:[#allocation2 + $0x1c0] sm:$0xf] }
 0x411   :  { %v1690_v57 = vsel %vm857_vm6, %v1682_v39, 0.0  ;;  %v4596_v39 = vor.u32 %v5117_v60, %v4595_v45  ;;  %v5113_v45 = vld [vmem:[#allocation2 + $0x1c4] sm:$0xf] }
 0x412   :  { %v1698_v17 = vsel %vm400_vm5, %v1690_v57, -inf  ;;  %v4563_v57 = vld [vmem:[#allocation2 + $0x180] sm:$0xf]  ;;  %v4597_v60 = vld [vmem:[#allocation2 + $0x1e0] sm:$0xf0] }
 0x413   :  { %v1699_v0 = vmax.f32 %v1696_v46, %v1698_v17  ;;  %v5109_v46 = vld [vmem:[#allocation2 + $0x19c] sm:$0xf0]  ;;  %3458 = vmatpush.bf16.msra.mxu1 %v4596_v39 }
 0x414   :  { %v1667_v24 = vpop.f32.mrf.mxu1 }
 0x415   :  { %v1702_v51 = vmax.f32 %v1699_v0, %v1701_v2  ;;  %v4564_v0 = vor.u32 %v5109_v46, %v4563_v57  ;;  %v4600_v57 = vor.u32 %v5113_v45, %v4597_v60  ;;  %v4723_v60 = vld [vmem:[#allocation2 + $0x2c0] sm:$0xf] }
 0x417   :  { %v1703_v21 = vrot.slane %v1702_v51, 4  ;;  %3459 = vmatpush.bf16.msra.mxu1 %v4564_v0  ;;  %v5105_v0 = vld [vmem:[#allocation2 + $0x184] sm:$0xf] }
 0x419   :  { %v1704_v38 = vmax.f32 %v1702_v51, %v1703_v21 }
 0x41b   :  { %v1705_v36 = vrot.slane %v1704_v38, 2 }
 0x41c   :  { %v1670_v10 = vpop.f32.mrf.mxu1 }
 0x41d   :  { %v1671_v27 = vadd.f32 %v1670_v10, %v1642_v30  ;;  %v1706_v19 = vmax.f32 %v1704_v38, %v1705_v36 }
 0x41f   :  { %v1684_v15 = vmax.f32 %v1671_v27, 0.0  ;;  %v1707_v3 = vrot.slane %v1706_v19, 1 }
 0x421   :  { %v1709_v58 = vsel %vm400_vm5, %v1684_v15, -inf  ;;  %v1708_v9 = vmax.f32 %v1706_v19, %v1707_v3  ;;  %v5093_v15 = vld [vmem:[#allocation2 + $0x11c] sm:$0xf0] }
 0x422   :  { %v4435_v19 = vld [vmem:[#allocation2 + $0x80] sm:$0xf] }
 0x424   :  { %v1672_v34 = vpop.f32.mrf.mxu1 }
 0x425   :  { %v1673_v43 = vadd.f32 %v1672_v34, %v1644_v32 }
 0x427   :  { %v1685_v25 = vmax.f32 %v1673_v43, 0.0 }
 0x429   :  { %v1710_v44 = vsel %vm400_vm5, %v1685_v25, -inf  ;;  %v5101_v25 = vld [vmem:[#allocation2 + $0x15c] sm:$0xf0] }
 0x42a   :  { %v1714_v53 = vmax.f32 %v1710_v44, %v7364_v16 }
 0x42c   :  { %v1675_v26 = vpop.f32.mrf.mxu1 }
 0x42d   :  { %v1676_v42 = vadd.f32 %v1675_v26, %v1647_v33  ;;  %v4531_v33 = vld [vmem:[#allocation2 + $0x140] sm:$0xf] }
 0x42e   :  { %v4499_v26 = vld [vmem:[#allocation2 + $0x100] sm:$0xf] }
 0x42f   :  { %v1686_v18 = vmax.f32 %v1676_v42, 0.0  ;;  %v4532_v42 = vor.u32 %v5101_v25, %v4531_v33  ;;  %v4500_v38 = vor.u32 %v5093_v15, %v4499_v26  ;;  %v5081_v25 = vld [vmem:[#allocation2 + $0xc4] sm:$0xf] }
 0x430   :  { %v4469_v26 = vld [vmem:[#allocation2 + $0xe0] sm:$0xf0] }
 0x431   :  { %v1694_v62 = vsel %vm857_vm6, %v1686_v18, 0.0  ;;  %3460 = vmatpush.bf16.msra.mxu1 %v4532_v42  ;;  %v5073_v42 = vld [vmem:[#allocation2 + $0x84] sm:$0xf] }
 0x432   :  { %v1711_v22 = vsel %vm400_vm5, %v1694_v62, -inf  ;;  %v4437_v15 = vld [vmem:[#allocation2 + $0xa0] sm:$0xf0] }
 0x433   :  { %v1712_v41 = vmax.f32 %v1709_v58, %v1711_v22  ;;  %v4467_v58 = vld [vmem:[#allocation2 + $0xc0] sm:$0xf] }
 0x434   :  { %v1677_v6 = vpop.f32.mrf.mxu1  ;;  %v5085_v22 = vld [vmem:[#allocation2 + $0xdc] sm:$0xf0] }
 0x435   :  { %v1715_v59 = vmax.f32 %v1712_v41, %v1714_v53  ;;  %3461 = vmatpush.bf16.msra.mxu1 %v4500_v38  ;;  %v4405_v38 = vld [vmem:[#allocation2 + $0x60] sm:$0xf0] }
 0x437   :  { %v1716_v8 = vrot.slane %v1715_v59, 4 }
 0x439   :  { %v1717_v20 = vmax.f32 %v1715_v59, %v1716_v8  ;;  %v4468_v8 = vor.u32 %v5085_v22, %v4467_v58  ;;  %v5057_v58 = vld [vmem:[#allocation2 + $0x4] sm:$0xf] }
 0x43a   :  { %v4373_v22 = vld [vmem:[#allocation2 + $0x20] sm:$0xf0] }
 0x43b   :  { %v1718_v55 = vrot.slane %v1717_v20, 2  ;;  %3462 = vmatpush.bf16.msra.mxu1 %v4468_v8  ;;  %v5173_v8 = vld [vmem:[#allocation2 + $0x39c] sm:$0xf0] }
 0x43d   :  { %v1719_v48 = vmax.f32 %v1717_v20, %v1718_v55  ;;  %v5077_v55 = vld [vmem:[#allocation2 + $0x9c] sm:$0xf0] }
 0x43f   :  { %v1720_v31 = vrot.slane %v1719_v48, 1 }
 0x441   :  { %v1721_v12 = vmax.f32 %v1719_v48, %v1720_v31 }
 0x443   :  { %v2558_v14 = vsel %vm2553_vm7, %v1721_v12, %v1708_v9  ;;  %v4436_v12 = vor.u32 %v5077_v55, %v4435_v19  ;;  %v5197_v19 = vld [vmem:[#allocation2 + $0x45c] sm:$0xf0] }
 0x444   :  { %2559 = vrot.lane.b32.xlu1 %v2558_v14, %s5586_s25 }
 0x445   :  { %3463 = vmatpush.bf16.msra.mxu1 %v4436_v12  ;;  %v5165_v12 = vld [vmem:[#allocation2 + $0x35c] sm:$0xf0] }
 0x449   :  { %v2489_v11 = vpop.f32.mrf.mxu0 }
 0x44f   :  { %v2460_v29 = vpop.f32.mrf.mxu3 }
 0x450   :  { %v2461_v40 = vadd.f32 %v5528_v52, %v2460_v29  ;;  %v5069_v29 = vld [vmem:[#allocation2 + $0x5c] sm:$0xf0] }
 0x451   :  { %v2491_v13 = vpop.f32.mrf.mxu0 }
 0x452   :  { %v2490_v24 = vadd.f32 %v2489_v11, %v2461_v40  ;;  %v4403_v11 = vld [vmem:[#allocation2 + $0x40] sm:$0xf] }
 0x453   :  { %v5061_v40 = vld [vmem:[#allocation2 + $0x1c] sm:$0xf0] }
 0x454   :  { %v2509_v5 = vmax.f32 %v2490_v24, 0.0  ;;  %v4565_v24 = vld [vmem:[#allocation2 + $0x1a0] sm:$0xf0] }
 0x456   :  { %v2525_v30 = vsel %vm400_vm5, %v2509_v5, -inf  ;;  %v5097_v5 = vld [vmem:[#allocation2 + $0x144] sm:$0xf] }
 0x457   :  { %v2462_v50 = vpop.f32.mrf.mxu3 }
 0x458   :  { %v2463_v28 = vadd.f32 %v5528_v52, %v2462_v50 }
 0x459   :  { %v2494_v37 = vpop.f32.mrf.mxu0 }
 0x45a   :  { %v2492_v61 = vadd.f32 %v2491_v13, %v2463_v28 }
 0x45c   :  { %v2510_v7 = vmax.f32 %v2492_v61, 0.0 }
 0x45e   :  { %v2526_v43 = vsel %vm400_vm5, %v2510_v7, -inf  ;;  %v4533_v7 = vld [vmem:[#allocation2 + $0x160] sm:$0xf0] }
 0x45f   :  { %v2465_v49 = vpop.f32.mrf.mxu3  ;;  %v2530_v44 = vmax.f32 %v2526_v43, %v7364_v16 }
 0x460   :  { %v2466_v63 = vadd.f32 %v5528_v52, %v2465_v49 }
 0x461   :  { %v2496_v1 = vpop.f32.mrf.mxu0 }
 0x462   :  { %v2495_v56 = vadd.f32 %v2494_v37, %v2466_v63  ;;  %v4404_v63 = vor.u32 %v5069_v29, %v4403_v11  ;;  %v4827_v11 = vld [vmem:[#allocation2 + $0x388] sm:$0xf] }
 0x463   :  { %v5174_v29 = vld [vmem:[#allocation2 + $0x3a4] sm:$0xf0] }
 0x464   :  { %v2511_v47 = vmax.f32 %v2495_v56, 0.0  ;;  %3464 = vmatpush.bf16.msra.mxu1 %v4404_v63  ;;  %v4923_v63 = vld [vmem:[#allocation2 + $0x448] sm:$0xf] }
 0x466   :  { %v2519_v34 = vsel %vm857_vm6, %v2511_v47, 0.0 }
 0x467   :  { %v2467_v54 = vpop.f32.mrf.mxu3  ;;  %v2527_v32 = vsel %vm400_vm5, %v2519_v34, -inf }
 0x468   :  { %v2528_v21 = vmax.f32 %v2525_v30, %v2527_v32  ;;  %v4536_v32 = vor.u32 %v5097_v5, %v4533_v7  ;;  %v5189_v5 = vld [vmem:[#allocation2 + $0x41c] sm:$0xf0] }
 0x469   :  { %v2499_v4 = vpop.f32.mrf.mxu0  ;;  %v4691_v7 = vld [vmem:[#allocation2 + $0x280] sm:$0xf] }
 0x46a   :  { %v2531_v53 = vmax.f32 %v2528_v21, %v2530_v44  ;;  %v4472_v21 = vor.u32 %v5081_v25, %v4469_v26  ;;  %v5065_v44 = vld [vmem:[#allocation2 + $0x44] sm:$0xf] }
 0x46c   :  { %v2532_v3 = vrot.slane %v2531_v53, 4 }
 0x46e   :  { %v2533_v50 = vmax.f32 %v2531_v53, %v2532_v3  ;;  %v4376_v53 = vor.u32 %v5057_v58, %v4373_v22  ;;  %v5178_v58 = vld [vmem:[#allocation2 + $0x3cc] sm:$0xf] }
 0x46f   :  { %v2470_v17 = vpop.f32.mrf.mxu3  ;;  %v4861_v22 = vld [vmem:[#allocation2 + $0x3e8] sm:$0xf0] }
 0x470   :  { %v2471_v18 = vadd.f32 %v5528_v52, %v2470_v17  ;;  %v2534_v56 = vrot.slane %v2533_v50, 2 }
 0x471   :  { %v2501_v10 = vpop.f32.mrf.mxu0 }
 0x472   :  { %v2500_v41 = vadd.f32 %v2499_v4, %v2471_v18  ;;  %v4371_v4 = vld [vmem:[#allocation2] sm:$0xf]  ;;  %v2535_v46 = vmax.f32 %v2533_v50, %v2534_v56  ;;  %v4440_v18 = vor.u32 %v5073_v42, %v4437_v15  ;;  %v5158_v56 = vld [vmem:[#allocation2 + $0x324] sm:$0xf0] }
 0x473   :  { %v4372_v23 = vor.u32 %v5061_v40, %v4371_v4  ;;  %v5198_v4 = vld [vmem:[#allocation2 + $0x464] sm:$0xf0]  ;;  %v4627_v15 = vld [vmem:[#allocation2 + $0x200] sm:$0xf] }
 0x474   :  { %v2513_v31 = vmax.f32 %v2500_v41, 0.0  ;;  %v2536_v47 = vrot.slane %v2535_v46, 1  ;;  %v4851_v41 = vld [vmem:[#allocation2 + $0x3c0] sm:$0xf]  ;;  %v5134_v42 = vld [vmem:[#allocation2 + $0x264] sm:$0xf0] }
 0x475   :  { %3465 = vmatpush.bf16.msra.mxu1 %v4372_v23 }
 0x476   :  { %v2538_v37 = vsel %vm400_vm5, %v2513_v31, -inf  ;;  %v5182_v31 = vld [vmem:[#allocation2 + $0x3e4] sm:$0xf0] }
 0x477   :  { %v2472_v2 = vpop.f32.mrf.mxu3 }
 0x478   :  { %v2473_v27 = vadd.f32 %v5528_v52, %v2472_v2  ;;  %v2537_v2 = vmax.f32 %v2535_v46, %v2536_v47  ;;  %v5150_v47 = vld [vmem:[#allocation2 + $0x2e4] sm:$0xf0] }
 0x479   :  { %v2504_v51 = vpop.f32.mrf.mxu0  ;;  %3497 = vmatpush.bf16.msrb.mxu1 %v4600_v57  ;;  %v4924_v57 = vor.u32 %v5198_v4, %v4923_v63 }
 0x47a   :  { %v2502_v62 = vadd.f32 %v2501_v10, %v2473_v27  ;;  %v4501_v27 = vld [vmem:[#allocation2 + $0x120] sm:$0xf0] }
 0x47c   :  { %v2514_v20 = vmax.f32 %v2502_v62, 0.0  ;;  %v4408_v62 = vor.u32 %v5065_v44, %v4405_v38  ;;  %v5177_v44 = vld [vmem:[#allocation2 + $0x3c4] sm:$0xf] }
 0x47d   :  { %v4853_v38 = vld [vmem:[#allocation2 + $0x3e0] sm:$0xf0] }
 0x47e   :  { %v2539_v14 = vsel %vm400_vm5, %v2514_v20, -inf  ;;  %v4915_v20 = vld [vmem:[#allocation2 + $0x440] sm:$0xf] }
 0x47f   :  { %v2475_v6 = vpop.f32.mrf.mxu3  ;;  %v4916_v55 = vor.u32 %v5197_v19, %v4915_v20  ;;  %v4856_v20 = vor.u32 %v5177_v44, %v4853_v38  ;;  %v4611_v19 = vld [vmem:[#allocation2 + $0x1d0] sm:$0xf]  ;;  %v5122_v44 = vld [vmem:[#allocation2 + $0x20c] sm:$0xf] }
 0x480   :  { %v2476_v59 = vadd.f32 %v5528_v52, %v2475_v6  ;;  %v2543_v52 = vmax.f32 %v2539_v14, %v7364_v16  ;;  %v4568_v16 = vor.u32 %v5105_v0, %v4565_v24  ;;  %v5181_v6 = vld [vmem:[#allocation2 + $0x3dc] sm:$0xf0]  ;;  %v4891_v0 = vld [vmem:[#allocation2 + $0x408] sm:$0xf]  ;;  %v4637_v38 = vld [vmem:[#allocation2 + $0x228] sm:$0xf0] }
 0x481   :  { %v2506_v36 = vpop.f32.mrf.mxu0  ;;  %3490 = vmatpush.bf16.msra.mxu3 %v4916_v55  ;;  %v5190_v24 = vld [vmem:[#allocation2 + $0x424] sm:$0xf0]  ;;  %v5119_v55 = vld [vmem:[#allocation2 + $0x1ec] sm:$0xf0] }
 0x482   :  { %v2505_v48 = vadd.f32 %v2504_v51, %v2476_v59  ;;  %3498 = vmatpush.bf16.msrb.mxu1 %v4568_v16  ;;  %v5089_v51 = vld [vmem:[#allocation2 + $0x104] sm:$0xf]  ;;  %v4819_v59 = vld [vmem:[#allocation2 + $0x380] sm:$0xf]  ;;  %v4852_v36 = vor.u32 %v5181_v6, %v4851_v41 }
 0x483   :  { %v4504_v33 = vor.u32 %v5089_v51, %v4501_v27  ;;  %v4820_v3 = vor.u32 %v5173_v8, %v4819_v59  ;;  %v5142_v51 = vld [vmem:[#allocation2 + $0x2a4] sm:$0xf0]  ;;  %v4659_v27 = vld [vmem:[#allocation2 + $0x240] sm:$0xf]  ;;  %v4917_v41 = vld [vmem:[#allocation2 + $0x460] sm:$0xf0] }
 0x484   :  { %v2515_v9 = vmax.f32 %v2505_v48, 0.0  ;;  %3471 = vmatpush.bf16.msra.mxu2 %v4852_v36  ;;  %v4859_v48 = vld [vmem:[#allocation2 + $0x3c8] sm:$0xf] }
 0x485   :  { %v4860_v14 = vor.u32 %v5182_v31, %v4859_v48  ;;  %v4635_v59 = vld [vmem:[#allocation2 + $0x208] sm:$0xf]  ;;  %v5169_v48 = vld [vmem:[#allocation2 + $0x384] sm:$0xf] }
 0x486   :  { %v2523_v13 = vsel %vm857_vm6, %v2515_v9, 0.0  ;;  %3499 = vmatpush.bf16.msrb.mxu1 %v4536_v32  ;;  %v4787_v9 = vld [vmem:[#allocation2 + $0x340] sm:$0xf]  ;;  %v5126_v36 = vld [vmem:[#allocation2 + $0x224] sm:$0xf0] }
 0x487   :  { %v2540_v49 = vsel %vm400_vm5, %v2523_v13, -inf  ;;  %v2477_v1 = vpop.f32.mrf.mxu3  ;;  %3549 = vmatpush.bf16.msrb.mxu0 %v4860_v14  ;;  %v4828_v13 = vor.u32 %v5174_v29, %v4827_v11  ;;  %v4788_v50 = vor.u32 %v5165_v12, %v4787_v9  ;;  %v4821_v31 = vld [vmem:[#allocation2 + $0x3a0] sm:$0xf0]  ;;  %v5170_v9 = vld [vmem:[#allocation2 + $0x38c] sm:$0xf]  ;;  %v4636_v14 = vor.u32 %v5126_v36, %v4635_v59 }
 0x488   :  { %v2541_v54 = vmax.f32 %v2538_v37, %v2540_v49  ;;  %3472 = vmatpush.bf16.msra.mxu2 %v4820_v3  ;;  %v4795_v37 = vld [vmem:[#allocation2 + $0x348] sm:$0xf]  ;;  %v4755_v1 = vld [vmem:[#allocation2 + $0x300] sm:$0xf]  ;;  %v4864_v3 = vor.u32 %v5178_v58, %v4861_v22  ;;  %v4829_v12 = vld [vmem:[#allocation2 + $0x3a8] sm:$0xf0]  ;;  %v4612_v11 = vor.u32 %v5119_v55, %v4611_v19  ;;  %v4824_v29 = vor.u32 %v5169_v48, %v4821_v31 }
 0x489   :  { %v5166_v49 = vld [vmem:[#allocation2 + $0x364] sm:$0xf0]  ;;  %v5121_v58 = vld [vmem:[#allocation2 + $0x204] sm:$0xf]  ;;  %v4483_v59 = vld [vmem:[#allocation2 + $0xd0] sm:$0xf] }
 0x48a   :  { %v2544_v28 = vmax.f32 %v2541_v54, %v2543_v52  ;;  %3500 = vmatpush.bf16.msrb.mxu1 %v4504_v33  ;;  %v5157_v52 = vld [vmem:[#allocation2 + $0x31c] sm:$0xf0]  ;;  %v4796_v54 = vor.u32 %v5166_v49, %v4795_v37  ;;  %v4832_v37 = vor.u32 %v5170_v9, %v4829_v12  ;;  %v5161_v49 = vld [vmem:[#allocation2 + $0x344] sm:$0xf]  ;;  %v5087_v36 = vld [vmem:[#allocation2 + $0xec] sm:$0xf0] }
 0x48b   :  { %3550 = vmatpush.bf16.msrb.mxu0 %v4828_v13  ;;  %v4756_v40 = vor.u32 %v5157_v52, %v4755_v1  ;;  %v5133_v33 = vld [vmem:[#allocation2 + $0x25c] sm:$0xf0]  ;;  %v4579_v13 = vld [vmem:[#allocation2 + $0x190] sm:$0xf]  ;;  %v4789_v1 = vld [vmem:[#allocation2 + $0x360] sm:$0xf0] }
 0x48c   :  { %v2545_v39 = vrot.slane %v2544_v28, 4  ;;  %3473 = vmatpush.bf16.msra.mxu2 %v4788_v50  ;;  %v4660_v26 = vor.u32 %v5133_v33, %v4659_v27  ;;  %v5111_v50 = vld [vmem:[#allocation2 + $0x1ac] sm:$0xf0]  ;;  %v5162_v52 = vld [vmem:[#allocation2 + $0x34c] sm:$0xf]  ;;  %v4792_v4 = vor.u32 %v5161_v49, %v4789_v1 }
 0x48d   :  { %v4580_v63 = vor.u32 %v5111_v50, %v4579_v13  ;;  %v4629_v22 = vld [vmem:[#allocation2 + $0x220] sm:$0xf0]  ;;  %v4451_v19 = vld [vmem:[#allocation2 + $0x90] sm:$0xf]  ;;  %v4613_v13 = vld [vmem:[#allocation2 + $0x1f0] sm:$0xf0] }
 0x48e   :  { %v2546_v17 = vmax.f32 %v2544_v28, %v2545_v39  ;;  %3501 = vmatpush.bf16.msrb.mxu1 %v4472_v21  ;;  %v4763_v28 = vld [vmem:[#allocation2 + $0x308] sm:$0xf]  ;;  %v5149_v39 = vld [vmem:[#allocation2 + $0x2dc] sm:$0xf0]  ;;  %v5079_v55 = vld [vmem:[#allocation2 + $0xac] sm:$0xf0] }
 0x48f   :  { %3551 = vmatpush.bf16.msrb.mxu0 %v4796_v54  ;;  %v4724_v16 = vor.u32 %v5149_v39, %v4723_v60  ;;  %v4667_v21 = vld [vmem:[#allocation2 + $0x248] sm:$0xf]  ;;  %v4797_v54 = vld [vmem:[#allocation2 + $0x368] sm:$0xf0]  ;;  %v5153_v60 = vld [vmem:[#allocation2 + $0x304] sm:$0xf] }
 0x490   :  { %v2547_v61 = vrot.slane %v2546_v17, 2  ;;  %3474 = vmatpush.bf16.msra.mxu2 %v4756_v40  ;;  %v4547_v40 = vld [vmem:[#allocation2 + $0x150] sm:$0xf]  ;;  %v4757_v39 = vld [vmem:[#allocation2 + $0x320] sm:$0xf0] }
 0x491   :  { %v4419_v48 = vld [vmem:[#allocation2 + $0x50] sm:$0xf]  ;;  %v4603_v50 = vld [vmem:[#allocation2 + $0x1c8] sm:$0xf]  ;;  %v5114_v49 = vld [vmem:[#allocation2 + $0x1cc] sm:$0xf] }
 0x492   :  { %v2548_v10 = vmax.f32 %v2546_v17, %v2547_v61  ;;  %3502 = vmatpush.bf16.msrb.mxu1 %v4440_v18  ;;  %v4764_v17 = vor.u32 %v5158_v56, %v4763_v28  ;;  %v4731_v61 = vld [vmem:[#allocation2 + $0x2c8] sm:$0xf]  ;;  %v5125_v18 = vld [vmem:[#allocation2 + $0x21c] sm:$0xf0]  ;;  %v5103_v28 = vld [vmem:[#allocation2 + $0x16c] sm:$0xf0]  ;;  %v4800_v56 = vor.u32 %v5162_v52, %v4797_v54 }
 0x493   :  { %v4628_v6 = vor.u32 %v5125_v18, %v4627_v15  ;;  %v5071_v31 = vld [vmem:[#allocation2 + $0x6c] sm:$0xf0]  ;;  %v4605_v1 = vld [vmem:[#allocation2 + $0x1e8] sm:$0xf0]  ;;  %v5195_v52 = vld [vmem:[#allocation2 + $0x454] sm:$0xf] }
 0x494   :  { %v2549_v34 = vrot.slane %v2548_v10, 1  ;;  %3552 = vmatpush.bf16.msrb.mxu0 %v4764_v17  ;;  %3475 = vmatpush.bf16.msra.mxu2 %v4724_v16  ;;  %v4548_v17 = vor.u32 %v5103_v28, %v4547_v40  ;;  %v4420_v9 = vor.u32 %v5071_v31, %v4419_v48  ;;  %v4387_v12 = vld [vmem:[#allocation2 + $0x10] sm:$0xf]  ;;  %v4933_v54 = vld [vmem:[#allocation2 + $0x470] sm:$0xf0] }
 0x495   :  { %v4453_v48 = vld [vmem:[#allocation2 + $0xb0] sm:$0xf0] }
 0x496   :  { %v2550_v30 = vmax.f32 %v2548_v10, %v2549_v34  ;;  %3503 = vmatpush.bf16.msrb.mxu1 %v4408_v62  ;;  %v4883_v10 = vld [vmem:[#allocation2 + $0x400] sm:$0xf]  ;;  %v5193_v62 = vld [vmem:[#allocation2 + $0x444] sm:$0xf] }
 0x497   :  { %v5141_v34 = vld [vmem:[#allocation2 + $0x29c] sm:$0xf0]  ;;  %v4884_v32 = vor.u32 %v5189_v5, %v4883_v10  ;;  %v4920_v8 = vor.u32 %v5193_v62, %v4917_v41  ;;  %v4725_v10 = vld [vmem:[#allocation2 + $0x2e0] sm:$0xf0]  ;;  %v5146_v5 = vld [vmem:[#allocation2 + $0x2cc] sm:$0xf]  ;;  %v4640_v62 = vor.u32 %v5122_v44, %v4637_v38  ;;  %v4632_v41 = vor.u32 %v5121_v58, %v4629_v22 }
 0x498   :  { %v2564_v43 = vsel %vm2553_vm7, %v2550_v30, %v2537_v2  ;;  %v4732_v2 = vor.u32 %v5150_v47, %v4731_v61  ;;  %v4692_v30 = vor.u32 %v5141_v34, %v4691_v7  ;;  %v5095_v61 = vld [vmem:[#allocation2 + $0x12c] sm:$0xf0]  ;;  %v5145_v47 = vld [vmem:[#allocation2 + $0x2c4] sm:$0xf]  ;;  %v4733_v7 = vld [vmem:[#allocation2 + $0x2e8] sm:$0xf0] }
 0x499   :  { %2565 = vrot.lane.b32.xlu0 %v2564_v43, %s5587_s26  ;;  %3491 = vmatpush.bf16.msra.mxu3 %v4884_v32  ;;  %v4699_v43 = vld [vmem:[#allocation2 + $0x288] sm:$0xf]  ;;  %v4728_v32 = vor.u32 %v5145_v47, %v4725_v10  ;;  %v4901_v47 = vld [vmem:[#allocation2 + $0x430] sm:$0xf0]  ;;  %v4509_v44 = vld [vmem:[#allocation2 + $0x128] sm:$0xf0] }
 0x49a   :  { %3504 = vmatpush.bf16.msrb.mxu1 %v4376_v53  ;;  %3553 = vmatpush.bf16.msrb.mxu0 %v4732_v2  ;;  %v4700_v25 = vor.u32 %v5142_v51, %v4699_v43  ;;  %v4668_v53 = vor.u32 %v5134_v42, %v4667_v21  ;;  %v5137_v2 = vld [vmem:[#allocation2 + $0x284] sm:$0xf]  ;;  %v5138_v43 = vld [vmem:[#allocation2 + $0x28c] sm:$0xf]  ;;  %v5083_v58 = vld [vmem:[#allocation2 + $0xd4] sm:$0xf] }
 0x49b   :  { %3476 = vmatpush.bf16.msra.mxu2 %v4692_v30  ;;  %v4693_v30 = vld [vmem:[#allocation2 + $0x2a0] sm:$0xf0]  ;;  %v4701_v51 = vld [vmem:[#allocation2 + $0x2a8] sm:$0xf0]  ;;  %v4485_v22 = vld [vmem:[#allocation2 + $0xf0] sm:$0xf0] }
 0x49c   :  { %v4696_v27 = vor.u32 %v5137_v2, %v4693_v30  ;;  %v4704_v33 = vor.u32 %v5138_v43, %v4701_v51  ;;  %v5130_v21 = vld [vmem:[#allocation2 + $0x24c] sm:$0xf]  ;;  %v5102_v2 = vld [vmem:[#allocation2 + $0x164] sm:$0xf0] }
 0x49d   :  { %3529 = vmatpush.bf16.msrb.mxu3 %v4920_v8  ;;  %v4669_v42 = vld [vmem:[#allocation2 + $0x268] sm:$0xf0] }
 0x49e   :  { %3554 = vmatpush.bf16.msrb.mxu0 %v4700_v25  ;;  %v5129_v25 = vld [vmem:[#allocation2 + $0x244] sm:$0xf]  ;;  %v4672_v18 = vor.u32 %v5130_v21, %v4669_v42  ;;  %v5098_v43 = vld [vmem:[#allocation2 + $0x14c] sm:$0xf]  ;;  %v4507_v42 = vld [vmem:[#allocation2 + $0x108] sm:$0xf] }
 0x49f   :  { %3477 = vmatpush.bf16.msra.mxu2 %v4660_v26  ;;  %v4661_v26 = vld [vmem:[#allocation2 + $0x260] sm:$0xf0]  ;;  %v4541_v51 = vld [vmem:[#allocation2 + $0x168] sm:$0xf0] }
 0x4a0   :  { %v4664_v15 = vor.u32 %v5129_v25, %v4661_v26  ;;  %v5091_v25 = vld [vmem:[#allocation2 + $0x114] sm:$0xf]  ;;  %v4544_v21 = vor.u32 %v5098_v43, %v4541_v51  ;;  %v4867_v43 = vld [vmem:[#allocation2 + $0x3d0] sm:$0xf] }
 0x4a1   :  { %v4517_v26 = vld [vmem:[#allocation2 + $0x130] sm:$0xf0]  ;;  %v5183_v51 = vld [vmem:[#allocation2 + $0x3ec] sm:$0xf0] }
 0x4a2   :  { %3555 = vmatpush.bf16.msrb.mxu0 %v4668_v53  ;;  %v5185_v53 = vld [vmem:[#allocation2 + $0x404] sm:$0xf]  ;;  %v4520_v38 = vor.u32 %v5091_v25, %v4517_v26 }
 0x4a3   :  { %3478 = vmatpush.bf16.msra.mxu2 %v4628_v6  ;;  %v4885_v6 = vld [vmem:[#allocation2 + $0x420] sm:$0xf0] }
 0x4a4   :  { %v4888_v8 = vor.u32 %v5185_v53, %v4885_v6  ;;  %v5086_v6 = vld [vmem:[#allocation2 + $0xe4] sm:$0xf0] }
 0x4a6   :  { %3556 = vmatpush.bf16.msrb.mxu0 %v4636_v14  ;;  %3530 = vmatpush.bf16.msrb.mxu3 %v4888_v8  ;;  %v5063_v14 = vld [vmem:[#allocation2 + $0x2c] sm:$0xf0]  ;;  %v4875_v8 = vld [vmem:[#allocation2 + $0x3d8] sm:$0xf] }
 0x4a7   :  { %3510 = vmatpush.bf16.msrb.mxu2 %v4856_v20  ;;  %v4484_v20 = vor.u32 %v5087_v36, %v4483_v59  ;;  %v5082_v59 = vld [vmem:[#allocation2 + $0xcc] sm:$0xf] }
 0x4a8   :  { %v4477_v36 = vld [vmem:[#allocation2 + $0xe8] sm:$0xf0] }
 0x4a9   :  { %v4480_v31 = vor.u32 %v5082_v59, %v4477_v36 }
 0x4aa   :  { %3614 = vmatpush.bf16.msra.mxu0 %v4612_v11  ;;  %v4388_v11 = vor.u32 %v5063_v14, %v4387_v12  ;;  %v4443_v12 = vld [vmem:[#allocation2 + $0x88] sm:$0xf] }
 0x4ab   :  { %3511 = vmatpush.bf16.msrb.mxu2 %v4824_v29  ;;  %v5115_v29 = vld [vmem:[#allocation2 + $0x1d4] sm:$0xf]  ;;  %v5078_v14 = vld [vmem:[#allocation2 + $0xa4] sm:$0xf0] }
 0x4ae   :  { %3615 = vmatpush.bf16.msra.mxu0 %v4580_v63 }
 0x4af   :  { %3512 = vmatpush.bf16.msrb.mxu2 %v4792_v4  ;;  %v4616_v4 = vor.u32 %v5115_v29, %v4613_v13  ;;  %v4445_v29 = vld [vmem:[#allocation2 + $0xa8] sm:$0xf0]  ;;  %v4843_v13 = vld [vmem:[#allocation2 + $0x398] sm:$0xf] }
 0x4b2   :  { %3616 = vmatpush.bf16.msra.mxu0 %v4548_v17  ;;  %v4571_v17 = vld [vmem:[#allocation2 + $0x188] sm:$0xf] }
 0x4b6   :  { %v7446_v45 = vpop.permute.xlu1 %2559 }
 0x4b7   :  { %v2568_v23 = vsel %vm400_vm5, %v7408_v35, %v7446_v45  ;;  %v4892_v35 = vor.u32 %v5190_v24, %v4891_v0  ;;  %v4760_v0 = vor.u32 %v5153_v60, %v4757_v39  ;;  %v4515_v24 = vld [vmem:[#allocation2 + $0x110] sm:$0xf]  ;;  %v5107_v60 = vld [vmem:[#allocation2 + $0x194] sm:$0xf] }
 0x4b8   :  { %v7451_v46 = vpack.c.bf16 %v2568_v23, %v2568_v23  ;;  %v5154_v23 = vld [vmem:[#allocation2 + $0x30c] sm:$0xf]  ;;  %v4516_v34 = vor.u32 %v5095_v61, %v4515_v24  ;;  %v4581_v39 = vld [vmem:[#allocation2 + $0x1b0] sm:$0xf0]  ;;  %v4936_v61 = vor.u32 %v5195_v52, %v4933_v54 }
 0x4b9   :  { %3513 = vmatpush.bf16.msrb.mxu2 %v4760_v0  ;;  %v5110_v0 = vld [vmem:[#allocation2 + $0x1a4] sm:$0xf0]  ;;  %v5106_v24 = vld [vmem:[#allocation2 + $0x18c] sm:$0xf]  ;;  %v4584_v10 = vor.u32 %v5107_v60, %v4581_v39  ;;  %v4421_v52 = vld [vmem:[#allocation2 + $0x70] sm:$0xf0] }
 0x4ba   :  { %3466 = vmatmul.bf16.vlgmr.msra.gmra.mxu1 %v7451_v46  ;;  %3617 = vmatpush.bf16.msra.mxu0 %v4516_v34  ;;  %v4549_v34 = vld [vmem:[#allocation2 + $0x170] sm:$0xf0]  ;;  %v4413_v60 = vld [vmem:[#allocation2 + $0x68] sm:$0xf0]  ;;  %v4811_v39 = vld [vmem:[#allocation2 + $0x358] sm:$0xf] }
 0x4bb   :  { %3568 = vmatpush.bf16.msra.mxu1 %v4924_v57  ;;  %v4765_v57 = vld [vmem:[#allocation2 + $0x328] sm:$0xf0] }
 0x4bc   :  { %v4768_v16 = vor.u32 %v5154_v23, %v4765_v57  ;;  %v4608_v57 = vor.u32 %v5114_v49, %v4605_v1  ;;  %v4444_v49 = vor.u32 %v5078_v14, %v4443_v12  ;;  %v5067_v1 = vld [vmem:[#allocation2 + $0x54] sm:$0xf]  ;;  %v5186_v12 = vld [vmem:[#allocation2 + $0x40c] sm:$0xf] }
 0x4bd   :  { %3514 = vmatpush.bf16.msrb.mxu2 %v4728_v32  ;;  %v4893_v14 = vld [vmem:[#allocation2 + $0x428] sm:$0xf0] }
 0x4be   :  { %3618 = vmatpush.bf16.msra.mxu0 %v4484_v20  ;;  %v5184_v20 = vld [vmem:[#allocation2 + $0x3f4] sm:$0xf0] }
 0x4bf   :  { %3569 = vmatpush.bf16.msra.mxu1 %v4892_v35  ;;  %v4736_v35 = vor.u32 %v5146_v5, %v4733_v7  ;;  %v4572_v5 = vor.u32 %v5110_v0, %v4571_v17  ;;  %v5099_v7 = vld [vmem:[#allocation2 + $0x154] sm:$0xf]  ;;  %v4424_v17 = vor.u32 %v5067_v1, %v4421_v52  ;;  %v4683_v1 = vld [vmem:[#allocation2 + $0x258] sm:$0xf] }
 0x4c0   :  { %v5059_v0 = vld [vmem:[#allocation2 + $0x14] sm:$0xf]  ;;  %v5136_v52 = vld [vmem:[#allocation2 + $0x274] sm:$0xf0] }
 0x4c1   :  { %3515 = vmatpush.bf16.msrb.mxu2 %v4696_v27  ;;  %v4552_v27 = vor.u32 %v5099_v7, %v4549_v34  ;;  %v4939_v7 = vld [vmem:[#allocation2 + $0x458] sm:$0xf] }
 0x4c2   :  { %v5200_v34 = vld [vmem:[#allocation2 + $0x474] sm:$0xf0] }
 0x4c5   :  { %3516 = vmatpush.bf16.msrb.mxu2 %v4664_v15  ;;  %v5094_v15 = vld [vmem:[#allocation2 + $0x124] sm:$0xf0] }
 0x4c9   :  { %3517 = vmatpush.bf16.msrb.mxu2 %v4632_v41  ;;  %v4475_v41 = vld [vmem:[#allocation2 + $0xc8] sm:$0xf] }
 0x4ca   :  { %3505 = vmatmul.bf16.vlgmr.msrb.gmra.mxu1 %v7451_v46 }
 0x4cb   :  { %3588 = vmatpush.bf16.msrb.mxu1 %v4864_v3  ;;  %v4452_v3 = vor.u32 %v5079_v55, %v4451_v19  ;;  %v4488_v19 = vor.u32 %v5083_v58, %v4485_v22  ;;  %v4476_v55 = vor.u32 %v5086_v6, %v4475_v41  ;;  %v5180_v58 = vld [vmem:[#allocation2 + $0x3dc] sm:$0xf]  ;;  %v4925_v41 = vld [vmem:[#allocation2 + $0x468] sm:$0xf0] }
 0x4cc   :  { %v4877_v22 = vld [vmem:[#allocation2 + $0x3f8] sm:$0xf0] }
 0x4cd   :  { %3619 = vmatpush.bf16.msra.mxu0 %v4452_v3  ;;  %v5075_v3 = vld [vmem:[#allocation2 + $0x94] sm:$0xf] }
 0x4cf   :  { %3589 = vmatpush.bf16.msrb.mxu1 %v4832_v37  ;;  %v5118_v37 = vld [vmem:[#allocation2 + $0x1e4] sm:$0xf0] }
 0x4d1   :  { %3620 = vmatpush.bf16.msra.mxu0 %v4420_v9  ;;  %v4876_v9 = vor.u32 %v5184_v20, %v4875_v8  ;;  %v4880_v8 = vor.u32 %v5180_v58, %v4877_v22  ;;  %v4803_v20 = vld [vmem:[#allocation2 + $0x350] sm:$0xf] }
 0x4d3   :  { %3590 = vmatpush.bf16.msrb.mxu1 %v4800_v56  ;;  %v4604_v56 = vor.u32 %v5118_v37, %v4603_v50  ;;  %v5176_v50 = vld [vmem:[#allocation2 + $0x3b4] sm:$0xf0]  ;;  %v4456_v37 = vor.u32 %v5075_v3, %v4453_v48  ;;  %v5167_v48 = vld [vmem:[#allocation2 + $0x36c] sm:$0xf0] }
 0x4d5   :  { %3621 = vmatpush.bf16.msra.mxu0 %v4388_v11  ;;  %v5074_v11 = vld [vmem:[#allocation2 + $0x8c] sm:$0xf] }
 0x4d6   :  { %v4448_v54 = vor.u32 %v5074_v11, %v4445_v29  ;;  %v4931_v29 = vld [vmem:[#allocation2 + $0x450] sm:$0xf] }
 0x4d7   :  { %3591 = vmatpush.bf16.msrb.mxu1 %v4768_v16  ;;  %v4573_v16 = vld [vmem:[#allocation2 + $0x1a8] sm:$0xf0] }
 0x4d8   :  { %v4576_v32 = vor.u32 %v5106_v24, %v4573_v16  ;;  %v4379_v16 = vld [vmem:[#allocation2 + $0x8] sm:$0xf] }
 0x4db   :  { %3592 = vmatpush.bf16.msrb.mxu1 %v4736_v35  ;;  %v4539_v35 = vld [vmem:[#allocation2 + $0x148] sm:$0xf] }
 0x4df   :  { %3593 = vmatpush.bf16.msrb.mxu1 %v4704_v33  ;;  %v4540_v33 = vor.u32 %v5102_v2, %v4539_v35  ;;  %v4779_v35 = vld [vmem:[#allocation2 + $0x318] sm:$0xf] }
 0x4e0   :  { %v5160_v2 = vld [vmem:[#allocation2 + $0x334] sm:$0xf0] }
 0x4e1   :  { %v4780_v26 = vor.u32 %v5160_v2, %v4779_v35  ;;  %v4869_v35 = vld [vmem:[#allocation2 + $0x3f0] sm:$0xf0] }
 0x4e3   :  { %3594 = vmatpush.bf16.msrb.mxu1 %v4672_v18  ;;  %v5090_v18 = vld [vmem:[#allocation2 + $0x10c] sm:$0xf] }
 0x4e4   :  { %v4512_v53 = vor.u32 %v5090_v18, %v4509_v44  ;;  %v4835_v18 = vld [vmem:[#allocation2 + $0x390] sm:$0xf]  ;;  %v4747_v44 = vld [vmem:[#allocation2 + $0x2d8] sm:$0xf] }
 0x4e7   :  { %3595 = vmatpush.bf16.msrb.mxu1 %v4640_v62  ;;  %v4508_v62 = vor.u32 %v5094_v15, %v4507_v42  ;;  %v5192_v42 = vld [vmem:[#allocation2 + $0x434] sm:$0xf0]  ;;  %v4868_v15 = vor.u32 %v5183_v51, %v4867_v43  ;;  %v4707_v43 = vld [vmem:[#allocation2 + $0x290] sm:$0xf] }
 0x4e8   :  { %v5143_v51 = vld [vmem:[#allocation2 + $0x2ac] sm:$0xf0] }
 0x50b   :  { %v2566_v63 = vpop.permute.xlu0 %2565 }
 0x50c   :  { %v2569_v40 = vsel %vm391_vm4, %v7446_v45, %v2566_v63  ;;  %v7457_v28 = vpack.c.bf16 %v2566_v63, %v2566_v63  ;;  %v5187_v45 = vld [vmem:[#allocation2 + $0x414] sm:$0xf]  ;;  %v4844_v63 = vor.u32 %v5176_v50, %v4843_v13  ;;  %v5199_v13 = vld [vmem:[#allocation2 + $0x46c] sm:$0xf0]  ;;  %v4804_v50 = vor.u32 %v5167_v48, %v4803_v20  ;;  %v5132_v20 = vld [vmem:[#allocation2 + $0x25c] sm:$0xf] }
 0x50d   :  { %v7459_v23 = vpack.c.bf16 %v2569_v40, %v2569_v40  ;;  %v4904_v30 = vor.u32 %v5187_v45, %v4901_v47  ;;  %v5070_v40 = vld [vmem:[#allocation2 + $0x64] sm:$0xf0]  ;;  %v5120_v48 = vld [vmem:[#allocation2 + $0x1f4] sm:$0xf0] }
 0x50e   :  { %4945 = vmatmul.msk.bf16.vlgmr.msra.gmra.mxu3 %vm382_vm3, %v7457_v28  ;;  %4947 = vmatmul.msk.bf16.vlgmr.msra.gmra.mxu1 %vm382_vm3, %v7457_v28  ;;  %v5062_v45 = vld [vmem:[#allocation2 + $0x24] sm:$0xf0] }
 0x50f   :  { %3653 = vmatpush.bf16.msra.mxu1 %v4616_v4  ;;  %3479 = vmatmul.bf16.vlgmr.msra.gmra.mxu2 %v7459_v23  ;;  %v4411_v4 = vld [vmem:[#allocation2 + $0x48] sm:$0xf] }
 0x510   :  { %3536 = vmatpush.bf16.msra.mxu3 %v4604_v56  ;;  %3557 = vmatmul.bf16.vlgmr.msrb.gmra.mxu0 %v7459_v23  ;;  %v5066_v56 = vld [vmem:[#allocation2 + $0x4c] sm:$0xf]  ;;  %v4412_v24 = vor.u32 %v5070_v40, %v4411_v4  ;;  %v5164_v4 = vld [vmem:[#allocation2 + $0x35c] sm:$0xf] }
 0x511   :  { %3575 = vmatpush.bf16.msra.mxu2 %v4608_v57  ;;  %3685 = vmatpush.bf16.msrb.mxu0 %v4936_v61  ;;  %v5168_v57 = vld [vmem:[#allocation2 + $0x374] sm:$0xf0]  ;;  %v4389_v61 = vld [vmem:[#allocation2 + $0x30] sm:$0xf0]  ;;  %v4416_v47 = vor.u32 %v5066_v56, %v4413_v60  ;;  %v4813_v40 = vld [vmem:[#allocation2 + $0x378] sm:$0xf0]  ;;  %v4932_v56 = vor.u32 %v5199_v13, %v4931_v29  ;;  %v4684_v60 = vor.u32 %v5136_v52, %v4683_v1 }
 0x512   :  { %v5124_v29 = vld [vmem:[#allocation2 + $0x21c] sm:$0xf]  ;;  %v5112_v1 = vld [vmem:[#allocation2 + $0x1b4] sm:$0xf0]  ;;  %v5147_v52 = vld [vmem:[#allocation2 + $0x2d4] sm:$0xf] }
 0x513   :  { %3654 = vmatpush.bf16.msra.mxu1 %v4584_v10  ;;  %v4812_v10 = vor.u32 %v5168_v57, %v4811_v39  ;;  %v4899_v39 = vld [vmem:[#allocation2 + $0x410] sm:$0xf]  ;;  %v4653_v13 = vld [vmem:[#allocation2 + $0x238] sm:$0xf0] }
 0x514   :  { %3537 = vmatpush.bf16.msra.mxu3 %v4572_v5  ;;  %v5058_v5 = vld [vmem:[#allocation2 + $0xc] sm:$0xf]  ;;  %v5191_v57 = vld [vmem:[#allocation2 + $0x42c] sm:$0xf0] }
 0x515   :  { %3576 = vmatpush.bf16.msra.mxu2 %v4576_v32  ;;  %3686 = vmatpush.bf16.msrb.mxu0 %v4904_v30  ;;  %v4381_v32 = vld [vmem:[#allocation2 + $0x28] sm:$0xf0]  ;;  %v4392_v30 = vor.u32 %v5059_v0, %v4389_v61  ;;  %v4816_v0 = vor.u32 %v5164_v4, %v4813_v40  ;;  %v4651_v61 = vld [vmem:[#allocation2 + $0x218] sm:$0xf] }
 0x516   :  { %v4384_v25 = vor.u32 %v5058_v5, %v4381_v32  ;;  %v5179_v32 = vld [vmem:[#allocation2 + $0x3d4] sm:$0xf] }
 0x517   :  { %3655 = vmatpush.bf16.msra.mxu1 %v4552_v27  ;;  %v4380_v27 = vor.u32 %v5062_v45, %v4379_v16  ;;  %v5128_v16 = vld [vmem:[#allocation2 + $0x234] sm:$0xf0]  ;;  %v5151_v45 = vld [vmem:[#allocation2 + $0x2ec] sm:$0xf0] }
 0x518   :  { %3538 = vmatpush.bf16.msra.mxu3 %v4540_v33  ;;  %v4940_v33 = vor.u32 %v5200_v34, %v4939_v7  ;;  %v4900_v7 = vor.u32 %v5191_v57, %v4899_v39  ;;  %v4652_v34 = vor.u32 %v5128_v16, %v4651_v61  ;;  %v5139_v39 = vld [vmem:[#allocation2 + $0x294] sm:$0xf]  ;;  %v4523_v61 = vld [vmem:[#allocation2 + $0x118] sm:$0xf] }
 0x519   :  { %3577 = vmatpush.bf16.msra.mxu2 %v4544_v21  ;;  %v4907_v21 = vld [vmem:[#allocation2 + $0x418] sm:$0xf]  ;;  %v4709_v57 = vld [vmem:[#allocation2 + $0x2b0] sm:$0xf0] }
 0x51a   :  { %v4908_v6 = vor.u32 %v5192_v42, %v4907_v21  ;;  %v4837_v21 = vld [vmem:[#allocation2 + $0x3b0] sm:$0xf0]  ;;  %v4708_v42 = vor.u32 %v5143_v51, %v4707_v43  ;;  %v5096_v16 = vld [vmem:[#allocation2 + $0x134] sm:$0xf0]  ;;  %v4621_v43 = vld [vmem:[#allocation2 + $0x1f8] sm:$0xf0] }
 0x51b   :  { %3656 = vmatpush.bf16.msra.mxu1 %v4520_v38  ;;  %v5152_v38 = vld [vmem:[#allocation2 + $0x2f4] sm:$0xf0] }
 0x51c   :  { %3539 = vmatpush.bf16.msra.mxu3 %v4508_v62  ;;  %v5175_v62 = vld [vmem:[#allocation2 + $0x3ac] sm:$0xf0]  ;;  %v4748_v59 = vor.u32 %v5152_v38, %v4747_v44  ;;  %v5140_v38 = vld [vmem:[#allocation2 + $0x29c] sm:$0xf] }
 0x51d   :  { %3578 = vmatpush.bf16.msra.mxu2 %v4512_v53  ;;  %v5194_v53 = vld [vmem:[#allocation2 + $0x44c] sm:$0xf]  ;;  %v4836_v36 = vor.u32 %v5175_v62, %v4835_v18  ;;  %v4675_v18 = vld [vmem:[#allocation2 + $0x250] sm:$0xf]  ;;  %v4717_v62 = vld [vmem:[#allocation2 + $0x2b8] sm:$0xf0] }
 0x51e   :  { %4946 = vmatmul.msk.bf16.vlgmr.msrb.gmra.mxu3 %vm382_vm3, %v7457_v28  ;;  %3596 = vmatmul.bf16.vlgmr.msrb.gmra.mxu1 %v7459_v23  ;;  %v4928_v3 = vor.u32 %v5194_v53, %v4925_v41  ;;  %v5135_v44 = vld [vmem:[#allocation2 + $0x26c] sm:$0xf0]  ;;  %v5163_v53 = vld [vmem:[#allocation2 + $0x354] sm:$0xf] }
 0x51f   :  { %3657 = vmatpush.bf16.msra.mxu1 %v4488_v19  ;;  %3518 = vmatmul.bf16.vlgmr.msrb.gmra.mxu2 %v7459_v23  ;;  %v4715_v19 = vld [vmem:[#allocation2 + $0x298] sm:$0xf]  ;;  %v4805_v41 = vld [vmem:[#allocation2 + $0x370] sm:$0xf0] }
 0x520   :  { %3540 = vmatpush.bf16.msra.mxu3 %v4476_v55  ;;  %3622 = vmatmul.bf16.vlgmr.msra.gmra.mxu0 %v7451_v46  ;;  %v5144_v55 = vld [vmem:[#allocation2 + $0x2b4] sm:$0xf0] }
 0x521   :  { %3579 = vmatpush.bf16.msra.mxu2 %v4480_v31  ;;  %3705 = vmatpush.bf16.msra.mxu0 %v4876_v9  ;;  %v5172_v31 = vld [vmem:[#allocation2 + $0x39c] sm:$0xf]  ;;  %v4716_v11 = vor.u32 %v5144_v55, %v4715_v19  ;;  %v4808_v55 = vor.u32 %v5163_v53, %v4805_v41  ;;  %v4395_v53 = vld [vmem:[#allocation2 + $0x18] sm:$0xf] }
 0x522   :  { %v4845_v9 = vld [vmem:[#allocation2 + $0x3b8] sm:$0xf0]  ;;  %v5064_v41 = vld [vmem:[#allocation2 + $0x34] sm:$0xf0] }
 0x523   :  { %3658 = vmatpush.bf16.msra.mxu1 %v4456_v37  ;;  %v4848_v37 = vor.u32 %v5172_v31, %v4845_v9  ;;  %v4685_v19 = vld [vmem:[#allocation2 + $0x278] sm:$0xf0]  ;;  %v5155_v31 = vld [vmem:[#allocation2 + $0x314] sm:$0xf] }
 0x524   :  { %3541 = vmatpush.bf16.msra.mxu3 %v4444_v49  ;;  %v4771_v49 = vld [vmem:[#allocation2 + $0x310] sm:$0xf]  ;;  %v4773_v9 = vld [vmem:[#allocation2 + $0x330] sm:$0xf0] }
 0x525   :  { %3580 = vmatpush.bf16.msra.mxu2 %v4448_v54  ;;  %3706 = vmatpush.bf16.msra.mxu0 %v4844_v63  ;;  %v4896_v54 = vor.u32 %v5186_v12, %v4893_v14  ;;  %v5159_v63 = vld [vmem:[#allocation2 + $0x32c] sm:$0xf0]  ;;  %v4688_v14 = vor.u32 %v5132_v20, %v4685_v19  ;;  %v4525_v20 = vld [vmem:[#allocation2 + $0x138] sm:$0xf0]  ;;  %v4396_v19 = vor.u32 %v5064_v41, %v4395_v53 }
 0x527   :  { %3659 = vmatpush.bf16.msra.mxu1 %v4424_v17  ;;  %v4772_v17 = vor.u32 %v5159_v63, %v4771_v49  ;;  %v4587_v49 = vld [vmem:[#allocation2 + $0x198] sm:$0xf]  ;;  %v4656_v63 = vor.u32 %v5124_v29, %v4653_v13  ;;  %v4461_v29 = vld [vmem:[#allocation2 + $0xb8] sm:$0xf0] }
 0x528   :  { %3542 = vmatpush.bf16.msra.mxu3 %v4412_v24  ;;  %v4739_v24 = vld [vmem:[#allocation2 + $0x2d0] sm:$0xf]  ;;  %v4588_v4 = vor.u32 %v5112_v1, %v4587_v49  ;;  %v4429_v49 = vld [vmem:[#allocation2 + $0x78] sm:$0xf0] }
 0x529   :  { %3581 = vmatpush.bf16.msra.mxu2 %v4416_v47  ;;  %3707 = vmatpush.bf16.msra.mxu0 %v4812_v10  ;;  %v5156_v47 = vld [vmem:[#allocation2 + $0x31c] sm:$0xf]  ;;  %v4740_v2 = vor.u32 %v5151_v45, %v4739_v24  ;;  %v4712_v24 = vor.u32 %v5139_v39, %v4709_v57  ;;  %v5131_v45 = vld [vmem:[#allocation2 + $0x254] sm:$0xf]  ;;  %v4957_v39 = vld [vmem:[%s7573_s9 + $0x20] sm:$0x10] }
 0x52a   :  { %v4781_v10 = vld [vmem:[#allocation2 + $0x338] sm:$0xf0]  ;;  %v7510_v57 = vld [vmem:[%s7572_s8] sm:$0xff]  ;;  %s3951_s8 = sshll.u32 %s7575_s11, 4  ;;  %s3952_s8 = int_to_ptr.hbm [resolvable:$true] %s3951_s8 }
 0x52b   :  { %3660 = vmatpush.bf16.msra.mxu1 %v4392_v30  ;;  %v4784_v30 = vor.u32 %v5156_v47, %v4781_v10  ;;  %v4677_v47 = vld [vmem:[#allocation2 + $0x270] sm:$0xf0]  ;;  %v4524_v10 = vor.u32 %v5096_v16, %v4523_v61 }
 0x52c   :  { %3543 = vmatpush.bf16.msra.mxu3 %v4380_v27  ;;  %v5148_v27 = vld [vmem:[#allocation2 + $0x2dc] sm:$0xf] }
 0x52d   :  { %3582 = vmatpush.bf16.msra.mxu2 %v4384_v25  ;;  %3708 = vmatpush.bf16.msra.mxu0 %v4780_v26  ;;  %v4872_v25 = vor.u32 %v5179_v32, %v4869_v35  ;;  %v5171_v26 = vld [vmem:[#allocation2 + $0x394] sm:$0xf]  ;;  %v5088_v32 = vld [vmem:[#allocation2 + $0xf4] sm:$0xf0] }
 0x52e   :  { %3661 = vmatmul.bf16.vlgmr.msra.gmra.mxu1 %v7451_v46  ;;  %v4840_v22 = vor.u32 %v5171_v26, %v4837_v21  ;;  %v5123_v35 = vld [vmem:[#allocation2 + $0x214] sm:$0xf]  ;;  %v5108_v21 = vld [vmem:[#allocation2 + $0x19c] sm:$0xf] }
 0x52f   :  { %3724 = vmatpush.bf16.msrb.mxu1 %v4940_v33  ;;  %3544 = vmatmul.bf16.vlgmr.msra.gmra.mxu3 %v7451_v46  ;;  %v4749_v33 = vld [vmem:[#allocation2 + $0x2f8] sm:$0xf0] }
 0x530   :  { %3583 = vmatmul.bf16.vlgmr.msra.gmra.mxu2 %v7451_v46  ;;  %4950 = vmatmul.msk.bf16.vlgmr.msrb.gmra.mxu0 %vm382_vm3, %v7457_v28 }
 0x531   :  { %3627 = vmatpush.bf16.msrb.mxu2 %v4868_v15  ;;  %3709 = vmatpush.bf16.msra.mxu0 %v4748_v59  ;;  %v4752_v15 = vor.u32 %v5148_v27, %v4749_v33  ;;  %v4720_v59 = vor.u32 %v5140_v38, %v4717_v62  ;;  %v4459_v33 = vld [vmem:[#allocation2 + $0x98] sm:$0xf]  ;;  %v5100_v62 = vld [vmem:[#allocation2 + $0x15c] sm:$0xf] }
 0x532   :  { %3607 = vmatpush.bf16.msrb.mxu3 %v4928_v3  ;;  %v4619_v3 = vld [vmem:[#allocation2 + $0x1d8] sm:$0xf] }
 0x533   :  { %3725 = vmatpush.bf16.msrb.mxu1 %v4908_v6  ;;  %v4676_v6 = vor.u32 %v5135_v44, %v4675_v18  ;;  %v4427_v18 = vld [vmem:[#allocation2 + $0x58] sm:$0xf] }
 0x534   :  { %v5072_v44 = vld [vmem:[#allocation2 + $0x74] sm:$0xf0] }
 0x535   :  { %3628 = vmatpush.bf16.msrb.mxu2 %v4836_v36  ;;  %3710 = vmatpush.bf16.msra.mxu0 %v4716_v11  ;;  %v4643_v36 = vld [vmem:[#allocation2 + $0x210] sm:$0xf]  ;;  %v4620_v11 = vor.u32 %v5120_v48, %v4619_v3  ;;  %v5188_v48 = vld [vmem:[#allocation2 + $0x41c] sm:$0xf] }
 0x536   :  { %3608 = vmatpush.bf16.msrb.mxu3 %v4896_v54  ;;  %v4741_v54 = vld [vmem:[#allocation2 + $0x2f0] sm:$0xf0] }
 0x537   :  { %3744 = vmatpush.bf16.msra.mxu1 %v4880_v8  ;;  %v7477_v5 = vpop.f32.mrf.mxu1  ;;  %v5127_v8 = vld [vmem:[#allocation2 + $0x22c] sm:$0xf0]  ;;  %v4744_v40 = vor.u32 %v5147_v52, %v4741_v54  ;;  %v5060_v52 = vld [vmem:[#allocation2 + $0x1c] sm:$0xf] }
 0x538   :  { %v4644_v12 = vor.u32 %v5127_v8, %v4643_v36  ;;  %v4941_v36 = vld [vmem:[#allocation2 + $0x478] sm:$0xf0] }
 0x539   :  { %3629 = vmatpush.bf16.msrb.mxu2 %v4804_v50  ;;  %3711 = vmatpush.bf16.msra.mxu0 %v4684_v60  ;;  %v5104_v60 = vld [vmem:[#allocation2 + $0x174] sm:$0xf0]  ;;  %v5092_v8 = vld [vmem:[#allocation2 + $0x11c] sm:$0xf] }
 0x53a   :  { %3646 = vmatpush.bf16.msra.mxu3 %v4932_v56  ;;  %v4555_v56 = vld [vmem:[#allocation2 + $0x158] sm:$0xf]  ;;  %v4528_v3 = vor.u32 %v5092_v8, %v4525_v20  ;;  %v4397_v54 = vld [vmem:[#allocation2 + $0x38] sm:$0xf0] }
 0x53b   :  { %3745 = vmatpush.bf16.msra.mxu1 %v4848_v37  ;;  %v4776_v37 = vor.u32 %v5155_v31, %v4773_v9  ;;  %v4909_v31 = vld [vmem:[#allocation2 + $0x438] sm:$0xf0] }
 0x53c   :  { %v5084_v9 = vld [vmem:[#allocation2 + $0xdc] sm:$0xf] }
 0x53d   :  { %3630 = vmatpush.bf16.msrb.mxu2 %v4772_v17  ;;  %3712 = vmatpush.bf16.msra.mxu0 %v4652_v34  ;;  %v4556_v17 = vor.u32 %v5104_v60, %v4555_v56  ;;  %v4491_v34 = vld [vmem:[#allocation2 + $0xd8] sm:$0xf]  ;;  %v5201_v60 = vld [vmem:[%s7573_s9 + $0x4] sm:$0xf] }
 0x53e   :  { %3647 = vmatpush.bf16.msra.mxu3 %v4900_v7  ;;  %4951 = vmatmul.msk.bf16.vlgmr.msrb.gmra.mxu1 %vm382_vm3, %v7457_v28  ;;  %v4680_v7 = vor.u32 %v5131_v45, %v4677_v47  ;;  %v4492_v51 = vor.u32 %v5088_v32, %v4491_v34 }
 0x53f   :  { %3746 = vmatpush.bf16.msra.mxu1 %v4816_v0  ;;  %4948 = vmatmul.msk.bf16.vlgmr.msrb.gmra.mxu3 %vm382_vm3, %v7457_v28  ;;  %v3469_v58 = vpop.f32.mrf.mxu1 }
 0x540   :  { %3713 = vmatmul.bf16.vlgmr.msra.gmra.mxu0 %v7459_v23  ;;  %v4557_v58 = vld [vmem:[#allocation2 + $0x178] sm:$0xf0] }
 0x541   :  { %3631 = vmatpush.bf16.msrb.mxu2 %v4740_v2  ;;  %v4645_v2 = vld [vmem:[#allocation2 + $0x230] sm:$0xf0] }
 0x542   :  { %3666 = vmatpush.bf16.msrb.mxu3 %v4872_v25  ;;  %v4648_v27 = vor.u32 %v5123_v35, %v4645_v2  ;;  %v5080_v25 = vld [vmem:[#allocation2 + $0xb4] sm:$0xf0] }
 0x543   :  { %3747 = vmatpush.bf16.msra.mxu1 %v4784_v30  ;;  %v5116_v30 = vld [vmem:[#allocation2 + $0x1dc] sm:$0xf] }
 0x544   :  { %v4624_v26 = vor.u32 %v5116_v30, %v4621_v43  ;;  %v4963_v43 = vld [vmem:[%s7573_s9 + $0x8] sm:$0xf] }
 0x545   :  { %3632 = vmatpush.bf16.msrb.mxu2 %v4708_v42  ;;  %v4589_v42 = vld [vmem:[#allocation2 + $0x1b8] sm:$0xf0] }
 0x546   :  { %3667 = vmatpush.bf16.msrb.mxu3 %v4840_v22  ;;  %v4592_v38 = vor.u32 %v5108_v21, %v4589_v42  ;;  %v4428_v22 = vor.u32 %v5072_v44, %v4427_v18 }
 0x547   :  { %3748 = vmatpush.bf16.msra.mxu1 %v4752_v15  ;;  %v7484_v50 = vpop.f32.mrf.mxu1  ;;  %v4460_v15 = vor.u32 %v5080_v25, %v4459_v33 }
 0x549   :  { %3633 = vmatpush.bf16.msrb.mxu2 %v4676_v6  ;;  %v4560_v6 = vor.u32 %v5100_v62, %v4557_v58  ;;  %v5202_v62 = vld [vmem:[%s7573_s9 + $0xc] sm:$0xf] }
 0x54a   :  { %3668 = vmatpush.bf16.msrb.mxu3 %v4808_v55  ;;  %v4965_v58 = vld [vmem:[%s7573_s9 + $0x28] sm:$0x10] }
 0x54b   :  { %3749 = vmatpush.bf16.msra.mxu1 %v4720_v59  ;;  %v5196_v59 = vld [vmem:[#allocation2 + $0x45c] sm:$0xf] }
 0x54c   :  { %v4944_v55 = vor.u32 %v5196_v59, %v4941_v36  ;;  %v2721_v36 = vperm.slane %v7510_v57, 2 }
 0x54d   :  { %3634 = vmatpush.bf16.msrb.mxu2 %v4644_v12  ;;  %v4493_v12 = vld [vmem:[#allocation2 + $0xf8] sm:$0xf0] }
 0x54e   :  { %3669 = vmatpush.bf16.msrb.mxu3 %v4776_v37  ;;  %v5068_v37 = vld [vmem:[#allocation2 + $0x5c] sm:$0xf] }
 0x54f   :  { %3750 = vmatpush.bf16.msra.mxu1 %v4688_v14  ;;  %4949 = vmatmul.msk.bf16.vlgmr.msra.gmra.mxu3 %vm382_vm3, %v7457_v28  ;;  %v3508_v0 = vpop.f32.mrf.mxu1  ;;  %v4496_v14 = vor.u32 %v5084_v9, %v4493_v12  ;;  %v4432_v1 = vor.u32 %v5068_v37, %v4429_v49  ;;  %v4971_v9 = vld [vmem:[%s7573_s9 + $0x10] sm:$0xf] }
 0x550   :  { %3635 = vmatmul.bf16.vlgmr.msrb.gmra.mxu2 %v7459_v23  ;;  %v5207_v12 = vld [vmem:[%s7573_s9 + $0x2c] sm:$0x10] }
 0x551   :  { %3692 = vmatpush.bf16.msra.mxu2 %v4620_v11  ;;  %v5076_v11 = vld [vmem:[#allocation2 + $0x9c] sm:$0xf] }
 0x552   :  { %3670 = vmatpush.bf16.msrb.mxu3 %v4744_v40  ;;  %v4464_v13 = vor.u32 %v5076_v11, %v4461_v29  ;;  %v5205_v40 = vld [vmem:[%s7573_s9 + $0x1c] sm:$0x10]  ;;  %v2722_v11 = vperm.slane %v7510_v57, 3 }
 0x553   :  { %3751 = vmatpush.bf16.msra.mxu1 %v4656_v63  ;;  %v4400_v63 = vor.u32 %v5060_v52, %v4397_v54 }
 0x555   :  { %3693 = vmatpush.bf16.msra.mxu2 %v4588_v4  ;;  %v4955_v4 = vld [vmem:[%s7573_s9] sm:$0xf] }
 0x556   :  { %3752 = vmatmul.bf16.vlgmr.msra.gmra.mxu1 %v7459_v23  ;;  %3671 = vmatpush.bf16.msrb.mxu3 %v4712_v24  ;;  %v4956_v56 = vor.u32 %v5205_v40, %v4955_v4 }
 0x558   :  { %3845 = vmatpush.bf16.xpose.msrb.mxu0 %v4956_v56 }
 0x559   :  { %3694 = vmatpush.bf16.msra.mxu2 %v4556_v17  ;;  %v4960_v17 = vor.u32 %v5201_v60, %v4957_v39 }
 0x55a   :  { %3672 = vmatpush.bf16.msrb.mxu3 %v4680_v7 }
 0x55d   :  { %3695 = vmatpush.bf16.msra.mxu2 %v4524_v10 }
 0x55e   :  { %3673 = vmatpush.bf16.msrb.mxu3 %v4648_v27  ;;  %v2720_v27 = vperm.slane %v7510_v57, 1 }
 0x560   :  { %v3507_v25 = vadd.f32 %v7484_v50, %v2720_v27  ;;  %v4981_v27 = vld [vmem:[%s7573_s9 + $0x38] sm:$0x10] }
 0x561   :  { %3696 = vmatpush.bf16.msra.mxu2 %v4492_v51  ;;  %3674 = vmatmul.bf16.vlgmr.msrb.gmra.mxu3 %v7459_v23  ;;  %v4912_v23 = vor.u32 %v5188_v48, %v4909_v31 }
 0x562   :  { %3731 = vmatpush.bf16.msra.mxu3 %v4624_v26 }
 0x565   :  { %3697 = vmatpush.bf16.msra.mxu2 %v4460_v15 }
 0x566   :  { %3732 = vmatpush.bf16.msra.mxu3 %v4592_v38 }
 0x569   :  { %3698 = vmatpush.bf16.msra.mxu2 %v4428_v22  ;;  %v4968_v22 = vor.u32 %v5202_v62, %v4965_v58  ;;  %v2725_v58 = vperm.slane %v7510_v57, 6 }
 0x56a   :  { %3733 = vmatpush.bf16.msra.mxu3 %v4560_v6 }
 0x56b   :  { %3884 = vmatpush.bf16.xpose.msra.mxu0 %v4968_v22 }
 0x56d   :  { %3699 = vmatpush.bf16.msra.mxu2 %v4396_v19 }
 0x56e   :  { %3734 = vmatpush.bf16.msra.mxu3 %v4528_v3 }
 0x570   :  { %3700 = vmatmul.bf16.vlgmr.msra.gmra.mxu2 %v7451_v46 }
 0x571   :  { %3763 = vmatpush.bf16.msrb.mxu2 %v4944_v55 }
 0x572   :  { %3735 = vmatpush.bf16.msra.mxu3 %v4496_v14 }
 0x575   :  { %3764 = vmatpush.bf16.msrb.mxu2 %v4912_v23  ;;  %v4972_v23 = vor.u32 %v5207_v12, %v4971_v9 }
 0x576   :  { %3736 = vmatpush.bf16.msra.mxu3 %v4464_v13 }
 0x577   :  { %3897 = vmatpush.bf16.xpose.msrb.mxu1 %v4972_v23 }
 0x579   :  { %3858 = vmatpush.bf16.xpose.msra.mxu2 %v4960_v17  ;;  %v5203_v17 = vld [vmem:[%s7573_s9 + $0x14] sm:$0xf] }
 0x57a   :  { %3737 = vmatpush.bf16.msra.mxu3 %v4432_v1 }
 0x57e   :  { %3738 = vmatpush.bf16.msra.mxu3 %v4400_v63 }
 0x580   :  { %4952 = vmatmul.msk.bf16.vlgmr.msrb.gmra.mxu2 %vm382_vm3, %v7457_v28  ;;  %v2719_v28 = vperm.slane %v7510_v57, 0 }
 0x581   :  { %3739 = vmatmul.bf16.vlgmr.msra.gmra.mxu3 %v7451_v46 }
 0x582   :  { %v3468_v24 = vadd.f32 %v7477_v5, %v2719_v28  ;;  %v5206_v5 = vld [vmem:[%s7573_s9 + $0x24] sm:$0x10] }
 0x583   :  { %v4964_v51 = vor.u32 %v5206_v5, %v4963_v43 }
 0x585   :  { %3871 = vmatpush.bf16.xpose.msrb.mxu3 %v4964_v51  ;;  %v5204_v51 = vld [vmem:[%s7573_s9 + $0x1c] sm:$0xf] }
 0x58b   :  { %v3571_v0 = vpop.f32.mrf.mxu1 }
 0x58d   :  { %v3558_v46 = vpop.f32.mrf.mxu0 }
 0x591   :  { %v3493_v61 = vpop.f32.mrf.mxu3 }
 0x592   :  { %v3480_v16 = vpop.f32.mrf.mxu2 }
 0x593   :  { %v3481_v45 = vadd.f32 %v3480_v16, %v3468_v24  ;;  %v3573_v47 = vpop.f32.mrf.mxu1  ;;  %v2723_v24 = vperm.slane %v7510_v57, 4 }
 0x595   :  { %v3494_v10 = vadd.f32 %v3493_v61, %v3481_v45  ;;  %v3560_v7 = vpop.f32.mrf.mxu0 }
 0x597   :  { %v3770_v34 = vmax.f32 %v3494_v10, 0.0 }
 0x599   :  { %v3778_v32 = vpack.c.bf16 %v3770_v34, %v3770_v34  ;;  %v3495_v35 = vpop.f32.mrf.mxu3 }
 0x59a   :  { %v3482_v2 = vpop.f32.mrf.mxu2  ;;  %v4979_v35 = vld [vmem:[%s7573_s9 + $0x18] sm:$0xf] }
 0x59b   :  { %v3597_v30 = vpop.f32.mrf.mxu1  ;;  %3846 = vmatmul.bf16.vlgmr.msrb.gmra.mxu0 %v3778_v32  ;;  %v5208_v2 = vld [vmem:[%s7573_s9 + $0x34] sm:$0x10] }
 0x59c   :  { %v4980_v43 = vor.u32 %v5208_v2, %v4979_v35 }
 0x59d   :  { %v3623_v33 = vpop.f32.mrf.mxu0 }
 0x59e   :  { %v3624_v16 = vadd.f32 %v3623_v33, %v2723_v24  ;;  %3923 = vmatpush.bf16.xpose.msra.mxu3 %v4980_v43  ;;  %v4984_v33 = vor.u32 %v5204_v51, %v4981_v27 }
 0x5a0   :  { %3936 = vmatpush.bf16.xpose.msrb.mxu0 %v4984_v33 }
 0x5a1   :  { %v3532_v26 = vpop.f32.mrf.mxu3 }
 0x5a2   :  { %v3519_v21 = vpop.f32.mrf.mxu2 }
 0x5a3   :  { %v3520_v42 = vadd.f32 %v3519_v21, %v3507_v25  ;;  %v3599_v15 = vpop.f32.mrf.mxu1 }
 0x5a5   :  { %v3533_v18 = vadd.f32 %v3532_v26, %v3520_v42  ;;  %v3625_v44 = vpop.f32.mrf.mxu0  ;;  %v2724_v26 = vperm.slane %v7510_v57, 5 }
 0x5a7   :  { %v3771_v38 = vmax.f32 %v3533_v18, 0.0 }
 0x5a9   :  { %v3779_v53 = vpack.c.bf16 %v3771_v38, %v3771_v38  ;;  %v3534_v41 = vpop.f32.mrf.mxu3 }
 0x5aa   :  { %v3521_v6 = vpop.f32.mrf.mxu2 }
 0x5ab   :  { %v3662_v50 = vpop.f32.mrf.mxu1  ;;  %3859 = vmatmul.bf16.vlgmr.msra.gmra.mxu2 %v3779_v53 }
 0x5ac   :  { %v3663_v21 = vadd.f32 %v3662_v50, %v2724_v26 }
 0x5ad   :  { %v3688_v59 = vpop.f32.mrf.mxu0 }
 0x5b2   :  { %v3545_v8 = vpop.f32.mrf.mxu3 }
 0x5b3   :  { %v3546_v20 = vadd.f32 %v3545_v8, %v2721_v36  ;;  %v3584_v19 = vpop.f32.mrf.mxu2  ;;  %v3664_v55 = vpop.f32.mrf.mxu1 }
 0x5b4   :  { %v3585_v1 = vadd.f32 %v3584_v19, %v2722_v11  ;;  %v2726_v19 = vperm.slane %v7510_v57, 7 }
 0x5b5   :  { %v3559_v3 = vadd.f32 %v3558_v46, %v3546_v20  ;;  %v3690_v48 = vpop.f32.mrf.mxu0 }
 0x5b6   :  { %v3598_v54 = vadd.f32 %v3597_v30, %v3585_v1 }
 0x5b7   :  { %v3572_v31 = vadd.f32 %v3571_v0, %v3559_v3  ;;  %v4973_v0 = vld [vmem:[%s7573_s9 + $0x30] sm:$0x10] }
 0x5b8   :  { %v4976_v46 = vor.u32 %v5203_v17, %v4973_v0 }
 0x5b9   :  { %v3772_v14 = vmax.f32 %v3572_v31, 0.0 }
 0x5ba   :  { %v3547_v29 = vpop.f32.mrf.mxu3  ;;  %3910 = vmatpush.bf16.xpose.msrb.mxu2 %v4976_v46 }
 0x5bb   :  { %v3780_v13 = vpack.c.bf16 %v3772_v14, %v3772_v14  ;;  %v3586_v37 = vpop.f32.mrf.mxu2  ;;  %v3727_v49 = vpop.f32.mrf.mxu1  ;;  %v5529_v29 = vld [vmem:[%s7574_s10] ss:$0 sm:$0xff]  ;;  %s3949_s10 = sshll.u32 %s5589_s19, 4  ;;  %s3950_s10 = int_to_ptr.vmem [resolvable:$true] %s3949_s10 }
 0x5bd   :  { %v3714_v52 = vpop.f32.mrf.mxu0  ;;  %3872 = vmatmul.bf16.vlgmr.msrb.gmra.mxu3 %v3780_v13 }
 0x5c2   :  { %v3610_v63 = vpop.f32.mrf.mxu3 }
 0x5c3   :  { %v3611_v4 = vadd.f32 %v3610_v63, %v3598_v54  ;;  %v3729_v40 = vpop.f32.mrf.mxu1 }
 0x5c5   :  { %v3773_v56 = vmax.f32 %v3611_v4, 0.0  ;;  %v3716_v60 = vpop.f32.mrf.mxu0 }
 0x5c7   :  { %v3781_v39 = vpack.c.bf16 %v3773_v56, %v3773_v56 }
 0x5c9   :  { %3885 = vmatmul.bf16.vlgmr.msra.gmra.mxu0 %v3781_v39 }
 0x5ca   :  { %v3612_v28 = vpop.f32.mrf.mxu3 }
 0x5d2   :  { %v3649_v10 = vpop.f32.mrf.mxu3 }
 0x5d3   :  { %v3753_v61 = vpop.f32.mrf.mxu1  ;;  %v3636_v45 = vpop.f32.mrf.mxu2 }
 0x5d4   :  { %v3637_v47 = vadd.f32 %v3636_v45, %v3624_v16 }
 0x5d6   :  { %v3650_v7 = vadd.f32 %v3649_v10, %v3637_v47 }
 0x5d8   :  { %v3774_v34 = vmax.f32 %v3650_v7, 0.0 }
 0x5da   :  { %v3782_v30 = vpack.c.bf16 %v3774_v34, %v3774_v34  ;;  %v3651_v25 = vpop.f32.mrf.mxu3 }
 0x5db   :  { %v3755_v32 = vpop.f32.mrf.mxu1  ;;  %v3638_v5 = vpop.f32.mrf.mxu2 }
 0x5dc   :  { %3898 = vmatmul.bf16.vlgmr.msrb.gmra.mxu1 %v3782_v30 }
 0x5e4   :  { %v3675_v42 = vpop.f32.mrf.mxu3 }
 0x5e5   :  { %v3676_v15 = vadd.f32 %v3675_v42, %v3663_v21 }
 0x5e7   :  { %v3689_v18 = vadd.f32 %v3688_v59, %v3676_v15 }
 0x5e9   :  { %v3775_v44 = vmax.f32 %v3689_v18, 0.0 }
 0x5eb   :  { %v3783_v38 = vpack.c.bf16 %v3775_v44, %v3775_v44 }
 0x5ec   :  { %v3677_v62 = vpop.f32.mrf.mxu3 }
 0x5ed   :  { %3911 = vmatmul.bf16.vlgmr.msrb.gmra.mxu2 %v3783_v38 }
 0x5f3   :  { %v3701_v22 = vpop.f32.mrf.mxu2 }
 0x5f4   :  { %v3702_v53 = vadd.f32 %v3701_v22, %v2725_v58 }
 0x5f6   :  { %v3715_v41 = vadd.f32 %v3714_v52, %v3702_v53 }
 0x5f8   :  { %v3728_v6 = vadd.f32 %v3727_v49, %v3715_v41 }
 0x5fa   :  { %v3776_v36 = vmax.f32 %v3728_v6, 0.0 }
 0x5fb   :  { %v3703_v8 = vpop.f32.mrf.mxu2 }
 0x5fc   :  { %v3784_v20 = vpack.c.bf16 %v3776_v36, %v3776_v36 }
 0x5fe   :  { %3924 = vmatmul.bf16.vlgmr.msra.gmra.mxu3 %v3784_v20 }
 0x603   :  { %v3766_v50 = vpop.f32.mrf.mxu2 }
 0x604   :  { %v3740_v55 = vpop.f32.mrf.mxu3 }
 0x605   :  { %v3741_v3 = vadd.f32 %v3740_v55, %v2726_v19 }
 0x607   :  { %v3754_v59 = vadd.f32 %v3753_v61, %v3741_v3 }
 0x609   :  { %v3767_v48 = vadd.f32 %v3766_v50, %v3754_v59 }
 0x60b   :  { %v3768_v31 = vpop.f32.mrf.mxu2  ;;  %v3777_v9 = vmax.f32 %v3767_v48, 0.0 }
 0x60c   :  { %v3742_v12 = vpop.f32.mrf.mxu3 }
 0x60d   :  { %v3785_v23 = vpack.c.bf16 %v3777_v9, %v3777_v9 }
 0x60f   :  { %3937 = vmatmul.bf16.vlgmr.msrb.gmra.mxu0 %v3785_v23 }
 0x618   :  { %v3847_v14 = vpop.f32.mrf.mxu0 }
 0x619   :  { %v3848_v13 = vadd.f32 %v5529_v29, %v3847_v14 }
 0x620   :  { %v3849_v11 = vpop.f32.mrf.mxu0 }
 0x62e   :  { %v3860_v37 = vpop.f32.mrf.mxu2 }
 0x62f   :  { %v3861_v49 = vadd.f32 %v3860_v37, %v3848_v13 }
 0x636   :  { %v3862_v57 = vpop.f32.mrf.mxu2 }
 0x640   :  { %v3873_v1 = vpop.f32.mrf.mxu3 }
 0x641   :  { %v3874_v17 = vadd.f32 %v3873_v1, %v3861_v49 }
 0x646   :  { %v3886_v52 = vpop.f32.mrf.mxu0 }
 0x647   :  { %v3887_v0 = vadd.f32 %v3886_v52, %v3874_v17 }
 0x648   :  { %v3875_v54 = vpop.f32.mrf.mxu3 }
 0x64e   :  { %v3888_v63 = vpop.f32.mrf.mxu0 }
 0x659   :  { %v3899_v4 = vpop.f32.mrf.mxu1 }
 0x65a   :  { %v3900_v28 = vadd.f32 %v3899_v4, %v3887_v0 }
 0x661   :  { %v3901_v40 = vpop.f32.mrf.mxu1 }
 0x670   :  { %v3912_v56 = vpop.f32.mrf.mxu2 }
 0x671   :  { %v3913_v24 = vadd.f32 %v3912_v56, %v3900_v28 }
 0x678   :  { %v3914_v60 = vpop.f32.mrf.mxu2 }
 0x681   :  { %v3925_v39 = vpop.f32.mrf.mxu3 }
 0x682   :  { %v3926_v61 = vadd.f32 %v3925_v39, %v3913_v24 }
 0x689   :  { %v3927_v46 = vpop.f32.mrf.mxu3 }
 0x68c   :  { %v3938_v16 = vpop.f32.mrf.mxu0 }
 0x68d   :  { %v3939_v45 = vadd.f32 %v3938_v16, %v3926_v61 }
 0x68f   :  { %3943 = vst.msk [vmem:[#allocation5] sm:$0x3] %vm3942_vm8, %v3939_v45 }
 0x690   :  { %3954 = dma.vmem_to_hbm [thread:$0]  %s3950_s10, 32, %s3952_s8, [#allocation4]  }
 0x694   :  { %v3940_v47 = vpop.f32.mrf.mxu0 }
 0x695   :  { %5580 = dma.done.wait [#allocation4], 32  }
 0x696   :  { %5581 = vsyncadd [#allocation4], 4294967264 }
 0x697   :  { %3959 = vsyncpa [#allocation3], 1 }
 0x698   :  { %3960 = vsyncpa [#allocation4], 1 }

</bundles_post_ra>
